<compile_context>
chip_gen: v7x
topology: tpu7x:2x2x1
jax: 0.10.0
libtpu: 0.0.40
codegen_flags: <defaults>
</compile_context>

<pallas_src>
import functools

import jax
import jax.numpy as jnp
from jax import lax
from jax.experimental import pallas as pl
from jax.experimental.pallas import tpu as pltpu

_BN_EPS = 1e-5


def _bottleneck_kernel(x_ref, w1_ref, w2_ref, w3_ref, bn_ref, out_ref, ypad_ref,
                       *, n, h, w):
    R, cin = x_ref.shape
    width = w1_ref.shape[1]
    cout = w3_ref.shape[1]

    def bn(y, g_row, b_row, c):
        # Training-mode BN with centered (two-pass) variance; data is VMEM-resident so the
        # second pass over y is nearly free and avoids E[y^2]-E[y]^2 cancellation.
        g = bn_ref[g_row:g_row + 1, 0:c]
        b = bn_ref[b_row:b_row + 1, 0:c]
        m = jnp.mean(y, axis=0, keepdims=True)
        d = y - m
        v = jnp.mean(d * d, axis=0, keepdims=True)
        return d * lax.rsqrt(v + _BN_EPS) * g + b

    # ---- conv1: 1x1 conv == channel matmul (bf16 MXU operands, f32 accumulate) ----
    y = jnp.dot(x_ref[...].astype(jnp.bfloat16), w1_ref[...],
                preferred_element_type=jnp.float32)                       # (R, width)
    y = jnp.maximum(bn(y, 0, 1, width), 0.0)

    # ---- conv2: 3x3, padding=1, stride=1 ----
    # Cast to bf16 BEFORE touching the halo scratch (halves bytes through the copy path),
    # write the interior once into a zero-bordered padded VMEM scratch, then feed 9 static
    # ref slices into 9 accumulating MXU matmuls (no im2col patches slab).
    yb = y.astype(jnp.bfloat16).reshape(n, h, w, width)
    ypad_ref[:, 0:1, :, :] = jnp.zeros((n, 1, w + 2, width), jnp.bfloat16)
    ypad_ref[:, h + 1:h + 2, :, :] = jnp.zeros((n, 1, w + 2, width), jnp.bfloat16)
    ypad_ref[:, :, 0:1, :] = jnp.zeros((n, h + 2, 1, width), jnp.bfloat16)
    ypad_ref[:, :, w + 1:w + 2, :] = jnp.zeros((n, h + 2, 1, width), jnp.bfloat16)
    ypad_ref[:, 1:h + 1, 1:w + 1, :] = yb

    acc = None
    for kh in range(3):
        for kw in range(3):
            tap = ypad_ref[:, kh:kh + h, kw:kw + w, :].reshape(R, width)  # bf16, static slice
            part = jnp.dot(tap, w2_ref[kh, kw], preferred_element_type=jnp.float32)
            acc = part if acc is None else acc + part
    y = jnp.maximum(bn(acc, 2, 3, width), 0.0)                            # (R, width)

    # ---- conv3: 1x1 conv + bn3 + residual add + relu (lane-dense store) ----
    y = jnp.dot(y.astype(jnp.bfloat16), w3_ref[...],
                preferred_element_type=jnp.float32)                       # (R, cout)
    y = bn(y, 4, 5, cout)
    y = jnp.maximum(y + x_ref[...], 0.0)     # identity path: Cin == Cout, re-read x here
    out_ref[...] = y.astype(out_ref.dtype)


def bottleneck_forward_nhwc(x, params, *, out_dtype=jnp.float32, vmem_limit_bytes=None):
    """x: (N, H, W, Cin) float32 NHWC.  params = (w1, w2, w3, g1, b1, g2, b2, g3, b3) with
    w1:(Cin,width), w2:(3,3,width,width) HWIO, w3:(width,Cout).  Returns (N, H, W, Cout)."""
    w1, w2, w3, g1, b1, g2, b2, g3, b3 = params
    n, h, w_, cin = x.shape
    width = w1.shape[1]
    cout = w3.shape[1]
    # Fused path hard-assumes the plain Bottleneck config (stride=1, groups=1, dilation=1,
    # no downsample) -- assert instead of silently producing wrong results.
    assert w1.shape == (cin, width) and w3.shape == (width, cout)
    assert w2.shape == (3, 3, width, width)
    assert cin == cout, "identity residual requires in_planes == planes*expansion (no downsample)"
    r = n * h * w_

    # Lane-dense 2-D views (contiguous fold; free in XLA).  TODO(synk): if Cout is not a
    # multiple of 128, fold W into the lane dim ((N*H, W*C)) to keep the writeback unmasked.
    x2 = x.reshape(r, cin).astype(jnp.float32)

    # MXU operands in bf16 (f32 accumulation inside the kernel).  In production, pre-pack once.
    w1b = w1.astype(jnp.bfloat16)
    w2b = w2.astype(jnp.bfloat16)
    w3b = w3.astype(jnp.bfloat16)

    # Pack the six BN gamma/beta vectors into one (6, Cmax) slab: a single DMA / VMEM buffer.
    cmax = max(width, cout)
    def _row(v):
        v = v.reshape(1, -1).astype(jnp.float32)
        return jnp.pad(v, ((0, 0), (0, cmax - v.shape[1])))
    bn_pack = jnp.concatenate([_row(g1), _row(b1), _row(g2), _row(b2), _row(g3), _row(b3)], axis=0)

    # VMEM budget with headroom below physical capacity (v7x has only 64 MiB physical).
    if vmem_limit_bytes is None:
        try:
            cap = pltpu.get_tpu_info().vmem_capacity_bytes
        except Exception:
            cap = 64 * 1024 * 1024
        vmem_limit_bytes = min(int(cap * 3 // 4), 96 * 1024 * 1024)

    flops = 2 * r * (cin * width + 9 * width * width + width * cout)
    bytes_accessed = ((x2.size + r * cout) * 4
                      + (w1b.size + w2b.size + w3b.size) * 2
                      + bn_pack.size * 4)

    kernel = functools.partial(_bottleneck_kernel, n=n, h=h, w=w_)
    full = lambda shape: pl.BlockSpec(shape, lambda i: (0,) * len(shape))

    out = pl.pallas_call(
        kernel,
        out_shape=jax.ShapeDtypeStruct((r, cout), out_dtype),
        grid=(1,),
        in_specs=[
            full((r, cin)),
            full(w1b.shape), full(w2b.shape), full(w3b.shape),
            full(bn_pack.shape),
        ],
        out_specs=full((r, cout)),
        scratch_shapes=[pltpu.VMEM((n, h + 2, w_ + 2, width), jnp.bfloat16)],
        compiler_params=pltpu.CompilerParams(
            dimension_semantics=("arbitrary",),
            vmem_limit_bytes=vmem_limit_bytes),
        cost_estimate=pl.CostEstimate(flops=flops, transcendentals=0,
                                      bytes_accessed=bytes_accessed),
    )(x2, w1b, w2b, w3b, bn_pack)
    return out.reshape(n, h, w_, cout)


def ref_forward_nhwc(x, params):
    """Pure-JAX f32 reference (XLA conv), same semantics, for validation."""
    w1, w2, w3, g1, b1, g2, b2, g3, b3 = params

    def bn(y, g, b):
        m = jnp.mean(y, axis=(0, 1, 2), keepdims=True)
        v = jnp.mean((y - m) ** 2, axis=(0, 1, 2), keepdims=True)
        return (y - m) * lax.rsqrt(v + _BN_EPS) * g.reshape(1, 1, 1, -1) + b.reshape(1, 1, 1, -1)

    y = jnp.einsum('nhwc,cd->nhwd', x, w1)
    y = jnp.maximum(bn(y, g1, b1), 0.0)
    y = lax.conv_general_dilated(y, w2, window_strides=(1, 1),
                                 padding=((1, 1), (1, 1)),
                                 dimension_numbers=('NHWC', 'HWIO', 'NHWC'))
    y = jnp.maximum(bn(y, g2, b2), 0.0)
    y = jnp.einsum('nhwc,cd->nhwd', y, w3)
    y = bn(y, g3, b3)
    return jnp.maximum(y + x, 0.0)


if __name__ == "__main__":
    # Small shapes consistent with Bottleneck: in_planes = planes * expansion (= 4), so the
    # identity add needs no downsample.  planes=32 gives Cin=Cout=128 (lane-dense in/out).
    # Activations are NHWC; the PyTorch NCHW conversion belongs once at the network boundary.
    N, H, W = 2, 8, 8
    planes = 32
    in_planes = planes * 4          # 128
    width = planes                  # base_width=64, groups=1 -> width = planes
    cout = planes * 4               # expansion = 4 -> 128

    key = jax.random.PRNGKey(0)
    ks = jax.random.split(key, 4)

    # trunc_normal_(std=0.02, a=-0.04, b=0.04) == 2-sigma truncated normal
    def trunc_normal(k, shape):
        return 0.02 * jax.random.truncated_normal(k, -2.0, 2.0, shape, jnp.float32)

    # conv weights stored matmul-ready: (Cin, Cout) for 1x1, (kh, kw, Cin, Cout) for 3x3
    # (PyTorch OIHW weights map here via a one-time transpose at the network boundary).
    w1 = trunc_normal(ks[0], (in_planes, width))
    w2 = trunc_normal(ks[1], (3, 3, width, width))
    w3 = trunc_normal(ks[2], (width, cout))
    # BatchNorm: ones_(weight), zeros_(bias)
    g1 = jnp.ones((width,), jnp.float32); b1 = jnp.zeros((width,), jnp.float32)
    g2 = jnp.ones((width,), jnp.float32); b2 = jnp.zeros((width,), jnp.float32)
    g3 = jnp.ones((cout,), jnp.float32);  b3 = jnp.zeros((cout,), jnp.float32)
    params = (w1, w2, w3, g1, b1, g2, b2, g3, b3)

    x = jax.random.normal(ks[3], (N, H, W, in_planes), jnp.float32)   # NHWC

    out = jax.block_until_ready(bottleneck_forward_nhwc(x, params))
    ref = jax.block_until_ready(ref_forward_nhwc(x, params))

    assert out.shape == (N, H, W, cout), out.shape
    max_err = float(jnp.max(jnp.abs(out - ref)))
    assert jnp.allclose(out, ref, atol=5e-2, rtol=5e-2), max_err

    print("KERNEL_OK")
</pallas_src>

<mosaic_0001>
module attributes {stable_mosaic.version = 11 : i64} {
  func.func @_bottleneck_kernel(%arg0: i32, %arg1: memref<128x128xf32, #tpu.memory_space<vmem>>, %arg2: memref<128x32xbf16, #tpu.memory_space<vmem>>, %arg3: memref<3x3x32x32xbf16, #tpu.memory_space<vmem>>, %arg4: memref<32x128xbf16, #tpu.memory_space<vmem>>, %arg5: memref<6x128xf32, #tpu.memory_space<vmem>>, %arg6: memref<128x128xf32, #tpu.memory_space<vmem>>, %arg7: memref<2x10x10x32xbf16, #tpu.memory_space<vmem>>) attributes {dimension_semantics = [#tpu.dimension_semantics<arbitrary>], iteration_bounds = array<i64: 1>, scalar_prefetch = 0 : i64, scratch_operands = 1 : i64, tpu.core_type = #tpu.core_type<tc>, window_params = [{pipeline_mode = #tpu.pipeline_mode<synchronous>, transform_indices = @transform_0, window_bounds = array<i64: 128, 128>}, {pipeline_mode = #tpu.pipeline_mode<synchronous>, transform_indices = @transform_1, window_bounds = array<i64: 128, 32>}, {pipeline_mode = #tpu.pipeline_mode<synchronous>, transform_indices = @transform_2, window_bounds = array<i64: 3, 3, 32, 32>}, {pipeline_mode = #tpu.pipeline_mode<synchronous>, transform_indices = @transform_3, window_bounds = array<i64: 32, 128>}, {pipeline_mode = #tpu.pipeline_mode<synchronous>, transform_indices = @transform_4, window_bounds = array<i64: 6, 128>}, {pipeline_mode = #tpu.pipeline_mode<synchronous>, transform_indices = @transform_5, window_bounds = array<i64: 128, 128>}]} {
    %c0 = arith.constant 0 : index
    %c0_0 = arith.constant 0 : index
    %0 = vector.load %arg1[%c0, %c0_0] : memref<128x128xf32, #tpu.memory_space<vmem>>, vector<128x128xf32>
    %1 = arith.truncf %0 : vector<128x128xf32> to vector<128x128xbf16>
    %c0_1 = arith.constant 0 : index
    %c0_2 = arith.constant 0 : index
    %2 = vector.load %arg2[%c0_1, %c0_2] : memref<128x32xbf16, #tpu.memory_space<vmem>>, vector<128x32xbf16>
    %cst = arith.constant dense<0.000000e+00> : vector<128x32xf32>
    %3 = tpu.matmul %1, %2, %cst {dimension_numbers = #tpu.dot_dimension_numbers<[1], [0], [0], [1], [0, 0, 1, 1], [], []>} : vector<128x128xbf16>, vector<128x32xbf16>, vector<128x32xf32> -> vector<128x32xf32>
    %c0_3 = arith.constant 0 : index
    %c0_4 = arith.constant 0 : index
    %4 = vector.load %arg5[%c0_3, %c0_4] : memref<6x128xf32, #tpu.memory_space<vmem>>, vector<1x32xf32>
    %c1 = arith.constant 1 : index
    %c0_5 = arith.constant 0 : index
    %5 = vector.load %arg5[%c1, %c0_5] : memref<6x128xf32, #tpu.memory_space<vmem>>, vector<1x32xf32>
    %cst_6 = arith.constant dense<0.000000e+00> : vector<32xf32>
    %6 = vector.multi_reduction <add>, %3, %cst_6 [0] : vector<128x32xf32> to vector<32xf32>
    %7 = vector.shape_cast %6 : vector<32xf32> to vector<1x32xf32>
    %cst_7 = arith.constant 1.280000e+02 : f32
    %8 = vector.broadcast %cst_7 : f32 to vector<1x32xf32>
    %9 = arith.divf %7, %8 : vector<1x32xf32>
    %10 = vector.broadcast %9 : vector<1x32xf32> to vector<128x32xf32>
    %11 = arith.subf %3, %10 : vector<128x32xf32>
    %12 = arith.mulf %11, %11 : vector<128x32xf32>
    %cst_8 = arith.constant dense<0.000000e+00> : vector<32xf32>
    %13 = vector.multi_reduction <add>, %12, %cst_8 [0] : vector<128x32xf32> to vector<32xf32>
    %14 = vector.shape_cast %13 : vector<32xf32> to vector<1x32xf32>
    %cst_9 = arith.constant 1.280000e+02 : f32
    %15 = vector.broadcast %cst_9 : f32 to vector<1x32xf32>
    %16 = arith.divf %14, %15 : vector<1x32xf32>
    %cst_10 = arith.constant 9.99999974E-6 : f32
    %17 = vector.broadcast %cst_10 : f32 to vector<1x32xf32>
    %18 = arith.addf %16, %17 : vector<1x32xf32>
    %19 = math.rsqrt %18 : vector<1x32xf32>
    %20 = vector.broadcast %19 : vector<1x32xf32> to vector<128x32xf32>
    %21 = arith.mulf %11, %20 : vector<128x32xf32>
    %22 = vector.broadcast %4 : vector<1x32xf32> to vector<128x32xf32>
    %23 = arith.mulf %21, %22 : vector<128x32xf32>
    %24 = vector.broadcast %5 : vector<1x32xf32> to vector<128x32xf32>
    %25 = arith.addf %23, %24 : vector<128x32xf32>
    %cst_11 = arith.constant 0.000000e+00 : f32
    %26 = vector.broadcast %cst_11 : f32 to vector<128x32xf32>
    %27 = arith.maximumf %25, %26 : vector<128x32xf32>
    %28 = arith.truncf %27 : vector<128x32xf32> to vector<128x32xbf16>
    %29 = vector.shape_cast %28 : vector<128x32xbf16> to vector<2x8x8x32xbf16>
    %cst_12 = arith.constant 0.000000e+00 : bf16
    %30 = vector.broadcast %cst_12 : bf16 to vector<2x1x10x32xbf16>
    %c0_13 = arith.constant 0 : index
    %c0_14 = arith.constant 0 : index
    %c0_15 = arith.constant 0 : index
    %c0_16 = arith.constant 0 : index
    %31 = vector.load %arg7[%c0_13, %c0_14, %c0_15, %c0_16] : memref<2x10x10x32xbf16, #tpu.memory_space<vmem>>, vector<2x1x10x32xbf16>
    tpu.vector_store %arg7[%c0_13, %c0_14, %c0_15, %c0_16], %30 {strides = array<i32>} : memref<2x10x10x32xbf16, #tpu.memory_space<vmem>>, vector<2x1x10x32xbf16>,
    %cst_17 = arith.constant 0.000000e+00 : bf16
    %32 = vector.broadcast %cst_17 : bf16 to vector<2x1x10x32xbf16>
    %c0_18 = arith.constant 0 : index
    %c9 = arith.constant 9 : index
    %c0_19 = arith.constant 0 : index
    %c0_20 = arith.constant 0 : index
    %33 = vector.load %arg7[%c0_18, %c9, %c0_19, %c0_20] : memref<2x10x10x32xbf16, #tpu.memory_space<vmem>>, vector<2x1x10x32xbf16>
    tpu.vector_store %arg7[%c0_18, %c9, %c0_19, %c0_20], %32 {strides = array<i32>} : memref<2x10x10x32xbf16, #tpu.memory_space<vmem>>, vector<2x1x10x32xbf16>,
    %cst_21 = arith.constant 0.000000e+00 : bf16
    %34 = vector.broadcast %cst_21 : bf16 to vector<2x10x1x32xbf16>
    %c0_22 = arith.constant 0 : index
    %c0_23 = arith.constant 0 : index
    %c0_24 = arith.constant 0 : index
    %c0_25 = arith.constant 0 : index
    %35 = vector.load %arg7[%c0_22, %c0_23, %c0_24, %c0_25] : memref<2x10x10x32xbf16, #tpu.memory_space<vmem>>, vector<2x10x1x32xbf16>
    tpu.vector_store %arg7[%c0_22, %c0_23, %c0_24, %c0_25], %34 {strides = array<i32>} : memref<2x10x10x32xbf16, #tpu.memory_space<vmem>>, vector<2x10x1x32xbf16>,
    %cst_26 = arith.constant 0.000000e+00 : bf16
    %36 = vector.broadcast %cst_26 : bf16 to vector<2x10x1x32xbf16>
    %c0_27 = arith.constant 0 : index
    %c0_28 = arith.constant 0 : index
    %c9_29 = arith.constant 9 : index
    %c0_30 = arith.constant 0 : index
    %37 = vector.load %arg7[%c0_27, %c0_28, %c9_29, %c0_30] : memref<2x10x10x32xbf16, #tpu.memory_space<vmem>>, vector<2x10x1x32xbf16>
    tpu.vector_store %arg7[%c0_27, %c0_28, %c9_29, %c0_30], %36 {strides = array<i32>} : memref<2x10x10x32xbf16, #tpu.memory_space<vmem>>, vector<2x10x1x32xbf16>,
    %c0_31 = arith.constant 0 : index
    %c1_32 = arith.constant 1 : index
    %c1_33 = arith.constant 1 : index
    %c0_34 = arith.constant 0 : index
    %38 = vector.load %arg7[%c0_31, %c1_32, %c1_33, %c0_34] : memref<2x10x10x32xbf16, #tpu.memory_space<vmem>>, vector<2x8x8x32xbf16>
    tpu.vector_store %arg7[%c0_31, %c1_32, %c1_33, %c0_34], %29 {strides = array<i32>} : memref<2x10x10x32xbf16, #tpu.memory_space<vmem>>, vector<2x8x8x32xbf16>,
    %c0_35 = arith.constant 0 : index
    %c0_36 = arith.constant 0 : index
    %c0_37 = arith.constant 0 : index
    %c0_38 = arith.constant 0 : index
    %39 = vector.load %arg7[%c0_35, %c0_36, %c0_37, %c0_38] : memref<2x10x10x32xbf16, #tpu.memory_space<vmem>>, vector<2x8x8x32xbf16>
    %40 = vector.shape_cast %39 : vector<2x8x8x32xbf16> to vector<128x32xbf16>
    %c0_39 = arith.constant 0 : index
    %c0_40 = arith.constant 0 : index
    %c0_41 = arith.constant 0 : index
    %c0_42 = arith.constant 0 : index
    %41 = vector.load %arg3[%c0_39, %c0_40, %c0_41, %c0_42] : memref<3x3x32x32xbf16, #tpu.memory_space<vmem>>, vector<1x1x32x32xbf16>
    %42 = vector.shape_cast %41 : vector<1x1x32x32xbf16> to vector<32x32xbf16>
    %cst_43 = arith.constant dense<0.000000e+00> : vector<128x32xf32>
    %43 = tpu.matmul %40, %42, %cst_43 {dimension_numbers = #tpu.dot_dimension_numbers<[1], [0], [0], [1], [0, 0, 1, 1], [], []>} : vector<128x32xbf16>, vector<32x32xbf16>, vector<128x32xf32> -> vector<128x32xf32>
    %c0_44 = arith.constant 0 : index
    %c0_45 = arith.constant 0 : index
    %c1_46 = arith.constant 1 : index
    %c0_47 = arith.constant 0 : index
    %44 = vector.load %arg7[%c0_44, %c0_45, %c1_46, %c0_47] : memref<2x10x10x32xbf16, #tpu.memory_space<vmem>>, vector<2x8x8x32xbf16>
    %45 = vector.shape_cast %44 : vector<2x8x8x32xbf16> to vector<128x32xbf16>
    %c0_48 = arith.constant 0 : index
    %c1_49 = arith.constant 1 : index
    %c0_50 = arith.constant 0 : index
    %c0_51 = arith.constant 0 : index
    %46 = vector.load %arg3[%c0_48, %c1_49, %c0_50, %c0_51] : memref<3x3x32x32xbf16, #tpu.memory_space<vmem>>, vector<1x1x32x32xbf16>
    %47 = vector.shape_cast %46 : vector<1x1x32x32xbf16> to vector<32x32xbf16>
    %cst_52 = arith.constant dense<0.000000e+00> : vector<128x32xf32>
    %48 = tpu.matmul %45, %47, %cst_52 {dimension_numbers = #tpu.dot_dimension_numbers<[1], [0], [0], [1], [0, 0, 1, 1], [], []>} : vector<128x32xbf16>, vector<32x32xbf16>, vector<128x32xf32> -> vector<128x32xf32>
    %49 = arith.addf %43, %48 : vector<128x32xf32>
    %c0_53 = arith.constant 0 : index
    %c0_54 = arith.constant 0 : index
    %c2 = arith.constant 2 : index
    %c0_55 = arith.constant 0 : index
    %50 = vector.load %arg7[%c0_53, %c0_54, %c2, %c0_55] : memref<2x10x10x32xbf16, #tpu.memory_space<vmem>>, vector<2x8x8x32xbf16>
    %51 = vector.shape_cast %50 : vector<2x8x8x32xbf16> to vector<128x32xbf16>
    %c0_56 = arith.constant 0 : index
    %c2_57 = arith.constant 2 : index
    %c0_58 = arith.constant 0 : index
    %c0_59 = arith.constant 0 : index
    %52 = vector.load %arg3[%c0_56, %c2_57, %c0_58, %c0_59] : memref<3x3x32x32xbf16, #tpu.memory_space<vmem>>, vector<1x1x32x32xbf16>
    %53 = vector.shape_cast %52 : vector<1x1x32x32xbf16> to vector<32x32xbf16>
    %cst_60 = arith.constant dense<0.000000e+00> : vector<128x32xf32>
    %54 = tpu.matmul %51, %53, %cst_60 {dimension_numbers = #tpu.dot_dimension_numbers<[1], [0], [0], [1], [0, 0, 1, 1], [], []>} : vector<128x32xbf16>, vector<32x32xbf16>, vector<128x32xf32> -> vector<128x32xf32>
    %55 = arith.addf %49, %54 : vector<128x32xf32>
    %c0_61 = arith.constant 0 : index
    %c1_62 = arith.constant 1 : index
    %c0_63 = arith.constant 0 : index
    %c0_64 = arith.constant 0 : index
    %56 = vector.load %arg7[%c0_61, %c1_62, %c0_63, %c0_64] : memref<2x10x10x32xbf16, #tpu.memory_space<vmem>>, vector<2x8x8x32xbf16>
    %57 = vector.shape_cast %56 : vector<2x8x8x32xbf16> to vector<128x32xbf16>
    %c1_65 = arith.constant 1 : index
    %c0_66 = arith.constant 0 : index
    %c0_67 = arith.constant 0 : index
    %c0_68 = arith.constant 0 : index
    %58 = vector.load %arg3[%c1_65, %c0_66, %c0_67, %c0_68] : memref<3x3x32x32xbf16, #tpu.memory_space<vmem>>, vector<1x1x32x32xbf16>
    %59 = vector.shape_cast %58 : vector<1x1x32x32xbf16> to vector<32x32xbf16>
    %cst_69 = arith.constant dense<0.000000e+00> : vector<128x32xf32>
    %60 = tpu.matmul %57, %59, %cst_69 {dimension_numbers = #tpu.dot_dimension_numbers<[1], [0], [0], [1], [0, 0, 1, 1], [], []>} : vector<128x32xbf16>, vector<32x32xbf16>, vector<128x32xf32> -> vector<128x32xf32>
    %61 = arith.addf %55, %60 : vector<128x32xf32>
    %c0_70 = arith.constant 0 : index
    %c1_71 = arith.constant 1 : index
    %c1_72 = arith.constant 1 : index
    %c0_73 = arith.constant 0 : index
    %62 = vector.load %arg7[%c0_70, %c1_71, %c1_72, %c0_73] : memref<2x10x10x32xbf16, #tpu.memory_space<vmem>>, vector<2x8x8x32xbf16>
    %63 = vector.shape_cast %62 : vector<2x8x8x32xbf16> to vector<128x32xbf16>
    %c1_74 = arith.constant 1 : index
    %c1_75 = arith.constant 1 : index
    %c0_76 = arith.constant 0 : index
    %c0_77 = arith.constant 0 : index
    %64 = vector.load %arg3[%c1_74, %c1_75, %c0_76, %c0_77] : memref<3x3x32x32xbf16, #tpu.memory_space<vmem>>, vector<1x1x32x32xbf16>
    %65 = vector.shape_cast %64 : vector<1x1x32x32xbf16> to vector<32x32xbf16>
    %cst_78 = arith.constant dense<0.000000e+00> : vector<128x32xf32>
    %66 = tpu.matmul %63, %65, %cst_78 {dimension_numbers = #tpu.dot_dimension_numbers<[1], [0], [0], [1], [0, 0, 1, 1], [], []>} : vector<128x32xbf16>, vector<32x32xbf16>, vector<128x32xf32> -> vector<128x32xf32>
    %67 = arith.addf %61, %66 : vector<128x32xf32>
    %c0_79 = arith.constant 0 : index
    %c1_80 = arith.constant 1 : index
    %c2_81 = arith.constant 2 : index
    %c0_82 = arith.constant 0 : index
    %68 = vector.load %arg7[%c0_79, %c1_80, %c2_81, %c0_82] : memref<2x10x10x32xbf16, #tpu.memory_space<vmem>>, vector<2x8x8x32xbf16>
    %69 = vector.shape_cast %68 : vector<2x8x8x32xbf16> to vector<128x32xbf16>
    %c1_83 = arith.constant 1 : index
    %c2_84 = arith.constant 2 : index
    %c0_85 = arith.constant 0 : index
    %c0_86 = arith.constant 0 : index
    %70 = vector.load %arg3[%c1_83, %c2_84, %c0_85, %c0_86] : memref<3x3x32x32xbf16, #tpu.memory_space<vmem>>, vector<1x1x32x32xbf16>
    %71 = vector.shape_cast %70 : vector<1x1x32x32xbf16> to vector<32x32xbf16>
    %cst_87 = arith.constant dense<0.000000e+00> : vector<128x32xf32>
    %72 = tpu.matmul %69, %71, %cst_87 {dimension_numbers = #tpu.dot_dimension_numbers<[1], [0], [0], [1], [0, 0, 1, 1], [], []>} : vector<128x32xbf16>, vector<32x32xbf16>, vector<128x32xf32> -> vector<128x32xf32>
    %73 = arith.addf %67, %72 : vector<128x32xf32>
    %c0_88 = arith.constant 0 : index
    %c2_89 = arith.constant 2 : index
    %c0_90 = arith.constant 0 : index
    %c0_91 = arith.constant 0 : index
    %74 = vector.load %arg7[%c0_88, %c2_89, %c0_90, %c0_91] : memref<2x10x10x32xbf16, #tpu.memory_space<vmem>>, vector<2x8x8x32xbf16>
    %75 = vector.shape_cast %74 : vector<2x8x8x32xbf16> to vector<128x32xbf16>
    %c2_92 = arith.constant 2 : index
    %c0_93 = arith.constant 0 : index
    %c0_94 = arith.constant 0 : index
    %c0_95 = arith.constant 0 : index
    %76 = vector.load %arg3[%c2_92, %c0_93, %c0_94, %c0_95] : memref<3x3x32x32xbf16, #tpu.memory_space<vmem>>, vector<1x1x32x32xbf16>
    %77 = vector.shape_cast %76 : vector<1x1x32x32xbf16> to vector<32x32xbf16>
    %cst_96 = arith.constant dense<0.000000e+00> : vector<128x32xf32>
    %78 = tpu.matmul %75, %77, %cst_96 {dimension_numbers = #tpu.dot_dimension_numbers<[1], [0], [0], [1], [0, 0, 1, 1], [], []>} : vector<128x32xbf16>, vector<32x32xbf16>, vector<128x32xf32> -> vector<128x32xf32>
    %79 = arith.addf %73, %78 : vector<128x32xf32>
    %c0_97 = arith.constant 0 : index
    %c2_98 = arith.constant 2 : index
    %c1_99 = arith.constant 1 : index
    %c0_100 = arith.constant 0 : index
    %80 = vector.load %arg7[%c0_97, %c2_98, %c1_99, %c0_100] : memref<2x10x10x32xbf16, #tpu.memory_space<vmem>>, vector<2x8x8x32xbf16>
    %81 = vector.shape_cast %80 : vector<2x8x8x32xbf16> to vector<128x32xbf16>
    %c2_101 = arith.constant 2 : index
    %c1_102 = arith.constant 1 : index
    %c0_103 = arith.constant 0 : index
    %c0_104 = arith.constant 0 : index
    %82 = vector.load %arg3[%c2_101, %c1_102, %c0_103, %c0_104] : memref<3x3x32x32xbf16, #tpu.memory_space<vmem>>, vector<1x1x32x32xbf16>
    %83 = vector.shape_cast %82 : vector<1x1x32x32xbf16> to vector<32x32xbf16>
    %cst_105 = arith.constant dense<0.000000e+00> : vector<128x32xf32>
    %84 = tpu.matmul %81, %83, %cst_105 {dimension_numbers = #tpu.dot_dimension_numbers<[1], [0], [0], [1], [0, 0, 1, 1], [], []>} : vector<128x32xbf16>, vector<32x32xbf16>, vector<128x32xf32> -> vector<128x32xf32>
    %85 = arith.addf %79, %84 : vector<128x32xf32>
    %c0_106 = arith.constant 0 : index
    %c2_107 = arith.constant 2 : index
    %c2_108 = arith.constant 2 : index
    %c0_109 = arith.constant 0 : index
    %86 = vector.load %arg7[%c0_106, %c2_107, %c2_108, %c0_109] : memref<2x10x10x32xbf16, #tpu.memory_space<vmem>>, vector<2x8x8x32xbf16>
    %87 = vector.shape_cast %86 : vector<2x8x8x32xbf16> to vector<128x32xbf16>
    %c2_110 = arith.constant 2 : index
    %c2_111 = arith.constant 2 : index
    %c0_112 = arith.constant 0 : index
    %c0_113 = arith.constant 0 : index
    %88 = vector.load %arg3[%c2_110, %c2_111, %c0_112, %c0_113] : memref<3x3x32x32xbf16, #tpu.memory_space<vmem>>, vector<1x1x32x32xbf16>
    %89 = vector.shape_cast %88 : vector<1x1x32x32xbf16> to vector<32x32xbf16>
    %cst_114 = arith.constant dense<0.000000e+00> : vector<128x32xf32>
    %90 = tpu.matmul %87, %89, %cst_114 {dimension_numbers = #tpu.dot_dimension_numbers<[1], [0], [0], [1], [0, 0, 1, 1], [], []>} : vector<128x32xbf16>, vector<32x32xbf16>, vector<128x32xf32> -> vector<128x32xf32>
    %91 = arith.addf %85, %90 : vector<128x32xf32>
    %c2_115 = arith.constant 2 : index
    %c0_116 = arith.constant 0 : index
    %92 = vector.load %arg5[%c2_115, %c0_116] : memref<6x128xf32, #tpu.memory_space<vmem>>, vector<1x32xf32>
    %c3 = arith.constant 3 : index
    %c0_117 = arith.constant 0 : index
    %93 = vector.load %arg5[%c3, %c0_117] : memref<6x128xf32, #tpu.memory_space<vmem>>, vector<1x32xf32>
    %cst_118 = arith.constant dense<0.000000e+00> : vector<32xf32>
    %94 = vector.multi_reduction <add>, %91, %cst_118 [0] : vector<128x32xf32> to vector<32xf32>
    %95 = vector.shape_cast %94 : vector<32xf32> to vector<1x32xf32>
    %cst_119 = arith.constant 1.280000e+02 : f32
    %96 = vector.broadcast %cst_119 : f32 to vector<1x32xf32>
    %97 = arith.divf %95, %96 : vector<1x32xf32>
    %98 = vector.broadcast %97 : vector<1x32xf32> to vector<128x32xf32>
    %99 = arith.subf %91, %98 : vector<128x32xf32>
    %100 = arith.mulf %99, %99 : vector<128x32xf32>
    %cst_120 = arith.constant dense<0.000000e+00> : vector<32xf32>
    %101 = vector.multi_reduction <add>, %100, %cst_120 [0] : vector<128x32xf32> to vector<32xf32>
    %102 = vector.shape_cast %101 : vector<32xf32> to vector<1x32xf32>
    %cst_121 = arith.constant 1.280000e+02 : f32
    %103 = vector.broadcast %cst_121 : f32 to vector<1x32xf32>
    %104 = arith.divf %102, %103 : vector<1x32xf32>
    %cst_122 = arith.constant 9.99999974E-6 : f32
    %105 = vector.broadcast %cst_122 : f32 to vector<1x32xf32>
    %106 = arith.addf %104, %105 : vector<1x32xf32>
    %107 = math.rsqrt %106 : vector<1x32xf32>
    %108 = vector.broadcast %107 : vector<1x32xf32> to vector<128x32xf32>
    %109 = arith.mulf %99, %108 : vector<128x32xf32>
    %110 = vector.broadcast %92 : vector<1x32xf32> to vector<128x32xf32>
    %111 = arith.mulf %109, %110 : vector<128x32xf32>
    %112 = vector.broadcast %93 : vector<1x32xf32> to vector<128x32xf32>
    %113 = arith.addf %111, %112 : vector<128x32xf32>
    %cst_123 = arith.constant 0.000000e+00 : f32
    %114 = vector.broadcast %cst_123 : f32 to vector<128x32xf32>
    %115 = arith.maximumf %113, %114 : vector<128x32xf32>
    %116 = arith.truncf %115 : vector<128x32xf32> to vector<128x32xbf16>
    %c0_124 = arith.constant 0 : index
    %c0_125 = arith.constant 0 : index
    %117 = vector.load %arg4[%c0_124, %c0_125] : memref<32x128xbf16, #tpu.memory_space<vmem>>, vector<32x128xbf16>
    %cst_126 = arith.constant dense<0.000000e+00> : vector<128x128xf32>
    %118 = tpu.matmul %116, %117, %cst_126 {dimension_numbers = #tpu.dot_dimension_numbers<[1], [0], [0], [1], [0, 0, 1, 1], [], []>} : vector<128x32xbf16>, vector<32x128xbf16>, vector<128x128xf32> -> vector<128x128xf32>
    %c4 = arith.constant 4 : index
    %c0_127 = arith.constant 0 : index
    %119 = vector.load %arg5[%c4, %c0_127] : memref<6x128xf32, #tpu.memory_space<vmem>>, vector<1x128xf32>
    %c5 = arith.constant 5 : index
    %c0_128 = arith.constant 0 : index
    %120 = vector.load %arg5[%c5, %c0_128] : memref<6x128xf32, #tpu.memory_space<vmem>>, vector<1x128xf32>
    %cst_129 = arith.constant dense<0.000000e+00> : vector<128xf32>
    %121 = vector.multi_reduction <add>, %118, %cst_129 [0] : vector<128x128xf32> to vector<128xf32>
    %122 = vector.shape_cast %121 : vector<128xf32> to vector<1x128xf32>
    %cst_130 = arith.constant 1.280000e+02 : f32
    %123 = vector.broadcast %cst_130 : f32 to vector<1x128xf32>
    %124 = arith.divf %122, %123 : vector<1x128xf32>
    %125 = vector.broadcast %124 : vector<1x128xf32> to vector<128x128xf32>
    %126 = arith.subf %118, %125 : vector<128x128xf32>
    %127 = arith.mulf %126, %126 : vector<128x128xf32>
    %cst_131 = arith.constant dense<0.000000e+00> : vector<128xf32>
    %128 = vector.multi_reduction <add>, %127, %cst_131 [0] : vector<128x128xf32> to vector<128xf32>
    %129 = vector.shape_cast %128 : vector<128xf32> to vector<1x128xf32>
    %cst_132 = arith.constant 1.280000e+02 : f32
    %130 = vector.broadcast %cst_132 : f32 to vector<1x128xf32>
    %131 = arith.divf %129, %130 : vector<1x128xf32>
    %cst_133 = arith.constant 9.99999974E-6 : f32
    %132 = vector.broadcast %cst_133 : f32 to vector<1x128xf32>
    %133 = arith.addf %131, %132 : vector<1x128xf32>
    %134 = math.rsqrt %133 : vector<1x128xf32>
    %135 = vector.broadcast %134 : vector<1x128xf32> to vector<128x128xf32>
    %136 = arith.mulf %126, %135 : vector<128x128xf32>
    %137 = vector.broadcast %119 : vector<1x128xf32> to vector<128x128xf32>
    %138 = arith.mulf %136, %137 : vector<128x128xf32>
    %139 = vector.broadcast %120 : vector<1x128xf32> to vector<128x128xf32>
    %140 = arith.addf %138, %139 : vector<128x128xf32>
    %c0_134 = arith.constant 0 : index
    %c0_135 = arith.constant 0 : index
    %141 = vector.load %arg1[%c0_134, %c0_135] : memref<128x128xf32, #tpu.memory_space<vmem>>, vector<128x128xf32>
    %142 = arith.addf %140, %141 : vector<128x128xf32>
    %cst_136 = arith.constant 0.000000e+00 : f32
    %143 = vector.broadcast %cst_136 : f32 to vector<128x128xf32>
    %144 = arith.maximumf %142, %143 : vector<128x128xf32>
    %c0_137 = arith.constant 0 : index
    %c0_138 = arith.constant 0 : index
    %145 = vector.load %arg6[%c0_137, %c0_138] : memref<128x128xf32, #tpu.memory_space<vmem>>, vector<128x128xf32>
    tpu.vector_store %arg6[%c0_137, %c0_138], %144 {strides = array<i32>} : memref<128x128xf32, #tpu.memory_space<vmem>>, vector<128x128xf32>,
    return
  }
  func.func @transform_0(%arg0: i32) -> (i32, i32) {
    %c0_i32 = arith.constant 0 : i32
    %c0_i32_0 = arith.constant 0 : i32
    %c0_i32_1 = arith.constant 0 : i32
    return %c0_i32, %c0_i32_0 : i32, i32
  }
  func.func @transform_1(%arg0: i32) -> (i32, i32) {
    %c0_i32 = arith.constant 0 : i32
    %c0_i32_0 = arith.constant 0 : i32
    %c0_i32_1 = arith.constant 0 : i32
    return %c0_i32, %c0_i32_0 : i32, i32
  }
  func.func @transform_2(%arg0: i32) -> (i32, i32, i32, i32) {
    %c0_i32 = arith.constant 0 : i32
    %c0_i32_0 = arith.constant 0 : i32
    %c0_i32_1 = arith.constant 0 : i32
    %c0_i32_2 = arith.constant 0 : i32
    %c0_i32_3 = arith.constant 0 : i32
    return %c0_i32, %c0_i32_0, %c0_i32_1, %c0_i32_2 : i32, i32, i32, i32
  }
  func.func @transform_3(%arg0: i32) -> (i32, i32) {
    %c0_i32 = arith.constant 0 : i32
    %c0_i32_0 = arith.constant 0 : i32
    %c0_i32_1 = arith.constant 0 : i32
    return %c0_i32, %c0_i32_0 : i32, i32
  }
  func.func @transform_4(%arg0: i32) -> (i32, i32) {
    %c0_i32 = arith.constant 0 : i32
    %c0_i32_0 = arith.constant 0 : i32
    %c0_i32_1 = arith.constant 0 : i32
    return %c0_i32, %c0_i32_0 : i32, i32
  }
  func.func @transform_5(%arg0: i32) -> (i32, i32) {
    %c0_i32 = arith.constant 0 : i32
    %c0_i32_0 = arith.constant 0 : i32
    %c0_i32_1 = arith.constant 0 : i32
    return %c0_i32, %c0_i32_0 : i32, i32
  }
}

</mosaic_0001>

<bundles_post_ra>
// kernel: tpu_custom_call.1
= control target key start
LH: loop header
LB: loop body
LE: loop exit
PB: predicated region body
PF: predicated region fallthrough
CT: control target
= control target key end

     0   :  { %10 = vsyncpa [#allocation4], 0  ;;  %s6480_s0 = inlined_call_operand.hbm [shape: f32[128,128], index: 0, kind: input, shape index: {}]   ;;  %s6481_s1 = inlined_call_operand.vmem [shape: bf16[128,32], index: 1, kind: input, shape index: {}]   ;;  %s6482_s2 = inlined_call_operand.hbm [shape: bf16[3,3,32,32], index: 2, kind: input, shape index: {}]   ;;  %s6483_s3 = inlined_call_operand.vmem [shape: bf16[32,128], index: 3, kind: input, shape index: {}]   ;;  %s6484_s4 = inlined_call_operand.vmem [shape: f32[6,128], index: 4, kind: input, shape index: {}]   ;;  %s6485_s5 = inlined_call_operand.hbm [shape: f32[128,128], index: 5, kind: output, shape index: {}]  }
   0x1   :  { %11 = vsyncpa [#allocation7], 0 }
   0x2   :  { %12 = vsyncpa [#allocation5], 0  ;;  %s5055_s18 = smov [#allocation3]   ;;  %s4983_s22 = scalar_lea.hbm %s6480_s0, 2048 }
   0x3   :  { %s18_s19 = sshll.u32 %s5055_s18, 4  ;;  %p4984_p0 = scmp.ne.s32.totalorder %s6480_s0, %s4983_s22  ;;  %s19_s19 = int_to_ptr.vmem [resolvable:$true] %s18_s19 }
   0x4   :  { %p4987_p1 = scmp.lt.u32.totalorder %s4983_s22, %s6480_s0 }
   0x6   :  { %p4989_p2 = pnand %p4987_p1, %p4984_p0 }
   0x8   :  { %4992 = shalt.err (!%p4989_p2)
}
   0x9   :  { %s4993_s27 = scalar_lea.vmem %s19_s19, 2048  ;;  %p4998_p4 = scmp.lt.s32.totalorder %s19_s19, %s19_s19 }
   0xa   :  { %p4994_p3 = scmp.ne.s32.totalorder %s19_s19, %s4993_s27  ;;  %p4999_p5 = scmp.lt.s32.totalorder %s4993_s27, %s4993_s27 }
   0xc   :  { %p5000_p6 = por %p4999_p5, %p4998_p4 }
   0xe   :  { %p5001_p7 = pnand %p5000_p6, %p4994_p3 }
  0x10   :  { %5004 = shalt.err (!%p5001_p7)
}
  0x11   :  { %s5056_s28 = smov 128   ;;  %s5057_s29 = smov 8  }
  0x12   :  { %24 = dma.hbm_to_vmem [thread:$0]  %s6480_s0, 2048, %s19_s19, [#allocation4], %s5056_s28, %s5056_s28, %s5057_s29  }
  0x13   :  { %s5058_s7 = smov [#allocation6]   ;;  %s5005_s11 = scalar_lea.hbm %s6482_s2, 2304 }
  0x14   :  { %s32_s8 = sshll.u32 %s5058_s7, 4  ;;  %p5006_p8 = scmp.ne.s32.totalorder %s6482_s2, %s5005_s11  ;;  %s33_s8 = int_to_ptr.vmem [resolvable:$true] %s32_s8 }
  0x15   :  { %p5009_p9 = scmp.lt.u32.totalorder %s5005_s11, %s6482_s2 }
  0x17   :  { %p5011_p10 = pnand %p5009_p9, %p5006_p8 }
  0x19   :  { %5014 = shalt.err (!%p5011_p10)
}
  0x1a   :  { %s5015_s16 = scalar_lea.vmem %s33_s8, 2304  ;;  %p5020_p12 = scmp.lt.s32.totalorder %s33_s8, %s33_s8 }
  0x1b   :  { %p5016_p11 = scmp.ne.s32.totalorder %s33_s8, %s5015_s16  ;;  %p5021_p13 = scmp.lt.s32.totalorder %s5015_s16, %s5015_s16 }
  0x1d   :  { %p5022_p0 = por %p5021_p13, %p5020_p12 }
  0x1f   :  { %p5023_p1 = pnand %p5022_p0, %p5016_p11 }
  0x21   :  { %5026 = shalt.err (!%p5023_p1)
}
  0x22   :  { %s5059_s0 = smov 64   ;;  %s5060_s17 = smov 4  }
  0x23   :  { %38 = dma.hbm_to_vmem [thread:$0]  %s6482_s2, 2304, %s33_s8, [#allocation7], %s5059_s0, %s5059_s0, %s5060_s17  }
  0x24   :  { %5049 = dma.done.wait [#allocation4], 2048  }
  0x25   :  { %5050 = vsyncadd [#allocation4], 4294965248 }
  0x26   :  { %5051 = dma.done.wait [#allocation7], 2304  }
  0x27   :  { %5052 = vsyncadd [#allocation7], 4294964992  ;;  %v4921_v0 = vld [vmem:[%s6481_s1] sm:$0xff]   ;;  %v4922_v1 = vld [vmem:[%s6481_s1 + $0x8] sm:$0xff]   ;;  %vm237_vm0 = vcmask 261120   ;;  %vm471_vm1 = vcmask 253952  }
  0x28   :  { %4553 = vmatprep.subr.bf16.mxu0 %v4921_v0  ;;  %v4923_v2 = vld [vmem:[%s6481_s1 + $0x10] sm:$0xff]   ;;  %v4924_v3 = vld [vmem:[%s6481_s1 + $0x18] sm:$0xff]   ;;  %v50_v4 = vld [vmem:[#allocation3] sm:$0xff]  ;;  %vm481_vm2 = vsmask.f32 256  ;;  %v6494_v38 = vmov 0 }
  0x29   :  { %4554 = vmatpush3.bf16.msra.mxu0 %v4921_v0  ;;  %v51_v5 = vld [vmem:[#allocation3 + $0x8] sm:$0xff]  ;;  %v4925_v7 = vld [vmem:[%s6481_s1 + $0x20] sm:$0xff]   ;;  %v4927_v9 = vld [vmem:[%s6481_s1 + $0x30] sm:$0xff]   ;;  %vm543_vm4 = vsmask.f32 7938  ;;  %vm469_vm6 = vcmask 257024  }
  0x2a   :  { %4555 = vmatprep.subr.bf16.mxu0 %v4922_v1  ;;  %v66_v6 = vpack.c.bf16 %v51_v5, %v50_v4  ;;  %v4926_v8 = vld [vmem:[%s6481_s1 + $0x28] sm:$0xff]   ;;  %v4928_v10 = vld [vmem:[%s6481_s1 + $0x38] sm:$0xff]   ;;  %v52_v11 = vld [vmem:[#allocation3 + $0x10] sm:$0xff]  ;;  %vm900_vm8 = vsmask.f32 3328  ;;  %vm1510_vm11 = vcmask 1042432  }
  0x2b   :  { %v53_v12 = vld [vmem:[#allocation3 + $0x18] sm:$0xff]  ;;  %v54_v13 = vld [vmem:[#allocation3 + $0x20] sm:$0xff]  ;;  %v55_v14 = vld [vmem:[#allocation3 + $0x28] sm:$0xff]  ;;  %vm901_vm9 = vsmask.f32 7440  ;;  %vm1511_vm12 = vcmask 1046532  }
  0x2c   :  { %4569 = vmatprep.mubr.bf16.mxu0 %v66_v6  ;;  %v67_v15 = vpack.c.bf16 %v53_v12, %v52_v11  ;;  %v68_v16 = vpack.c.bf16 %v55_v14, %v54_v13  ;;  %v56_v17 = vld [vmem:[#allocation3 + $0x30] sm:$0xff]  ;;  %v57_v18 = vld [vmem:[#allocation3 + $0x38] sm:$0xff]  ;;  %v58_v19 = vld [vmem:[#allocation3 + $0x40] sm:$0xff]  ;;  %v6497_v13 = vmov 0 }
  0x2d   :  { %4556 = vmatpush3.bf16.msra.mxu0 %v4922_v1  ;;  %v59_v20 = vld [vmem:[#allocation3 + $0x48] sm:$0xff]  ;;  %v69_v21 = vpack.c.bf16 %v57_v18, %v56_v17  ;;  %v60_v23 = vld [vmem:[#allocation3 + $0x50] sm:$0xff]  ;;  %v61_v24 = vld [vmem:[#allocation3 + $0x58] sm:$0xff] }
  0x2e   :  { %4557 = vmatprep.subr.bf16.mxu0 %v4923_v2  ;;  %v70_v22 = vpack.c.bf16 %v59_v20, %v58_v19  ;;  %v62_v25 = vld [vmem:[#allocation3 + $0x60] sm:$0xff]  ;;  %v63_v26 = vld [vmem:[#allocation3 + $0x68] sm:$0xff]  ;;  %v71_v27 = vpack.c.bf16 %v61_v24, %v60_v23  ;;  %v64_v29 = vld [vmem:[#allocation3 + $0x70] sm:$0xff] }
  0x2f   :  { %v72_v28 = vpack.c.bf16 %v63_v26, %v62_v25  ;;  %v65_v30 = vld [vmem:[#allocation3 + $0x78] sm:$0xff]  ;;  %vm5157_vm3 = vmand %vm471_vm1, %vm481_vm2  ;;  %v498_v39 = vld [vmem:[#allocation2 + $0x28] sm:$0x1] }
  0x30   :  { %v73_v31 = vpack.c.bf16 %v65_v30, %v64_v29  ;;  %v6495_v38 = vsel %vm5157_vm3, 4294967295, %v6494_v38  ;;  %v501_v40 = vld [vmem:[#allocation2 + $0x30] sm:$0x1]  ;;  %v499_v42 = vsel %vm5157_vm3, 0, %v498_v39  ;;  %v504_v44 = vld [vmem:[#allocation2 + $0x38] sm:$0x1]  ;;  %vm5205_vm5 = vmand %vm471_vm1, %vm543_vm4 }
  0x31   :  { %4558 = vmatpush3.bf16.msra.mxu0 %v4923_v2  ;;  %6496 = vst [vmem:[#allocation12_spill] sm:$0xff] %v6495_v38  ;;  %v502_v43 = vsel %vm5157_vm3, 0, %v501_v40  ;;  %500 = vst [vmem:[#allocation2 + $0x28] sm:$0x1] %v499_v42  ;;  %v505_v46 = vsel %vm5157_vm3, 0, %v504_v44  ;;  %v6498_v13 = vsel %vm5205_vm5, 4294967295, %v6497_v13 }
  0x32   :  { %4559 = vmatprep.subr.bf16.mxu0 %v4924_v3  ;;  %503 = vst [vmem:[#allocation2 + $0x30] sm:$0x1] %v502_v43  ;;  %v507_v47 = vld [vmem:[#allocation2 + $0x40] sm:$0x1]  ;;  %v516_v48 = vld [vmem:[#allocation2 + $0x58] sm:$0x1]  ;;  %vm5279_vm7 = vmand %vm469_vm6, %vm543_vm4 }
  0x33   :  { %506 = vst [vmem:[#allocation2 + $0x38] sm:$0x1] %v505_v46  ;;  %v508_v50 = vsel %vm5157_vm3, 0, %v507_v47  ;;  %v517_v51 = vsel %vm5157_vm3, 0, %v516_v48  ;;  %v519_v52 = vld [vmem:[#allocation2 + $0x60] sm:$0x1]  ;;  %vm5717_vm10 = vmor %vm900_vm8, %vm901_vm9 }
  0x34   :  { %v522_v53 = vld [vmem:[#allocation2 + $0x68] sm:$0x1]  ;;  %509 = vst [vmem:[#allocation2 + $0x40] sm:$0x1] %v508_v50  ;;  %518 = vst [vmem:[#allocation2 + $0x58] sm:$0x1] %v517_v51 }
  0x35   :  { %4560 = vmatpush3.bf16.msra.mxu0 %v4924_v3  ;;  %v520_v56 = vsel %vm5157_vm3, 0, %v519_v52  ;;  %v523_v57 = vsel %vm5157_vm3, 0, %v522_v53  ;;  %v525_v58 = vld [vmem:[#allocation2 + $0x70] sm:$0x1]  ;;  %v528_v62 = vld [vmem:[#allocation2 + $0x78] sm:$0x1]  ;;  %vm5975_vm13 = vmor %vm1510_vm11, %vm1511_vm12 }
  0x36   :  { %4561 = vmatprep.subr.bf16.mxu0 %v4925_v7  ;;  %521 = vst [vmem:[#allocation2 + $0x60] sm:$0x1] %v520_v56  ;;  %524 = vst [vmem:[#allocation2 + $0x68] sm:$0x1] %v523_v57  ;;  %v526_v61 = vsel %vm5157_vm3, 0, %v525_v58  ;;  %v529_v1 = vsel %vm5157_vm3, 0, %v528_v62 }
  0x37   :  { %527 = vst [vmem:[#allocation2 + $0x70] sm:$0x1] %v526_v61  ;;  %v531_v2 = vld [vmem:[#allocation2 + $0x80] sm:$0x1]  ;;  %530 = vst [vmem:[#allocation2 + $0x78] sm:$0x1] %v529_v1 }
  0x38   :  { %v532_v5 = vsel %vm5157_vm3, 0, %v531_v2  ;;  %v534_v6 = vld [vmem:[#allocation2 + $0x88] sm:$0x1]  ;;  %6499 = vst [vmem:[#allocation13_spill] sm:$0xff] %v6498_v13  ;;  %v548_v14 = vld [vmem:[#allocation2 + $0xc] sm:$0x1] }
  0x39   :  { %4562 = vmatpush3.bf16.msra.mxu0 %v4925_v7  ;;  %533 = vst [vmem:[#allocation2 + $0x80] sm:$0x1] %v532_v5  ;;  %v554_v18 = vld [vmem:[#allocation2 + $0x1c] sm:$0x1]  ;;  %v557_v19 = vld [vmem:[#allocation2 + $0x24] sm:$0x1] }
  0x3a   :  { %4563 = vmatprep.subr.bf16.mxu0 %v4926_v8  ;;  %v560_v23 = vld [vmem:[#allocation2 + $0x2c] sm:$0x1]  ;;  %v563_v24 = vld [vmem:[#allocation2 + $0x34] sm:$0x1]  ;;  %v566_v29 = vld [vmem:[#allocation2 + $0x3c] sm:$0x1] }
  0x3b   :  { %v578_v42 = vld [vmem:[#allocation2 + $0x5c] sm:$0x1]  ;;  %v581_v47 = vld [vmem:[#allocation2 + $0x64] sm:$0x1]  ;;  %v584_v50 = vld [vmem:[#allocation2 + $0x6c] sm:$0x1] }
  0x3c   :  { %v579_v46 = vsel %vm5205_vm5, 0, %v578_v42  ;;  %v587_v51 = vld [vmem:[#allocation2 + $0x74] sm:$0x1]  ;;  %v585_v53 = vsel %vm5205_vm5, 0, %v584_v50  ;;  %v590_v56 = vld [vmem:[#allocation2 + $0x7c] sm:$0x1] }
  0x3d   :  { %4564 = vmatpush3.bf16.msra.mxu0 %v4926_v8  ;;  %v535_v8 = vsel %vm5157_vm3, 0, %v534_v6  ;;  %580 = vst [vmem:[#allocation2 + $0x5c] sm:$0x1] %v579_v46  ;;  %v593_v57 = vld [vmem:[#allocation2 + $0x84] sm:$0x1]  ;;  %v591_v58 = vsel %vm5205_vm5, 0, %v590_v56 }
  0x3e   :  { %4565 = vmatprep.subr.bf16.mxu0 %v4927_v9  ;;  %536 = vst [vmem:[#allocation2 + $0x88] sm:$0x1] %v535_v8  ;;  %586 = vst [vmem:[#allocation2 + $0x6c] sm:$0x1] %v585_v53  ;;  %v596_v61 = vld [vmem:[#allocation2 + $0x8c] sm:$0x1] }
  0x3f   :  { %v599_v62 = vld [vmem:[#allocation2 + $0x94] sm:$0x1]  ;;  %592 = vst [vmem:[#allocation2 + $0x7c] sm:$0x1] %v591_v58  ;;  %v597_v1 = vsel %vm5205_vm5, 0, %v596_v61  ;;  %v5301_v50 = vld [vmem:[#allocation6 + $0x40] sm:$0xff]  }
  0x40   :  { %v600_v2 = vsel %vm5205_vm5, 0, %v599_v62  ;;  %v489_v5 = vld [vmem:[#allocation2 + $0x10] sm:$0x1]  ;;  %598 = vst [vmem:[#allocation2 + $0x8c] sm:$0x1] %v597_v1  ;;  %6502 = vst [vmem:[#allocation14_spill] sm:$0xff] %v5301_v50 }
  0x41   :  { %4566 = vmatpush3.bf16.msra.mxu0 %v4927_v9  ;;  %v537_v9 = vld [vmem:[#allocation2 + $0x90] sm:$0x1]  ;;  %601 = vst [vmem:[#allocation2 + $0x94] sm:$0x1] %v600_v2  ;;  %v4936_v56 = vld [vmem:[#allocation6 + $0x18] sm:$0xff]  }
  0x42   :  { %4567 = vmatprep.subr.bf16.mxu0 %v4928_v10  ;;  %v538_v12 = vsel %vm5157_vm3, 0, %v537_v9  ;;  %v490_v9 = vsel %vm5157_vm3, 0, %v489_v5  ;;  %v822_v13 = vld [vmem:[#allocation2 + $0x60] sm:$0xf] }
  0x43   :  { %539 = vst [vmem:[#allocation2 + $0x90] sm:$0x1] %v538_v12  ;;  %491 = vst [vmem:[#allocation2 + $0x10] sm:$0x1] %v490_v9  ;;  %v492_v12 = vld [vmem:[#allocation2 + $0x18] sm:$0x1] }
  0x45   :  { %4568 = vmatpush3.bf16.msra.mxu0 %v4928_v10 }
  0x48   :  { %4570 = vmatmul.mubr.bf16.vlgmr.msra.gmra.mrb[0].mxu0 %v67_v15  ;;  %v551_v15 = vld [vmem:[#allocation2 + $0x14] sm:$0x1] }
  0x49   :  { %4573 = vmatprep.mubr.bf16.mxu0 %v68_v16  ;;  %v549_v16 = vsel %vm5205_vm5, 0, %v548_v14  ;;  %v552_v17 = vsel %vm5205_vm5, 0, %v551_v15  ;;  %v495_v14 = vld [vmem:[#allocation2 + $0x20] sm:$0x1] }
  0x4a   :  { %550 = vst [vmem:[#allocation2 + $0xc] sm:$0x1] %v549_v16  ;;  %553 = vst [vmem:[#allocation2 + $0x14] sm:$0x1] %v552_v17  ;;  %v493_v17 = vsel %vm5157_vm3, 0, %v492_v12 }
  0x4b   :  { %494 = vst [vmem:[#allocation2 + $0x18] sm:$0x1] %v493_v17 }
  0x50   :  { %4574 = vmatmul.mubr.bf16.gmra.mrb[4].mxu0 %v69_v21  ;;  %v555_v21 = vsel %vm5205_vm5, 0, %v554_v18  ;;  %v496_v18 = vsel %vm5157_vm3, 0, %v495_v14 }
  0x51   :  { %4577 = vmatprep.mubr.bf16.mxu0 %v70_v22  ;;  %v558_v22 = vsel %vm5205_vm5, 0, %v557_v19  ;;  %556 = vst [vmem:[#allocation2 + $0x1c] sm:$0x1] %v555_v21  ;;  %497 = vst [vmem:[#allocation2 + $0x20] sm:$0x1] %v496_v18 }
  0x52   :  { %559 = vst [vmem:[#allocation2 + $0x24] sm:$0x1] %v558_v22  ;;  %v5061_v22 = vmov 0  }
  0x53   :  { %470 = vst.msk [vmem:[#allocation2] sm:$0xf] %vm469_vm6, %v5061_v22  ;;  %473 = vst.msk [vmem:[#allocation2 + $0x50] sm:$0xf] %vm469_vm6, %v5061_v22 }
  0x54   :  { %472 = vst.msk [vmem:[#allocation2 + $0x4] sm:$0x1] %vm471_vm1, %v5061_v22  ;;  %474 = vst.msk [vmem:[#allocation2 + $0x54] sm:$0x1] %vm471_vm1, %v5061_v22 }
  0x55   :  { %476 = vst.msk [vmem:[#allocation2 + $0x48] sm:$0xf] %vm469_vm6, %v5061_v22  ;;  %478 = vst.msk [vmem:[#allocation2 + $0x98] sm:$0xf] %vm469_vm6, %v5061_v22 }
  0x56   :  { %477 = vst.msk [vmem:[#allocation2 + $0x4c] sm:$0x1] %vm471_vm1, %v5061_v22  ;;  %479 = vst.msk [vmem:[#allocation2 + $0x9c] sm:$0x1] %vm471_vm1, %v5061_v22 }
  0x58   :  { %4578 = vmatmul.mubr.bf16.gmra.mrb[8].mxu0 %v71_v27  ;;  %v561_v27 = vsel %vm5205_vm5, 0, %v560_v23 }
  0x59   :  { %4581 = vmatprep.mubr.bf16.mxu0 %v72_v28  ;;  %v564_v28 = vsel %vm5205_vm5, 0, %v563_v24  ;;  %562 = vst [vmem:[#allocation2 + $0x2c] sm:$0x1] %v561_v27 }
  0x5a   :  { %565 = vst [vmem:[#allocation2 + $0x34] sm:$0x1] %v564_v28  ;;  %v483_v42 = vld [vmem:[#allocation2] sm:$0x1] }
  0x5b   :  { %v575_v53 = vld [vmem:[#allocation2 + $0x54] sm:$0x1] }
  0x5c   :  { %v576_v58 = vsel %vm5205_vm5, 0, %v575_v53 }
  0x5d   :  { %577 = vst [vmem:[#allocation2 + $0x54] sm:$0x1] %v576_v58 }
  0x60   :  { %4582 = vmatmul.mubr.bf16.gmra.mrb[12].mxu0 %v73_v31 }
 0x11b   :  { %v5144_v32 = vpop.f32.mrb[0].mxu0 }
 0x11c   :  { %v5146_v33 = vpop.f32.mrb[1].mxu0  ;;  %v241_v45 = vsel %vm237_vm0, %v5144_v32, 0.0 }
 0x11d   :  { %v5148_v34 = vpop.f32.mrb[2].mxu0  ;;  %v238_v36 = vsel %vm237_vm0, %v5146_v33, 0.0 }
 0x11e   :  { %v5150_v35 = vpop.f32.mrb[3].mxu0  ;;  %v243_v54 = vsel %vm237_vm0, %v5148_v34, 0.0 }
 0x11f   :  { %v239_v37 = vsel %vm237_vm0, %v5150_v35, 0.0 }
 0x120   :  { %v240_v41 = vadd.f32 %v239_v37, %v238_v36  ;;  %v567_v36 = vsel %vm5205_vm5, 0, %v566_v29  ;;  %v569_v37 = vld [vmem:[#allocation2 + $0x44] sm:$0x1] }
 0x121   :  { %568 = vst [vmem:[#allocation2 + $0x3c] sm:$0x1] %v567_v36  ;;  %v4929_v36 = vld [vmem:[#allocation6 + $0x30] sm:$0xff]  }
 0x122   :  { %v242_v49 = vadd.f32 %v241_v45, %v240_v41  ;;  %v570_v41 = vsel %vm5205_vm5, 0, %v569_v37  ;;  %4645 = vmatprep.subr.bf16.mxu1 %v4929_v36 }
 0x123   :  { %v5175_v55 = vpop.f32.mrb[4].mxu0  ;;  %571 = vst [vmem:[#allocation2 + $0x44] sm:$0x1] %v570_v41  ;;  %4646 = vmatpush3.bf16.msra.mxu1 %v4929_v36 }
 0x124   :  { %v5181_v59 = vpop.f32.mrb[5].mxu0  ;;  %v244_v60 = vadd.f32 %v243_v54, %v242_v49  ;;  %v249_v10 = vsel %vm237_vm0, %v5175_v55, 0.0  ;;  %v582_v49 = vsel %vm5205_vm5, 0, %v581_v47  ;;  %v588_v54 = vsel %vm5205_vm5, 0, %v587_v51  ;;  %v4934_v51 = vld [vmem:[#allocation6 + $0x10] sm:$0xff]  }
 0x125   :  { %v245_v63 = vsel %vm237_vm0, %v5181_v59, 0.0  ;;  %v5187_v0 = vpop.f32.mrb[6].mxu0  ;;  %583 = vst [vmem:[#allocation2 + $0x64] sm:$0x1] %v582_v49  ;;  %589 = vst [vmem:[#allocation2 + $0x74] sm:$0x1] %v588_v54  ;;  %4585 = vmatprep.subr.bf16.mxu0 %v4934_v51 }
 0x126   :  { %v246_v3 = vadd.f32 %v245_v63, %v244_v60  ;;  %v5191_v4 = vpop.f32.mrb[7].mxu0  ;;  %v251_v25 = vsel %vm237_vm0, %v5187_v0, 0.0  ;;  %v594_v60 = vsel %vm5205_vm5, 0, %v593_v57  ;;  %4586 = vmatpush3.bf16.msra.mxu0 %v4934_v51 }
 0x127   :  { %v247_v7 = vsel %vm237_vm0, %v5191_v4, 0.0  ;;  %595 = vst [vmem:[#allocation2 + $0x84] sm:$0x1] %v594_v60  ;;  %4587 = vmatprep.subr.bf16.mxu0 %v4936_v56 }
 0x128   :  { %v248_v11 = vadd.f32 %v247_v7, %v246_v3  ;;  %v486_v3 = vld [vmem:[#allocation2 + $0x8] sm:$0x1] }
 0x129   :  { %v487_v8 = vsel %vm5157_vm3, 0, %v486_v3 }
 0x12a   :  { %v250_v20 = vadd.f32 %v249_v10, %v248_v11  ;;  %488 = vst [vmem:[#allocation2 + $0x8] sm:$0x1] %v487_v8  ;;  %4588 = vmatpush3.bf16.msra.mxu0 %v4936_v56 }
 0x12b   :  { %v5219_v26 = vpop.f32.mrb[8].mxu0 }
 0x12c   :  { %v5225_v30 = vpop.f32.mrb[9].mxu0  ;;  %v252_v31 = vadd.f32 %v251_v25, %v250_v20  ;;  %v257_v43 = vsel %vm237_vm0, %v5219_v26, 0.0 }
 0x12d   :  { %v253_v39 = vsel %vm237_vm0, %v5225_v30, 0.0  ;;  %v5231_v40 = vpop.f32.mrb[10].mxu0 }
 0x12e   :  { %v254_v44 = vadd.f32 %v253_v39, %v252_v31  ;;  %v5237_v45 = vpop.f32.mrb[11].mxu0  ;;  %v259_v6 = vsel %vm237_vm0, %v5231_v40, 0.0  ;;  %v4930_v39 = vld [vmem:[#allocation6 + $0x38] sm:$0xff]  }
 0x12f   :  { %v255_v48 = vsel %vm237_vm0, %v5237_v45, 0.0  ;;  %4647 = vmatprep.subr.bf16.mxu1 %v4930_v39 }
 0x130   :  { %v256_v52 = vadd.f32 %v255_v48, %v254_v44  ;;  %v484_v44 = vsel %vm5157_vm3, 0, %v483_v42  ;;  %4648 = vmatpush3.bf16.msra.mxu1 %v4930_v39 }
 0x131   :  { %485 = vst [vmem:[#allocation2] sm:$0x1] %v484_v44  ;;  %4665 = vmatprep.subr.bf16.mxu1 %v5301_v50  ;;  %v828_v50 = vld [vmem:[#allocation2 + $0x68] sm:$0xf] }
 0x132   :  { %v258_v63 = vadd.f32 %v257_v43, %v256_v52  ;;  %v545_v43 = vld [vmem:[#allocation2 + $0x4] sm:$0x1]  ;;  %v513_v52 = vld [vmem:[#allocation2 + $0x50] sm:$0x1] }
 0x133   :  { %v5259_v7 = vpop.f32.mrb[12].mxu0  ;;  %v546_v46 = vsel %vm5205_vm5, 0, %v545_v43  ;;  %v514_v57 = vsel %vm5157_vm3, 0, %v513_v52 }
 0x134   :  { %v5265_v10 = vpop.f32.mrb[13].mxu0  ;;  %v260_v11 = vadd.f32 %v259_v6, %v258_v63  ;;  %v265_v25 = vsel %vm237_vm0, %v5259_v7, 0.0  ;;  %547 = vst [vmem:[#allocation2 + $0x4] sm:$0x1] %v546_v46  ;;  %515 = vst [vmem:[#allocation2 + $0x50] sm:$0x1] %v514_v57 }
 0x135   :  { %v261_v15 = vsel %vm237_vm0, %v5265_v10, 0.0  ;;  %v5269_v16 = vpop.f32.mrb[14].mxu0 }
 0x136   :  { %v262_v19 = vadd.f32 %v261_v15, %v260_v11  ;;  %v5275_v20 = vpop.f32.mrb[15].mxu0  ;;  %v267_v28 = vsel %vm237_vm0, %v5269_v16, 0.0 }
 0x137   :  { %v263_v23 = vsel %vm237_vm0, %v5275_v20, 0.0 }
 0x138   :  { %v264_v24 = vadd.f32 %v263_v23, %v262_v19 }
 0x13a   :  { %v266_v27 = vadd.f32 %v265_v25, %v264_v24 }
 0x13c   :  { %v268_v29 = vadd.f32 %v267_v28, %v266_v27 }
 0x13e   :  { %v269_v31 = vrot.slane %v268_v29, 4 }
 0x140   :  { %v270_v37 = vadd.f32 %v269_v31, %v268_v29 }
 0x142   :  { %v271_v41 = vrot.slane %v270_v37, 2 }
 0x144   :  { %v272_v47 = vadd.f32 %v271_v41, %v270_v37 }
 0x146   :  { %v273_v48 = vrot.slane %v272_v47, 1 }
 0x148   :  { %v274_v49 = vadd.f32 %v273_v48, %v272_v47 }
 0x14a   :  { %v276_v54 = vmul.f32 0.0078125, %v274_v49 }
 0x14c   :  { %v5309_v60 = vsub.f32 %v5146_v33, %v276_v54  ;;  %v5312_v61 = vsub.f32 %v5150_v35, %v276_v54  ;;  %v5315_v62 = vsub.f32 %v5144_v32, %v276_v54  ;;  %v5318_v63 = vsub.f32 %v5148_v34, %v276_v54 }
 0x14d   :  { %v5321_v1 = vsub.f32 %v5181_v59, %v276_v54  ;;  %v5324_v2 = vsub.f32 %v5191_v4, %v276_v54  ;;  %v5327_v33 = vsub.f32 %v5175_v55, %v276_v54  ;;  %v5330_v35 = vsub.f32 %v5187_v0, %v276_v54 }
 0x14e   :  { %v5333_v32 = vsub.f32 %v5225_v30, %v276_v54  ;;  %v5336_v34 = vsub.f32 %v5237_v45, %v276_v54  ;;  %v5339_v3 = vsub.f32 %v5219_v26, %v276_v54  ;;  %v5342_v59 = vsub.f32 %v5231_v40, %v276_v54 }
 0x14f   :  { %v5345_v4 = vsub.f32 %v5265_v10, %v276_v54  ;;  %v5348_v55 = vsub.f32 %v5275_v20, %v276_v54  ;;  %v5351_v0 = vsub.f32 %v5259_v7, %v276_v54  ;;  %v5354_v30 = vsub.f32 %v5269_v16, %v276_v54 }
 0x150   :  { %v293_v45 = vmul.f32 %v5309_v60, %v5309_v60  ;;  %v294_v26 = vmul.f32 %v5312_v61, %v5312_v61  ;;  %v295_v40 = vmul.f32 %v5315_v62, %v5315_v62  ;;  %v296_v5 = vmul.f32 %v5318_v63, %v5318_v63 }
 0x151   :  { %v297_v9 = vmul.f32 %v5321_v1, %v5321_v1  ;;  %v298_v12 = vmul.f32 %v5324_v2, %v5324_v2  ;;  %v299_v16 = vmul.f32 %v5327_v33, %v5327_v33  ;;  %v300_v19 = vmul.f32 %v5330_v35, %v5330_v35 }
 0x152   :  { %v309_v6 = vsel %vm237_vm0, %v293_v45, 0.0  ;;  %v310_v7 = vsel %vm237_vm0, %v294_v26, 0.0  ;;  %v312_v10 = vsel %vm237_vm0, %v295_v40, 0.0  ;;  %v314_v14 = vsel %vm237_vm0, %v296_v5, 0.0 }
 0x153   :  { %v311_v8 = vadd.f32 %v310_v7, %v309_v6  ;;  %v316_v17 = vsel %vm237_vm0, %v297_v9, 0.0  ;;  %v318_v20 = vsel %vm237_vm0, %v298_v12, 0.0  ;;  %v301_v23 = vmul.f32 %v5333_v32, %v5333_v32  ;;  %v5404_v7 = vld [vmem:[#allocation6] sm:$0xff]  }
 0x154   :  { %v320_v24 = vsel %vm237_vm0, %v299_v16, 0.0  ;;  %v302_v27 = vmul.f32 %v5336_v34, %v5336_v34  ;;  %v322_v28 = vsel %vm237_vm0, %v300_v19, 0.0  ;;  %v303_v31 = vmul.f32 %v5339_v3, %v5339_v3  ;;  %6503 = vst [vmem:[#allocation15_spill] sm:$0xff] %v5404_v7  ;;  %4605 = vmatprep.subr.bf16.mxu0 %v5404_v7  ;;  %v872_v16 = vld [vmem:[#allocation2 + $0x50] sm:$0xf] }
 0x155   :  { %v313_v11 = vadd.f32 %v312_v10, %v311_v8  ;;  %v324_v36 = vsel %vm237_vm0, %v301_v23, 0.0  ;;  %v304_v39 = vmul.f32 %v5342_v59, %v5342_v59  ;;  %v305_v43 = vmul.f32 %v5345_v4, %v5345_v4 }
 0x156   :  { %v326_v41 = vsel %vm237_vm0, %v302_v27, 0.0  ;;  %v328_v44 = vsel %vm237_vm0, %v303_v31, 0.0  ;;  %v306_v47 = vmul.f32 %v5348_v55, %v5348_v55  ;;  %v307_v51 = vmul.f32 %v5351_v0, %v5351_v0 }
 0x157   :  { %v315_v15 = vadd.f32 %v314_v14, %v313_v11  ;;  %v330_v48 = vsel %vm237_vm0, %v304_v39, 0.0  ;;  %v332_v52 = vsel %vm237_vm0, %v305_v43, 0.0  ;;  %v308_v54 = vmul.f32 %v5354_v30, %v5354_v30  ;;  %v4179_v43 = vld [vmem:[%s6484_s4] ss:$0 sm:$0xff] }
 0x158   :  { %v334_v56 = vsel %vm237_vm0, %v306_v47, 0.0  ;;  %v336_v58 = vsel %vm237_vm0, %v307_v51, 0.0  ;;  %v1016_v19 = vshrl.u32 %v872_v16, 16 }
 0x159   :  { %v317_v18 = vadd.f32 %v316_v17, %v315_v15  ;;  %v338_v26 = vsel %vm237_vm0, %v308_v54, 0.0  ;;  %v864_v15 = vld [vmem:[#allocation2] sm:$0xf] }
 0x15a   :  { %v904_v17 = vshrl.u32 %v864_v15, 16 }
 0x15b   :  { %v319_v22 = vadd.f32 %v318_v20, %v317_v18  ;;  %v907_v18 = vshll.u32 %v864_v15, 16  ;;  %v1019_v20 = vshll.u32 %v872_v16, 16 }
 0x15c   :  { %v5409_v23 = vrot.slane %v904_v17, 4 }
 0x15d   :  { %v321_v25 = vadd.f32 %v320_v24, %v319_v22  ;;  %v5407_v22 = vld [vmem:[#allocation2 + $0x4] sm:$0x1]  ;;  %v5418_v31 = vrot.slane %v1019_v20, 5 }
 0x15f   :  { %v323_v29 = vadd.f32 %v322_v28, %v321_v25  ;;  %v5412_v25 = vld [vmem:[#allocation2 + $0x54] sm:$0x1]  ;;  %v5414_v28 = vrot.slane %v907_v18, 5 }
 0x161   :  { %v325_v37 = vadd.f32 %v324_v36, %v323_v29  ;;  %v5416_v29 = vrot.slane %v1016_v19, 4  ;;  %v792_v36 = vld [vmem:[#allocation2 + $0x28] sm:$0xf] }
 0x163   :  { %v327_v42 = vadd.f32 %v326_v41, %v325_v37 }
 0x165   :  { %v329_v46 = vadd.f32 %v328_v44, %v327_v42 }
 0x167   :  { %v331_v49 = vadd.f32 %v330_v48, %v329_v46 }
 0x169   :  { %v333_v53 = vadd.f32 %v332_v52, %v331_v49 }
 0x16b   :  { %v335_v57 = vadd.f32 %v334_v56, %v333_v53 }
 0x16d   :  { %v337_v45 = vadd.f32 %v336_v58, %v335_v57 }
 0x16f   :  { %v339_v40 = vadd.f32 %v338_v26, %v337_v45 }
 0x171   :  { %v340_v5 = vrot.slane %v339_v40, 4 }
 0x173   :  { %v341_v6 = vadd.f32 %v340_v5, %v339_v40 }
 0x175   :  { %v342_v8 = vrot.slane %v341_v6, 2 }
 0x177   :  { %v343_v9 = vadd.f32 %v342_v8, %v341_v6 }
 0x179   :  { %v344_v10 = vrot.slane %v343_v9, 1 }
 0x17b   :  { %v345_v11 = vadd.f32 %v344_v10, %v343_v9 }
 0x17d   :  { %v346_v12 = vmul.f32 0.0078125, %v345_v11 }
 0x17f   :  { %v347_v14 = vadd.f32 1e-05, %v346_v12 }
 0x181   :  { %4972 = vrsqrt.f32 %v347_v14 }
 0x18b   :  { %v4973_v27 = vpop.eup %4972 }
 0x18c   :  { %v349_v37 = vmul.f32 %v4973_v27, %v5309_v60  ;;  %v350_v39 = vmul.f32 %v4973_v27, %v5312_v61  ;;  %v351_v41 = vmul.f32 %v4973_v27, %v5315_v62  ;;  %v352_v42 = vmul.f32 %v4973_v27, %v5318_v63 }
 0x18d   :  { %v353_v44 = vmul.f32 %v4973_v27, %v5321_v1  ;;  %v354_v46 = vmul.f32 %v4973_v27, %v5324_v2  ;;  %v355_v47 = vmul.f32 %v4973_v27, %v5327_v33  ;;  %v356_v48 = vmul.f32 %v4973_v27, %v5330_v35 }
 0x18e   :  { %v357_v60 = vmul.f32 %v4973_v27, %v5333_v32  ;;  %v358_v61 = vmul.f32 %v4973_v27, %v5336_v34  ;;  %v359_v62 = vmul.f32 %v4973_v27, %v5339_v3  ;;  %v360_v63 = vmul.f32 %v4973_v27, %v5342_v59  ;;  %v4180_v32 = vld [vmem:[%s6484_s4 + $0x1] ss:$0 sm:$0xff] }
 0x18f   :  { %v361_v49 = vmul.f32 %v4973_v27, %v5345_v4  ;;  %v362_v51 = vmul.f32 %v4973_v27, %v5348_v55  ;;  %v363_v1 = vmul.f32 %v4973_v27, %v5351_v0  ;;  %v364_v2 = vmul.f32 %v4973_v27, %v5354_v30 }
 0x190   :  { %v369_v52 = vmul.f32 %v4179_v43, %v349_v37  ;;  %v370_v33 = vmul.f32 %v4179_v43, %v350_v39  ;;  %v371_v53 = vmul.f32 %v4179_v43, %v351_v41  ;;  %v372_v35 = vmul.f32 %v4179_v43, %v352_v42 }
 0x191   :  { %v373_v34 = vmul.f32 %v4179_v43, %v353_v44  ;;  %v374_v3 = vmul.f32 %v4179_v43, %v354_v46  ;;  %v375_v54 = vmul.f32 %v4179_v43, %v355_v47  ;;  %v376_v59 = vmul.f32 %v4179_v43, %v356_v48 }
 0x192   :  { %v377_v56 = vmul.f32 %v4179_v43, %v357_v60  ;;  %v378_v4 = vmul.f32 %v4179_v43, %v358_v61  ;;  %v379_v57 = vmul.f32 %v4179_v43, %v359_v62  ;;  %v380_v55 = vmul.f32 %v4179_v43, %v360_v63 }
 0x193   :  { %v381_v58 = vmul.f32 %v4179_v43, %v361_v49  ;;  %v382_v0 = vmul.f32 %v4179_v43, %v362_v51  ;;  %v383_v45 = vmul.f32 %v4179_v43, %v363_v1  ;;  %v384_v30 = vmul.f32 %v4179_v43, %v364_v2 }
 0x194   :  { %v389_v26 = vadd.f32 %v4180_v32, %v369_v52  ;;  %v390_v40 = vadd.f32 %v4180_v32, %v370_v33  ;;  %v391_v5 = vadd.f32 %v4180_v32, %v371_v53  ;;  %v392_v6 = vadd.f32 %v4180_v32, %v372_v35 }
 0x195   :  { %v393_v8 = vadd.f32 %v4180_v32, %v373_v34  ;;  %v394_v9 = vadd.f32 %v4180_v32, %v374_v3  ;;  %v395_v10 = vadd.f32 %v4180_v32, %v375_v54  ;;  %v396_v11 = vadd.f32 %v4180_v32, %v376_v59 }
 0x196   :  { %v397_v12 = vadd.f32 %v4180_v32, %v377_v56  ;;  %v398_v14 = vadd.f32 %v4180_v32, %v378_v4  ;;  %v399_v15 = vadd.f32 %v4180_v32, %v379_v57  ;;  %v400_v16 = vadd.f32 %v4180_v32, %v380_v55 }
 0x197   :  { %v401_v17 = vadd.f32 %v4180_v32, %v381_v58  ;;  %v402_v18 = vadd.f32 %v4180_v32, %v382_v0  ;;  %v403_v19 = vadd.f32 %v4180_v32, %v383_v45  ;;  %v404_v20 = vadd.f32 %v4180_v32, %v384_v30 }
 0x198   :  { %v405_v27 = vmax.f32 %v389_v26, 0.0  ;;  %v406_v37 = vmax.f32 %v390_v40, 0.0  ;;  %v407_v39 = vmax.f32 %v391_v5, 0.0  ;;  %v408_v41 = vmax.f32 %v392_v6, 0.0 }
 0x199   :  { %v409_v42 = vmax.f32 %v393_v8, 0.0  ;;  %v410_v43 = vmax.f32 %v394_v9, 0.0  ;;  %v411_v44 = vmax.f32 %v395_v10, 0.0  ;;  %v412_v46 = vmax.f32 %v396_v11, 0.0 }
 0x19a   :  { %v413_v47 = vmax.f32 %v397_v12, 0.0  ;;  %v414_v48 = vmax.f32 %v398_v14, 0.0  ;;  %v415_v60 = vmax.f32 %v399_v15, 0.0  ;;  %v416_v61 = vmax.f32 %v400_v16, 0.0 }
 0x19b   :  { %v417_v62 = vmax.f32 %v401_v17, 0.0  ;;  %v418_v63 = vmax.f32 %v402_v18, 0.0  ;;  %v419_v49 = vmax.f32 %v403_v19, 0.0  ;;  %v420_v51 = vmax.f32 %v404_v20, 0.0 }
 0x19c   :  { %v5443_v1 = vpack.c.bf16 %v405_v27, %v405_v27  ;;  %v5445_v2 = vpack.c.bf16 %v406_v37, %v406_v37  ;;  %v4423_v52 = vpack.c.bf16 %v407_v39, %v407_v39  ;;  %v4424_v33 = vpack.c.bf16 %v408_v41, %v408_v41 }
 0x19d   :  { %v4425_v53 = vpack.c.bf16 %v409_v42, %v409_v42  ;;  %v4426_v35 = vpack.c.bf16 %v410_v43, %v410_v43  ;;  %v4427_v32 = vpack.c.bf16 %v411_v44, %v411_v44  ;;  %v4428_v34 = vpack.c.bf16 %v412_v46, %v412_v46  ;;  %v810_v44 = vld [vmem:[#allocation2 + $0x40] sm:$0xf]  ;;  %v816_v42 = vld [vmem:[#allocation2 + $0x58] sm:$0xf] }
 0x19e   :  { %v4429_v3 = vpack.c.bf16 %v413_v47, %v413_v47  ;;  %v5447_v54 = vpack.c.bf16 %v414_v48, %v414_v48  ;;  %v5449_v59 = vpack.c.bf16 %v415_v60, %v415_v60  ;;  %v5451_v56 = vpack.c.bf16 %v416_v61, %v416_v61 }
 0x19f   :  { %v5453_v4 = vpack.c.bf16 %v417_v62, %v417_v62  ;;  %v5455_v57 = vpack.c.bf16 %v418_v63, %v418_v63  ;;  %v5457_v55 = vpack.c.bf16 %v419_v49, %v419_v49  ;;  %v5459_v58 = vpack.c.bf16 %v420_v51, %v420_v51  ;;  %v804_v51 = vld [vmem:[#allocation2 + $0x38] sm:$0xf] }
 0x1a0   :  { %v606_v0 = vshrl.u32 %v5443_v1, 16  ;;  %v614_v30 = vshrl.u32 %v5445_v2, 16  ;;  %v622_v40 = vshrl.u32 %v4423_v52, 16  ;;  %v625_v5 = vshll.u32 %v4423_v52, 16 }
 0x1a1   :  { %v630_v6 = vshrl.u32 %v4424_v33, 16  ;;  %v633_v8 = vshll.u32 %v4424_v33, 16  ;;  %v638_v11 = vshrl.u32 %v4425_v53, 16  ;;  %v641_v12 = vshll.u32 %v4425_v53, 16 }
 0x1a2   :  { %v5465_v9 = vrot.slane %v606_v0, 7  ;;  %v5467_v10 = vrot.slane %v614_v30, 7  ;;  %v5469_v14 = vrot.slane %v622_v40, 7  ;;  %v646_v16 = vshrl.u32 %v4426_v35, 16 }
 0x1a3   :  { %v5471_v15 = vrot.slane %v630_v6, 7  ;;  %v649_v17 = vshll.u32 %v4426_v35, 16  ;;  %v5475_v20 = vrot.slane %v638_v11, 7  ;;  %v654_v27 = vshrl.u32 %v4427_v32, 16 }
 0x1a4   :  { %v612_v18 = vrot.slane %v5465_v9, 4  ;;  %v620_v19 = vrot.slane %v5467_v10, 4  ;;  %v5478_v37 = vor.u32 %v625_v5, %v5469_v14  ;;  %v5489_v46 = vrot.slane %v646_v16, 7 }
 0x1a5   :  { %v5482_v41 = vor.u32 %v633_v8, %v5471_v15  ;;  %v5486_v43 = vor.u32 %v641_v12, %v5475_v20  ;;  %v5491_v47 = vrot.slane %v654_v27, 7  ;;  %v657_v48 = vshll.u32 %v4427_v32, 16  ;;  %v798_v8 = vld [vmem:[#allocation2 + $0x30] sm:$0xf] }
 0x1a6   :  { %v662_v60 = vshrl.u32 %v4428_v34, 16  ;;  %v665_v61 = vshll.u32 %v4428_v34, 16  ;;  %v670_v62 = vshrl.u32 %v4429_v3, 16  ;;  %v5494_v63 = vor.u32 %v649_v17, %v5489_v46 }
 0x1a7   :  { %v673_v52 = vshll.u32 %v4429_v3, 16  ;;  %v5499_v33 = vor.u32 %v657_v48, %v5491_v47  ;;  %v678_v32 = vshrl.u32 %v5447_v54, 16  ;;  %v681_v34 = vshll.u32 %v5447_v54, 16  ;;  %v801_v3 = vld [vmem:[#allocation2 + $0x34] sm:$0x1] }
 0x1a8   :  { %v5501_v53 = vrot.slane %v662_v60, 7  ;;  %v5503_v35 = vrot.slane %v670_v62, 7  ;;  %v686_v0 = vshrl.u32 %v5449_v59, 16  ;;  %v689_v30 = vshll.u32 %v5449_v59, 16  ;;  %v771_v60 = vld [vmem:[#allocation2 + $0xc] sm:$0x1] }
 0x1a9   :  { %v694_v40 = vshrl.u32 %v5451_v56, 16  ;;  %v5518_v11 = vrot.slane %v678_v32, 7  ;;  %v697_v59 = vshll.u32 %v5451_v56, 16  ;;  %v702_v16 = vshrl.u32 %v5453_v4, 16 }
 0x1aa   :  { %v5511_v5 = vor.u32 %v665_v61, %v5501_v53  ;;  %v5515_v6 = vor.u32 %v673_v52, %v5503_v35  ;;  %v5520_v12 = vrot.slane %v686_v0, 7  ;;  %v705_v17 = vshll.u32 %v5453_v4, 16  ;;  %v777_v61 = vld [vmem:[#allocation2 + $0x14] sm:$0x1]  ;;  %v783_v0 = vld [vmem:[#allocation2 + $0x1c] sm:$0x1] }
 0x1ab   :  { %v5522_v54 = vrot.slane %v694_v40, 7  ;;  %v710_v27 = vshrl.u32 %v5455_v57, 16  ;;  %v713_v48 = vshll.u32 %v5455_v57, 16  ;;  %v5530_v62 = vor.u32 %v681_v34, %v5518_v11  ;;  %v789_v40 = vld [vmem:[#allocation2 + $0x24] sm:$0x1] }
 0x1ac   :  { %v5534_v32 = vor.u32 %v689_v30, %v5520_v12  ;;  %v5541_v24 = vrot.slane %v702_v16, 7  ;;  %v795_v34 = vld [vmem:[#allocation2 + $0x2c] sm:$0x1]  ;;  %v718_v45 = vshrl.u32 %v5457_v55, 16  ;;  %v721_v30 = vshll.u32 %v5457_v55, 16 }
 0x1ad   :  { %v5538_v4 = vor.u32 %v697_v59, %v5522_v54  ;;  %v5543_v26 = vrot.slane %v710_v27, 7  ;;  %v726_v52 = vshrl.u32 %v5459_v58, 16  ;;  %v729_v56 = vshll.u32 %v5459_v58, 16  ;;  %v807_v59 = vld [vmem:[#allocation2 + $0x3c] sm:$0x1] }
 0x1ae   :  { %v5550_v49 = vor.u32 %v705_v17, %v5541_v24  ;;  %v813_v55 = vld [vmem:[#allocation2 + $0x44] sm:$0x1]  ;;  %v5557_v39 = vrot.slane %v718_v45, 7  ;;  %v772_v17 = vsel %vm5157_vm3, %v612_v18, %v771_v60  ;;  %v819_v16 = vld [vmem:[#allocation2 + $0x5c] sm:$0x1]  ;;  %v6504_v57 = vrot.slane %v5469_v14, 4 }
 0x1af   :  { %v5554_v27 = vor.u32 %v713_v48, %v5543_v26  ;;  %v5559_v58 = vrot.slane %v726_v52, 7  ;;  %v778_v48 = vsel %vm5157_vm3, %v620_v19, %v777_v61  ;;  %v6505_v52 = vrot.slane %v5471_v15, 4  ;;  %v825_v61 = vld [vmem:[#allocation2 + $0x64] sm:$0x1]  ;;  %v831_v14 = vld [vmem:[#allocation2 + $0x6c] sm:$0x1] }
 0x1b0   :  { %v784_v45 = vsel %vm5157_vm3, %v6504_v57, %v783_v0  ;;  %v793_v18 = vsel %vm5279_vm7, %v5486_v43, %v792_v36  ;;  %v6506_v60 = vrot.slane %v5475_v20, 4  ;;  %773 = vst [vmem:[#allocation2 + $0xc] sm:$0x1] %v772_v17  ;;  %779 = vst [vmem:[#allocation2 + $0x14] sm:$0x1] %v778_v48  ;;  %v723_v0 = vor.u32 %v721_v30, %v5557_v39 }
 0x1b1   :  { %v790_v7 = vsel %vm5157_vm3, %v6505_v52, %v789_v40  ;;  %v724_v15 = vrot.slane %v5557_v39, 4  ;;  %v5587_v40 = vor.u32 %v729_v56, %v5559_v58  ;;  %v732_v57 = vrot.slane %v5559_v58, 4  ;;  %785 = vst [vmem:[#allocation2 + $0x1c] sm:$0x1] %v784_v45  ;;  %v834_v36 = vld [vmem:[#allocation2 + $0x70] sm:$0xf] }
 0x1b2   :  { %v796_v19 = vsel %vm5157_vm3, %v6506_v60, %v795_v34  ;;  %v837_v20 = vld [vmem:[#allocation2 + $0x74] sm:$0x1]  ;;  %791 = vst [vmem:[#allocation2 + $0x24] sm:$0x1] %v790_v7  ;;  %794 = vst [vmem:[#allocation2 + $0x28] sm:$0xf] %v793_v18  ;;  %v799_v43 = vsel %vm5279_vm7, %v5494_v63, %v798_v8  ;;  %v805_v56 = vsel %vm5279_vm7, %v5499_v33, %v804_v51 }
 0x1b3   :  { %797 = vst [vmem:[#allocation2 + $0x2c] sm:$0x1] %v796_v19  ;;  %v6507_v34 = vrot.slane %v5489_v46, 4  ;;  %v6508_v30 = vrot.slane %v5491_v47, 4  ;;  %v840_v58 = vld [vmem:[#allocation2 + $0x78] sm:$0xf]  ;;  %v811_v63 = vsel %vm5279_vm7, %v5511_v5, %v810_v44  ;;  %v817_v51 = vsel %vm5279_vm7, %v5515_v6, %v816_v42 }
 0x1b4   :  { %v843_v17 = vld [vmem:[#allocation2 + $0x7c] sm:$0x1]  ;;  %v846_v48 = vld [vmem:[#allocation2 + $0x80] sm:$0xf]  ;;  %v6509_v46 = vrot.slane %v5501_v53, 4  ;;  %v6510_v47 = vrot.slane %v5503_v35, 4  ;;  %v823_v44 = vsel %vm5279_vm7, %v5530_v62, %v822_v13  ;;  %v829_v35 = vsel %vm5279_vm7, %v5534_v32, %v828_v50 }
 0x1b5   :  { %v802_v39 = vsel %vm5157_vm3, %v6507_v34, %v801_v3  ;;  %v808_v7 = vsel %vm5157_vm3, %v6508_v30, %v807_v59  ;;  %v849_v8 = vld [vmem:[#allocation2 + $0x84] sm:$0x1]  ;;  %v852_v59 = vld [vmem:[#allocation2 + $0x88] sm:$0xf]  ;;  %v855_v45 = vld [vmem:[#allocation2 + $0x8c] sm:$0x1]  ;;  %v835_v13 = vsel %vm5279_vm7, %v5538_v4, %v834_v36 }
 0x1b6   :  { %v814_v3 = vsel %vm5157_vm3, %v6509_v46, %v813_v55  ;;  %v820_v33 = vsel %vm5157_vm3, %v6510_v47, %v819_v16  ;;  %800 = vst [vmem:[#allocation2 + $0x30] sm:$0xf] %v799_v43  ;;  %803 = vst [vmem:[#allocation2 + $0x34] sm:$0x1] %v802_v39  ;;  %v6511_v42 = vrot.slane %v5518_v11, 4  ;;  %v6512_v5 = vrot.slane %v5520_v12, 4 }
 0x1b7   :  { %806 = vst [vmem:[#allocation2 + $0x38] sm:$0xf] %v805_v56  ;;  %809 = vst [vmem:[#allocation2 + $0x3c] sm:$0x1] %v808_v7  ;;  %v858_v16 = vld [vmem:[#allocation2 + $0x90] sm:$0xf]  ;;  %v841_v12 = vsel %vm5279_vm7, %v5550_v49, %v840_v58  ;;  %v856_v60 = vsel %vm5157_vm3, %v724_v15, %v855_v45 }
 0x1b8   :  { %815 = vst [vmem:[#allocation2 + $0x44] sm:$0x1] %v814_v3  ;;  %821 = vst [vmem:[#allocation2 + $0x5c] sm:$0x1] %v820_v33  ;;  %v826_v53 = vsel %vm5157_vm3, %v6511_v42, %v825_v61  ;;  %v832_v6 = vsel %vm5157_vm3, %v6512_v5, %v831_v14  ;;  %v861_v55 = vld [vmem:[#allocation2 + $0x94] sm:$0x1] }
 0x1b9   :  { %812 = vst [vmem:[#allocation2 + $0x40] sm:$0xf] %v811_v63  ;;  %818 = vst [vmem:[#allocation2 + $0x58] sm:$0xf] %v817_v51  ;;  %v6513_v11 = vrot.slane %v5522_v54, 4  ;;  %v6514_v62 = vrot.slane %v5541_v24, 4  ;;  %v847_v54 = vsel %vm5279_vm7, %v5554_v27, %v846_v48  ;;  %v853_v24 = vsel %vm5279_vm7, %v723_v0, %v852_v59 }
 0x1ba   :  { %827 = vst [vmem:[#allocation2 + $0x64] sm:$0x1] %v826_v53  ;;  %830 = vst [vmem:[#allocation2 + $0x68] sm:$0xf] %v829_v35  ;;  %v780_v52 = vld [vmem:[#allocation2 + $0x18] sm:$0xf]  ;;  %v859_v27 = vsel %vm5279_vm7, %v5587_v40, %v858_v16 }
 0x1bb   :  { %833 = vst [vmem:[#allocation2 + $0x6c] sm:$0x1] %v832_v6  ;;  %v838_v50 = vsel %vm5157_vm3, %v6513_v11, %v837_v20  ;;  %v844_v32 = vsel %vm5157_vm3, %v6514_v62, %v843_v17  ;;  %824 = vst [vmem:[#allocation2 + $0x60] sm:$0xf] %v823_v44  ;;  %v786_v18 = vld [vmem:[#allocation2 + $0x20] sm:$0xf]  ;;  %v781_v40 = vsel %vm5279_vm7, %v5478_v37, %v780_v52 }
 0x1bc   :  { %836 = vst [vmem:[#allocation2 + $0x70] sm:$0xf] %v835_v13  ;;  %839 = vst [vmem:[#allocation2 + $0x74] sm:$0x1] %v838_v50  ;;  %v6515_v4 = vrot.slane %v5543_v26, 4  ;;  %v862_v26 = vsel %vm5157_vm3, %v732_v57, %v861_v55  ;;  %v6516_v14 = vshll.u32 %v5443_v1, 16  ;;  %v787_v57 = vsel %vm5279_vm7, %v5482_v41, %v786_v18 }
 0x1bd   :  { %842 = vst [vmem:[#allocation2 + $0x78] sm:$0xf] %v841_v12  ;;  %845 = vst [vmem:[#allocation2 + $0x7c] sm:$0x1] %v844_v32  ;;  %v768_v19 = vld [vmem:[#allocation2 + $0x8] sm:$0xf]  ;;  %v910_v1 = vor.u32 %v5414_v28, %v5409_v23  ;;  %v1022_v41 = vor.u32 %v5418_v31, %v5416_v29 }
 0x1be   :  { %v850_v49 = vsel %vm5157_vm3, %v6515_v4, %v849_v8  ;;  %v774_v61 = vld [vmem:[#allocation2 + $0x10] sm:$0xf]  ;;  %848 = vst [vmem:[#allocation2 + $0x80] sm:$0xf] %v847_v54  ;;  %854 = vst [vmem:[#allocation2 + $0x88] sm:$0xf] %v853_v24  ;;  %v611_v0 = vor.u32 %v6516_v14, %v5465_v9 }
 0x1bf   :  { %851 = vst [vmem:[#allocation2 + $0x84] sm:$0x1] %v850_v49  ;;  %857 = vst [vmem:[#allocation2 + $0x8c] sm:$0x1] %v856_v60  ;;  %v6517_v15 = vshll.u32 %v5445_v2, 16  ;;  %v6518_v56 = vshll.u32 %v5407_v22, 16 }
 0x1c0   :  { %v5668_v20 = vld [vmem:[#allocation2 + $0xc] sm:$0x1]  ;;  %v5670_v43 = vld [vmem:[#allocation2 + $0x14] sm:$0x1]  ;;  %860 = vst [vmem:[#allocation2 + $0x90] sm:$0xf] %v859_v27  ;;  %v769_v9 = vsel %vm5279_vm7, %v611_v0, %v768_v19 }
 0x1c1   :  { %v619_v36 = vor.u32 %v6517_v15, %v5467_v10  ;;  %863 = vst [vmem:[#allocation2 + $0x94] sm:$0x1] %v862_v26  ;;  %v5680_v2 = vld [vmem:[#allocation2 + $0x1c] sm:$0x1]  ;;  %782 = vst [vmem:[#allocation2 + $0x18] sm:$0xf] %v781_v40 }
 0x1c2   :  { %788 = vst [vmem:[#allocation2 + $0x20] sm:$0xf] %v787_v57  ;;  %v927_v37 = vshll.u32 %v5668_v20, 16  ;;  %v888_v34 = vld [vmem:[#allocation2 + $0x24] sm:$0x1]  ;;  %v941_v23 = vshll.u32 %v5670_v43, 16 }
 0x1c3   :  { %v775_v10 = vsel %vm5279_vm7, %v619_v36, %v774_v61  ;;  %770 = vst [vmem:[#allocation2 + $0x8] sm:$0xf] %v769_v9  ;;  %v955_v28 = vshll.u32 %v5680_v2, 16  ;;  %v5691_v39 = vld [vmem:[#allocation2 + $0x28] sm:$0xf]  ;;  %v5695_v21 = vrot.slane %v6518_v56, 5 }
 0x1c4   :  { %776 = vst [vmem:[#allocation2 + $0x10] sm:$0xf] %v775_v10  ;;  %v6519_v30 = vshll.u32 %v5412_v25, 16  ;;  %v5701_v58 = vrot.slane %v910_v1, 4  ;;  %v969_v17 = vshll.u32 %v888_v34, 16  ;;  %v5703_v29 = vrot.slane %v927_v37, 5 }
 0x1c5   :  { %v5705_v31 = vld [vmem:[#allocation2 + $0x2c] sm:$0x1]  ;;  %v974_v48 = vshrl.u32 %v5691_v39, 16  ;;  %v977_v63 = vshll.u32 %v5691_v39, 16  ;;  %v5709_v46 = vrot.slane %v1022_v41, 4  ;;  %v5711_v22 = vrot.slane %v941_v23, 5 }
 0x1c6   :  { %v5699_v7 = vrot.slane %v6519_v30, 5  ;;  %v5713_v3 = vrot.slane %v955_v28, 5  ;;  %v5721_v51 = vrot.slane %v969_v17, 5  ;;  %v983_v8 = vshll.u32 %v5705_v31, 16  ;;  %v4939_v45 = vld [vmem:[#allocation6 + $0x48] sm:$0xff]   ;;  %v5750_v4 = vld [vmem:[#allocation6 + $0x50] sm:$0xff]  }
 0x1c7   :  { %v976_v47 = vrot.slane %v974_v48, 4  ;;  %v979_v33 = vrot.slane %v977_v63, 5  ;;  %v4935_v42 = vld [vmem:[#allocation2 + $0x28] ss:$8 sps:$4 sm:$0xff]   ;;  %v916_v35 = vsel %vm5717_vm10, %v5701_v58, %v5695_v21  ;;  %v6522_v49 = vld [vmem:[#allocation14_spill] sm:$0xff] }
 0x1c8   :  { %v5732_v6 = vld [vmem:[#allocation2 + $0x18] sm:$0xf]  ;;  %v1028_v55 = vsel %vm5717_vm10, %v5709_v46, %v5699_v7  ;;  %v5754_v27 = vld [vmem:[#allocation2 + $0x30] sm:$0xf]  ;;  %v5756_v36 = vld [vmem:[#allocation2 + $0x34] sm:$0x1] }
 0x1c9   :  { %v4933_v59 = vld [vmem:[#allocation2 + $0x18] ss:$8 sps:$4 sm:$0xff]   ;;  %v980_v16 = vor.u32 %v979_v33, %v976_v47  ;;  %v946_v32 = vshrl.u32 %v5732_v6, 16  ;;  %v949_v52 = vshll.u32 %v5732_v6, 16  ;;  %v985_v9 = vrot.slane %v983_v8, 5 }
 0x1ca   :  { %v5724_v53 = vld [vmem:[#allocation2 + $0x8] sm:$0xf]  ;;  %v5743_v62 = vld [vmem:[#allocation2 + $0x20] sm:$0xf]  ;;  %v5758_v41 = vld [vmem:[#allocation2 + $0x38] sm:$0xf] }
 0x1cb   :  { %v4931_v44 = vld [vmem:[#allocation2 + $0x8] ss:$8 sps:$4 sm:$0xff]   ;;  %v918_v13 = vshrl.u32 %v5724_v53, 16  ;;  %v921_v11 = vshll.u32 %v5724_v53, 16  ;;  %v960_v18 = vshrl.u32 %v5743_v62, 16  ;;  %v963_v54 = vshll.u32 %v5743_v62, 16 }
 0x1cc   :  { %v5730_v5 = vld [vmem:[#allocation2 + $0x10] sm:$0xf]  ;;  %4649 = vmatprep.mubr.msk.bf16.mxu1 %vm237_vm0, %v4931_v44  ;;  %v948_v26 = vrot.slane %v946_v32, 4  ;;  %v951_v14 = vrot.slane %v949_v52, 5  ;;  %v981_v1 = vrot.slane %v980_v16, 4  ;;  %v988_v23 = vshrl.u32 %v5754_v27, 16 }
 0x1cd   :  { %v932_v50 = vshrl.u32 %v5730_v5, 16  ;;  %v935_v12 = vshll.u32 %v5730_v5, 16  ;;  %4650 = vmatmul.mubr.msk.bf16.vlgmr.msra.gmra.mrb[0].mxu1 %vm237_vm0, %v4933_v59  ;;  %v920_v24 = vrot.slane %v918_v13, 4  ;;  %v923_v60 = vrot.slane %v921_v11, 5  ;;  %v4937_v10 = vld [vmem:[#allocation2 + $0x38] ss:$8 sps:$4 sm:$0xff]  }
 0x1ce   :  { %4666 = vmatpush3.bf16.msra.mxu1 %v6522_v49  ;;  %4653 = vmatprep.mubr.msk.bf16.mxu1 %vm237_vm0, %v4935_v42  ;;  %v962_v0 = vrot.slane %v960_v18, 4  ;;  %v965_v15 = vrot.slane %v963_v54, 5  ;;  %v952_v37 = vor.u32 %v951_v14, %v948_v26  ;;  %v991_v28 = vshll.u32 %v5754_v27, 16  ;;  %v4938_v30 = vld [vmem:[#allocation2 + $0x58] ss:$8 sps:$4 sm:$0xff]   ;;  %v4945_v32 = vld [vmem:[#allocation6 + $0x8] sm:$0xff]  }
 0x1cf   :  { %v934_v19 = vrot.slane %v932_v50, 4  ;;  %v937_v61 = vrot.slane %v935_v12, 5  ;;  %4667 = vmatprep.subr.bf16.mxu1 %v4939_v45  ;;  %v924_v40 = vor.u32 %v923_v60, %v920_v24  ;;  %v986_v58 = vsel %vm5717_vm10, %v981_v1, %v985_v9  ;;  %v5764_v17 = vld [vmem:[#allocation2 + $0x3c] sm:$0x1]  ;;  %v5777_v16 = vld [vmem:[#allocation2 + $0x58] sm:$0xf] }
 0x1d0   :  { %v966_v34 = vor.u32 %v965_v15, %v962_v0  ;;  %v997_v48 = vshll.u32 %v5756_v36, 16  ;;  %v953_v63 = vrot.slane %v952_v37, 4  ;;  %v990_v33 = vrot.slane %v988_v23, 4  ;;  %v5786_v12 = vld [vmem:[#allocation2 + $0x60] sm:$0xf] }
 0x1d1   :  { %v938_v57 = vor.u32 %v937_v61, %v934_v19  ;;  %v925_v56 = vrot.slane %v924_v40, 4  ;;  %v993_v8 = vrot.slane %v991_v28, 5  ;;  %v1005_v54 = vshll.u32 %v5758_v41, 16  ;;  %v5792_v49 = vld [vmem:[#allocation2 + $0x5c] sm:$0x1] }
 0x1d2   :  { %4668 = vmatpush3.bf16.msra.mxu1 %v4939_v45  ;;  %v967_v47 = vrot.slane %v966_v34, 4  ;;  %v5774_v42 = vrot.slane %v997_v48, 5  ;;  %v1002_v45 = vshrl.u32 %v5758_v41, 16  ;;  %v958_v11 = vsel %vm5717_vm10, %v953_v63, %v5713_v3  ;;  %v5794_v3 = vld [vmem:[#allocation2 + $0x68] sm:$0xf] }
 0x1d3   :  { %v939_v21 = vrot.slane %v938_v57, 4  ;;  %4685 = vmatprep.subr.bf16.mxu1 %v5750_v4  ;;  %v930_v59 = vsel %vm5717_vm10, %v925_v56, %v5703_v29  ;;  %v994_v50 = vor.u32 %v993_v8, %v990_v33  ;;  %v1011_v24 = vshll.u32 %v5764_v17, 16  ;;  %v5800_v61 = vld [vmem:[#allocation2 + $0x64] sm:$0x1]  ;;  %v5803_v14 = vld [vmem:[#allocation2 + $0x6c] sm:$0x1] }
 0x1d4   :  { %v4197_v13 = vcombine.low %v916_v35, %v930_v59  ;;  %v972_v29 = vsel %vm5717_vm10, %v967_v47, %v5721_v51  ;;  %v1004_v18 = vrot.slane %v1002_v45, 4  ;;  %v1030_v60 = vshrl.u32 %v5777_v16, 16  ;;  %v1965_v37 = vld [vmem:[#allocation2 + $0x8] sm:$0xf]  ;;  %v4941_v59 = vld [vmem:[#allocation2 + $0x78] ss:$8 sps:$4 sm:$0xff]  }
 0x1d5   :  { %v944_v44 = vsel %vm5717_vm10, %v939_v21, %v5711_v22  ;;  %4654 = vmatmul.mubr.msk.bf16.gmra.mrb[4].mxu1 %vm237_vm0, %v4937_v10  ;;  %v5788_v22 = vld [vmem:[#allocation2 + $0xc] sm:$0x1]  ;;  %v4199_v35 = vcombine.low %v972_v29, %v986_v58  ;;  %v995_v51 = vrot.slane %v994_v50, 4  ;;  %v1033_v19 = vshll.u32 %v5777_v16, 16  ;;  %v4940_v58 = vld [vmem:[#allocation2 + $0x68] ss:$8 sps:$4 sm:$0xff]  }
 0x1d6   :  { %v4198_v52 = vcombine.low %v944_v44, %v958_v11  ;;  %4657 = vmatprep.mubr.msk.bf16.mxu1 %vm237_vm0, %v4938_v30  ;;  %4589 = vmatprep.mubr.msk.bf16.mxu0 %vm237_vm0, %v4197_v13  ;;  %v1007_v26 = vrot.slane %v1005_v54, 5  ;;  %v1044_v0 = vshrl.u32 %v5786_v12, 16  ;;  %v1047_v15 = vshll.u32 %v5786_v12, 16  ;;  %v6523_v34 = vld [vmem:[#allocation15_spill] sm:$0xff]  ;;  %v5814_v30 = vld [vmem:[#allocation6 + $0x20] sm:$0xff]  }
 0x1d7   :  { %v2007_v40 = vshll.u32 %v5788_v22, 16  ;;  %v1000_v57 = vsel %vm5717_vm10, %v995_v51, %v5774_v42  ;;  %v1032_v1 = vrot.slane %v1030_v60, 4  ;;  %v1035_v9 = vrot.slane %v1033_v19, 5  ;;  %v5824_v51 = vld [vmem:[#allocation2 + $0x14] sm:$0x1] }
 0x1d8   :  { %4590 = vmatmul.mubr.msk.bf16.vlgmr.msra.gmra.mrb[16].mxu0 %vm237_vm0, %v4198_v52  ;;  %v1039_v10 = vshll.u32 %v5792_v49, 16  ;;  %v1008_v23 = vor.u32 %v1007_v26, %v1004_v18  ;;  %v1013_v28 = vrot.slane %v1011_v24, 5  ;;  %v1046_v56 = vrot.slane %v1044_v0, 4  ;;  %v1967_v52 = vld [vmem:[#allocation2 + $0x10] sm:$0xf] }
 0x1d9   :  { %4593 = vmatprep.mubr.msk.bf16.mxu0 %vm237_vm0, %v4199_v35  ;;  %4606 = vmatpush3.bf16.msra.mxu0 %v6523_v34  ;;  %v1049_v21 = vrot.slane %v1047_v15, 5  ;;  %v1036_v48 = vor.u32 %v1035_v9, %v1032_v1  ;;  %v1053_v63 = vshll.u32 %v5800_v61, 16  ;;  %v1058_v47 = vshrl.u32 %v5794_v3, 16  ;;  %v5829_v15 = vld [vmem:[#allocation2 + $0x70] sm:$0xf] }
 0x1da   :  { %4607 = vmatprep.subr.bf16.mxu0 %v4945_v32  ;;  %v1061_v33 = vshll.u32 %v5794_v3, 16  ;;  %v1009_v8 = vrot.slane %v1008_v23, 4  ;;  %v1067_v42 = vshll.u32 %v5803_v14, 16  ;;  %v1998_v45 = vshrl.u32 %v1965_v37, 16  ;;  %v5838_v34 = vld [vmem:[#allocation2 + $0x74] sm:$0x1] }
 0x1db   :  { %v1050_v44 = vor.u32 %v1049_v21, %v1046_v56  ;;  %v1037_v13 = vrot.slane %v1036_v48, 4  ;;  %v1041_v11 = vrot.slane %v1039_v10, 5  ;;  %v1060_v29 = vrot.slane %v1058_v47, 4  ;;  %v5843_v46 = vld [vmem:[#allocation2 + $0x78] sm:$0xf] }
 0x1dc   :  { %v1063_v50 = vrot.slane %v1061_v33, 5  ;;  %v1014_v35 = vsel %vm5717_vm10, %v1009_v8, %v1013_v28  ;;  %v1055_v54 = vrot.slane %v1053_v63, 5  ;;  %v2000_v24 = vrot.slane %v1998_v45, 4  ;;  %v5849_v33 = vld [vmem:[#allocation2 + $0x7c] sm:$0x1] }
 0x1dd   :  { %4658 = vmatmul.mubr.msk.bf16.gmra.mrb[8].mxu1 %vm237_vm0, %v4940_v58  ;;  %4608 = vmatpush3.bf16.msra.mxu0 %v4945_v32  ;;  %v1051_v18 = vrot.slane %v1050_v44, 4  ;;  %v4200_v60 = vcombine.low %v1000_v57, %v1014_v35  ;;  %v1042_v19 = vsel %vm5717_vm10, %v1037_v13, %v1041_v11  ;;  %v2001_v0 = vshll.u32 %v1965_v37, 16  ;;  %v4942_v57 = vld [vmem:[#allocation2 + $0x88] ss:$8 sps:$4 sm:$0xff]  }
 0x1de   :  { %4661 = vmatprep.mubr.msk.bf16.mxu1 %vm237_vm0, %v4941_v59  ;;  %4625 = vmatprep.subr.bf16.mxu0 %v5814_v30  ;;  %v1064_v26 = vor.u32 %v1063_v50, %v1060_v29  ;;  %v4201_v32 = vcombine.low %v1028_v55, %v1042_v19  ;;  %v1069_v9 = vrot.slane %v1067_v42, 5  ;;  %v2012_v10 = vshrl.u32 %v1967_v52, 16  ;;  %v1969_v59 = vld [vmem:[#allocation2 + $0x18] sm:$0xf] }
 0x1df   :  { %v1056_v1 = vsel %vm5717_vm10, %v1051_v18, %v1055_v54  ;;  %v2003_v37 = vrot.slane %v2001_v0, 5  ;;  %v2015_v28 = vshll.u32 %v1967_v52, 16  ;;  %v2021_v56 = vshll.u32 %v5824_v51, 16  ;;  %v5855_v52 = vld [vmem:[#allocation2 + $0x1c] sm:$0x1] }
 0x1e0   :  { %4594 = vmatmul.mubr.msk.bf16.gmra.mrb[20].mxu0 %vm237_vm0, %v4200_v60  ;;  %v1065_v23 = vrot.slane %v1064_v26, 4  ;;  %v2009_v21 = vrot.slane %v2007_v40, 5  ;;  %v2014_v7 = vrot.slane %v2012_v10, 4  ;;  %v1072_v55 = vshrl.u32 %v5829_v15, 16  ;;  %v1971_v54 = vld [vmem:[#allocation2 + $0x20] sm:$0xf] }
 0x1e1   :  { %4597 = vmatprep.mubr.msk.bf16.mxu0 %vm237_vm0, %v4201_v32  ;;  %v1075_v58 = vshll.u32 %v5829_v15, 16  ;;  %v2004_v63 = vor.u32 %v2003_v37, %v2000_v24  ;;  %v2017_v47 = vrot.slane %v2015_v28, 5  ;;  %v1081_v8 = vshll.u32 %v5838_v34, 16  ;;  %v5860_v10 = vld [vmem:[#allocation2 + $0x24] sm:$0x1] }
 0x1e2   :  { %v1070_v48 = vsel %vm5717_vm10, %v1065_v23, %v1069_v9  ;;  %v2023_v42 = vrot.slane %v2021_v56, 5  ;;  %v1074_v40 = vrot.slane %v1072_v55, 4  ;;  %v1086_v29 = vshrl.u32 %v5843_v46, 16  ;;  %v5866_v55 = vld [vmem:[#allocation2 + $0x80] sm:$0xf] }
 0x1e3   :  { %v4202_v44 = vcombine.low %v1056_v1, %v1070_v48  ;;  %v1077_v45 = vrot.slane %v1075_v58, 5  ;;  %v2005_v13 = vrot.slane %v2004_v63, 4  ;;  %v2018_v11 = vor.u32 %v2017_v47, %v2014_v7  ;;  %v5868_v47 = vld [vmem:[#allocation2 + $0x88] sm:$0xf] }
 0x1e4   :  { %v1089_v50 = vshll.u32 %v5843_v46, 16  ;;  %v1095_v18 = vshll.u32 %v5849_v33, 16  ;;  %v2026_v24 = vshrl.u32 %v1969_v59, 16  ;;  %v2029_v60 = vshll.u32 %v1969_v59, 16 }
 0x1e5   :  { %4662 = vmatmul.mubr.msk.bf16.gmra.mrb[12].mxu1 %vm237_vm0, %v4942_v57  ;;  %v1078_v35 = vor.u32 %v1077_v45, %v1074_v40  ;;  %v2010_v19 = vsel %vm5717_vm10, %v2005_v13, %v2009_v21  ;;  %v2019_v26 = vrot.slane %v2018_v11, 4  ;;  %v1088_v0 = vrot.slane %v1086_v29, 4  ;;  %v5876_v11 = vld [vmem:[#allocation2 + $0x8c] sm:$0x1] }
 0x1e6   :  { %v1091_v32 = vrot.slane %v1089_v50, 5  ;;  %v1083_v9 = vrot.slane %v1081_v8, 5  ;;  %v2028_v57 = vrot.slane %v2026_v24, 4  ;;  %v2031_v23 = vrot.slane %v2029_v60, 5  ;;  %6525 = vst [vmem:[#allocation15_spill] sm:$0xff] %v5876_v11 }
 0x1e7   :  { %v1079_v1 = vrot.slane %v1078_v35, 4  ;;  %v2024_v37 = vsel %vm5717_vm10, %v2019_v26, %v2023_v42  ;;  %v2035_v56 = vshll.u32 %v5855_v52, 16  ;;  %v2040_v7 = vshrl.u32 %v1971_v54, 16  ;;  %v5873_v42 = vld [vmem:[#allocation2 + $0x84] sm:$0x1] }
 0x1e8   :  { %4598 = vmatmul.mubr.msk.bf16.gmra.mrb[24].mxu0 %vm237_vm0, %v4202_v44  ;;  %v1092_v28 = vor.u32 %v1091_v32, %v1088_v0  ;;  %v4285_v21 = vcombine.low %v2010_v19, %v2024_v37  ;;  %v1097_v58 = vrot.slane %v1095_v18, 5  ;;  %v2032_v48 = vor.u32 %v2031_v23, %v2028_v57  ;;  %6524 = vst [vmem:[#allocation14_spill] sm:$0xff] %v5873_v42  ;;  %v1973_v60 = vld [vmem:[#allocation2 + $0x28] sm:$0xf] }
 0x1e9   :  { %v2043_v63 = vshll.u32 %v1971_v54, 16  ;;  %v1084_v8 = vsel %vm5717_vm10, %v1079_v1, %v1083_v9  ;;  %v2042_v44 = vrot.slane %v2040_v7, 4  ;;  %v2049_v40 = vshll.u32 %v5860_v10, 16  ;;  %v5884_v1 = vld [vmem:[#allocation2 + $0x2c] sm:$0x1] }
 0x1ea   :  { %v1093_v59 = vrot.slane %v1092_v28, 4  ;;  %4669 = vmatprep.mubr.msk.bf16.mxu1 %vm237_vm0, %v4285_v21  ;;  %v2033_v45 = vrot.slane %v2032_v48, 4  ;;  %v1100_v29 = vshrl.u32 %v5866_v55, 16  ;;  %v1103_v50 = vshll.u32 %v5866_v55, 16  ;;  %v1975_v9 = vld [vmem:[#allocation2 + $0x30] sm:$0xf] }
 0x1eb   :  { %v2045_v13 = vrot.slane %v2043_v63, 5  ;;  %v2037_v18 = vrot.slane %v2035_v56, 5  ;;  %v2051_v54 = vrot.slane %v2049_v40, 5  ;;  %v1114_v24 = vshrl.u32 %v5868_v47, 16 }
 0x1ec   :  { %v1098_v35 = vsel %vm5717_vm10, %v1093_v59, %v1097_v58  ;;  %v1102_v0 = vrot.slane %v1100_v29, 4  ;;  %v1109_v32 = vshll.u32 %v5873_v42, 16  ;;  %v1105_v23 = vrot.slane %v1103_v50, 5  ;;  %v1977_v50 = vld [vmem:[#allocation2 + $0x38] sm:$0xf] }
 0x1ed   :  { %v4203_v19 = vcombine.low %v1084_v8, %v1098_v35  ;;  %v2046_v26 = vor.u32 %v2045_v13, %v2042_v44  ;;  %v2038_v57 = vsel %vm5717_vm10, %v2033_v45, %v2037_v18  ;;  %v1116_v37 = vrot.slane %v1114_v24, 4  ;;  %v5891_v8 = vld [vmem:[#allocation2 + $0x34] sm:$0x1] }
 0x1ee   :  { %v1117_v28 = vshll.u32 %v5868_v47, 16  ;;  %v1123_v7 = vshll.u32 %v5876_v11, 16  ;;  %v2054_v21 = vshrl.u32 %v1973_v60, 16  ;;  %v2057_v58 = vshll.u32 %v1973_v60, 16  ;;  %v4948_v60 = vld [vmem:[#allocation6 + $0x58] sm:$0xff]  }
 0x1ef   :  { %4601 = vmatprep.mubr.msk.bf16.mxu0 %vm237_vm0, %v4203_v19  ;;  %v2047_v56 = vrot.slane %v2046_v26, 4  ;;  %v1106_v48 = vor.u32 %v1105_v23, %v1102_v0  ;;  %v2063_v59 = vshll.u32 %v5884_v1, 16  ;;  %v2068_v44 = vshrl.u32 %v1975_v9, 16  ;;  %v5896_v26 = vld [vmem:[#allocation2 + $0x3c] sm:$0x1] }
 0x1f0   :  { %v1119_v63 = vrot.slane %v1117_v28, 5  ;;  %v1111_v45 = vrot.slane %v1109_v32, 5  ;;  %v2056_v13 = vrot.slane %v2054_v21, 4  ;;  %v2059_v29 = vrot.slane %v2057_v58, 5  ;;  %v1979_v11 = vld [vmem:[#allocation2 + $0x40] sm:$0xf] }
 0x1f1   :  { %v2052_v40 = vsel %vm5717_vm10, %v2047_v56, %v2051_v54  ;;  %v1107_v18 = vrot.slane %v1106_v48, 4  ;;  %v1125_v19 = vrot.slane %v1123_v7, 5  ;;  %v2070_v23 = vrot.slane %v2068_v44, 4  ;;  %v4978_v21 = vld [vmem:[#allocation2] sm:$0xf] }
 0x1f2   :  { %v4286_v35 = vcombine.low %v2038_v57, %v2052_v40  ;;  %v1120_v24 = vor.u32 %v1119_v63, %v1116_v37  ;;  %v2060_v0 = vor.u32 %v2059_v29, %v2056_v13  ;;  %v2071_v28 = vshll.u32 %v1975_v9, 16  ;;  %v5904_v48 = vld [vmem:[#allocation2 + $0x44] sm:$0x1]  ;;  %v1981_v13 = vld [vmem:[#allocation2 + $0x58] sm:$0xf] }
 0x1f3   :  { %v2077_v38 = vshll.u32 %v5891_v8, 16  ;;  %v1112_v54 = vsel %vm5717_vm10, %v1107_v18, %v1111_v45  ;;  %v2065_v56 = vrot.slane %v2063_v59, 5  ;;  %v2082_v57 = vshrl.u32 %v1977_v50, 16  ;;  %v5909_v59 = vld [vmem:[#allocation6 + $0x60] sm:$0xff]  }
 0x1f4   :  { %4670 = vmatmul.mubr.msk.bf16.vlgmr.msra.gmra.mrb[0].mxu1 %vm237_vm0, %v4286_v35  ;;  %v1121_v32 = vrot.slane %v1120_v24, 4  ;;  %v2061_v37 = vrot.slane %v2060_v0, 4  ;;  %v2073_v7 = vrot.slane %v2071_v28, 5  ;;  %v4215_v58 = vcombine.low %v4978_v21, %v5724_v53  ;;  %v5911_v24 = vld [vmem:[#allocation2 + $0x5c] sm:$0x1] }
 0x1f5   :  { %4686 = vmatpush3.bf16.msra.mxu1 %v5750_v4  ;;  %v2085_v9 = vshll.u32 %v1977_v50, 16  ;;  %v2084_v44 = vrot.slane %v2082_v57, 4  ;;  %v2091_v40 = vshll.u32 %v5896_v26, 16  ;;  %v2096_v45 = vshrl.u32 %v1979_v11, 16  ;;  %v1983_v28 = vld [vmem:[#allocation2 + $0x60] sm:$0xf] }
 0x1f6   :  { %v1126_v63 = vsel %vm5717_vm10, %v1121_v32, %v1125_v19  ;;  %4687 = vmatprep.subr.bf16.mxu1 %v4948_v60  ;;  %v2074_v29 = vor.u32 %v2073_v7, %v2070_v23  ;;  %v2079_v35 = vrot.slane %v2077_v38, 5  ;;  %v2066_v53 = vsel %vm5717_vm10, %v2061_v37, %v2065_v56 }
 0x1f7   :  { %v4204_v4 = vcombine.low %v1112_v54, %v1126_v63  ;;  %v2087_v18 = vrot.slane %v2085_v9, 5  ;;  %v2098_v50 = vrot.slane %v2096_v45, 4  ;;  %v2099_v0 = vshll.u32 %v1979_v11, 16  ;;  %v5920_v54 = vld [vmem:[#allocation2 + $0x64] sm:$0x1] }
 0x1f8   :  { %v2105_v19 = vshll.u32 %v5904_v48, 16  ;;  %v2075_v32 = vrot.slane %v2074_v29, 4  ;;  %v2093_v21 = vrot.slane %v2091_v40, 5  ;;  %v2110_v42 = vshrl.u32 %v1981_v13, 16 }
 0x1f9   :  { %4602 = vmatmul.mubr.msk.bf16.gmra.mrb[28].mxu0 %vm237_vm0, %v4204_v4  ;;  %v2088_v57 = vor.u32 %v2087_v18, %v2084_v44  ;;  %4688 = vmatpush3.bf16.msra.mxu1 %v4948_v60  ;;  %v2101_v38 = vrot.slane %v2099_v0, 5  ;;  %v4216_v23 = vcombine.low %v5730_v5, %v5732_v6  ;;  %v2113_v56 = vshll.u32 %v1981_v13, 16  ;;  %v1985_v60 = vld [vmem:[#allocation2 + $0x68] sm:$0xf]  ;;  %v5926_v4 = vld [vmem:[#allocation2 + $0x6c] sm:$0x1] }
 0x1fa   :  { %4609 = vmatprep.mubr.msk.bf16.mxu0 %vm237_vm0, %v4215_v58  ;;  %v2119_v11 = vshll.u32 %v5911_v24, 16  ;;  %4705 = vmatprep.subr.bf16.mxu1 %v5909_v59  ;;  %v2080_v37 = vsel %vm5717_vm10, %v2075_v32, %v2079_v35  ;;  %v2112_v9 = vrot.slane %v2110_v42, 4  ;;  %v2124_v63 = vshrl.u32 %v1983_v28, 16  ;;  %v1987_v18 = vld [vmem:[#allocation2 + $0x70] sm:$0xf] }
 0x1fb   :  { %v2089_v7 = vrot.slane %v2088_v57, 4  ;;  %v4287_v44 = vcombine.low %v2066_v53, %v2080_v37  ;;  %v2102_v58 = vor.u32 %v2101_v38, %v2098_v50  ;;  %v2107_v40 = vrot.slane %v2105_v19, 5  ;;  %v5934_v19 = vld [vmem:[#allocation2 + $0x74] sm:$0x1]  ;;  %v4956_v38 = vld [vmem:[#allocation6 + $0x28] sm:$0xff]  }
 0x1fc   :  { %v2115_v45 = vrot.slane %v2113_v56, 5  ;;  %v2121_v5 = vrot.slane %v2119_v11, 5  ;;  %v2126_v6 = vrot.slane %v2124_v63, 4  ;;  %v2127_v13 = vshll.u32 %v1983_v28, 16 }
 0x1fd   :  { %v2133_v29 = vshll.u32 %v5920_v54, 16  ;;  %4673 = vmatprep.mubr.msk.bf16.mxu1 %vm237_vm0, %v4287_v44  ;;  %v2094_v35 = vsel %vm5717_vm10, %v2089_v7, %v2093_v21  ;;  %v2103_v42 = vrot.slane %v2102_v58, 4  ;;  %v2138_v32 = vshrl.u32 %v1985_v60, 16  ;;  %v1989_v21 = vld [vmem:[#allocation2 + $0x78] sm:$0xf] }
 0x1fe   :  { %v2116_v0 = vor.u32 %v2115_v45, %v2112_v9  ;;  %v2129_v53 = vrot.slane %v2127_v13, 5  ;;  %v4217_v50 = vcombine.low %v5743_v62, %v5691_v39  ;;  %v2141_v57 = vshll.u32 %v1985_v60, 16  ;;  %v5940_v39 = vld [vmem:[#allocation2 + $0x7c] sm:$0x1] }
 0x1ff   :  { %v2147_v28 = vshll.u32 %v5926_v4, 16  ;;  %v2108_v56 = vsel %vm5717_vm10, %v2103_v42, %v2107_v40  ;;  %v2140_v37 = vrot.slane %v2138_v32, 4  ;;  %v2152_v63 = vshrl.u32 %v1987_v18, 16  ;;  %v1991_v40 = vld [vmem:[#allocation2 + $0x80] sm:$0xf] }
 0x200   :  { %v2117_v11 = vrot.slane %v2116_v0, 4  ;;  %v4288_v7 = vcombine.low %v2094_v35, %v2108_v56  ;;  %v2130_v9 = vor.u32 %v2129_v53, %v2126_v6  ;;  %v2135_v44 = vrot.slane %v2133_v29, 5 }
 0x201   :  { %4610 = vmatmul.mubr.msk.bf16.vlgmr.msra.gmra.mrb[16].mxu0 %vm237_vm0, %v4216_v23  ;;  %v2143_v58 = vrot.slane %v2141_v57, 5  ;;  %v2149_v62 = vrot.slane %v2147_v28, 5  ;;  %v2154_v60 = vrot.slane %v2152_v63, 4  ;;  %v2155_v45 = vshll.u32 %v1987_v18, 16  ;;  %v5950_v18 = vld [vmem:[#allocation2 + $0x84] sm:$0x1] }
 0x202   :  { %4613 = vmatprep.mubr.msk.bf16.mxu0 %vm237_vm0, %v4217_v50  ;;  %v2161_v13 = vshll.u32 %v5934_v19, 16  ;;  %4626 = vmatpush3.bf16.msra.mxu0 %v5814_v30  ;;  %v2122_v23 = vsel %vm5717_vm10, %v2117_v11, %v2121_v5  ;;  %v2131_v6 = vrot.slane %v2130_v9, 4  ;;  %v2166_v35 = vshrl.u32 %v1989_v21, 16  ;;  %v1993_v28 = vld [vmem:[#allocation2 + $0x88] sm:$0xf] }
 0x203   :  { %4674 = vmatmul.mubr.msk.bf16.gmra.mrb[4].mxu1 %vm237_vm0, %v4288_v7  ;;  %v2144_v29 = vor.u32 %v2143_v58, %v2140_v37  ;;  %4627 = vmatprep.subr.bf16.mxu0 %v4956_v38  ;;  %v2157_v42 = vrot.slane %v2155_v45, 5  ;;  %v4218_v0 = vcombine.low %v5754_v27, %v5758_v41  ;;  %v2169_v32 = vshll.u32 %v1989_v21, 16  ;;  %v1995_v7 = vld [vmem:[#allocation2 + $0x90] sm:$0xf]  ;;  %v5958_v58 = vld [vmem:[#allocation2 + $0x8c] sm:$0x1] }
 0x204   :  { %v2175_v53 = vshll.u32 %v5940_v39, 16  ;;  %v2136_v30 = vsel %vm5717_vm10, %v2131_v6, %v2135_v44  ;;  %v2168_v57 = vrot.slane %v2166_v35, 4  ;;  %v2180_v5 = vshrl.u32 %v1991_v40, 16  ;;  %v4979_v6 = vld [vmem:[#allocation2 + $0x50] sm:$0xf] }
 0x205   :  { %v2145_v50 = vrot.slane %v2144_v29, 4  ;;  %v4289_v56 = vcombine.low %v2122_v23, %v2136_v30  ;;  %v2158_v11 = vor.u32 %v2157_v42, %v2154_v60  ;;  %v2163_v37 = vrot.slane %v2161_v13, 5  ;;  %v5962_v13 = vld [vmem:[#allocation2 + $0x94] sm:$0x1] }
 0x206   :  { %v2171_v63 = vrot.slane %v2169_v32, 5  ;;  %4628 = vmatpush3.bf16.msra.mxu0 %v4956_v38  ;;  %v2182_v41 = vrot.slane %v2180_v5, 4  ;;  %v2183_v21 = vshll.u32 %v1991_v40, 16  ;;  %v2189_v9 = vshll.u32 %v5950_v18, 16  ;;  %v2399_v40 = vld [vmem:[#allocation2 + $0x8] sm:$0xe] }
 0x207   :  { %v2150_v27 = vsel %vm5717_vm10, %v2145_v50, %v2149_v62  ;;  %4677 = vmatprep.mubr.msk.bf16.mxu1 %vm237_vm0, %v4289_v56  ;;  %v2159_v44 = vrot.slane %v2158_v11, 4  ;;  %v4219_v60 = vcombine.low %v4979_v6, %v5777_v16  ;;  %v2194_v23 = vshrl.u32 %v1993_v28, 16  ;;  %v2400_v50 = vld [vmem:[#allocation2 + $0x10] sm:$0xe]  ;;  %v2402_v6 = vld [vmem:[#allocation2 + $0x20] sm:$0xe] }
 0x208   :  { %v2172_v45 = vor.u32 %v2171_v63, %v2168_v57  ;;  %v2177_v38 = vrot.slane %v2175_v53, 5  ;;  %v2185_v62 = vrot.slane %v2183_v21, 5  ;;  %v2197_v29 = vshll.u32 %v1993_v28, 16  ;;  %v2401_v63 = vld [vmem:[#allocation2 + $0x18] sm:$0xe] }
 0x209   :  { %4614 = vmatmul.mubr.msk.bf16.gmra.mrb[20].mxu0 %vm237_vm0, %v4218_v0  ;;  %v2164_v35 = vsel %vm5717_vm10, %v2159_v44, %v2163_v37  ;;  %v2196_v32 = vrot.slane %v2194_v23, 4  ;;  %v2208_v30 = vshrl.u32 %v1995_v7, 16  ;;  %v2191_v5 = vrot.slane %v2189_v9, 5 }
 0x20a   :  { %v2173_v42 = vrot.slane %v2172_v45, 4  ;;  %4617 = vmatprep.mubr.msk.bf16.mxu0 %vm237_vm0, %v4219_v60  ;;  %v4290_v16 = vcombine.low %v2150_v27, %v2164_v35  ;;  %v2186_v57 = vor.u32 %v2185_v62, %v2182_v41  ;;  %v2199_v56 = vrot.slane %v2197_v29, 5  ;;  %v1462_v35 = vld [vmem:[#allocation2] sm:$0xe] }
 0x20b   :  { %v2203_v53 = vshll.u32 %v5958_v58, 16  ;;  %v2210_v28 = vrot.slane %v2208_v30, 4  ;;  %v2211_v11 = vshll.u32 %v1995_v7, 16  ;;  %v2217_v44 = vshll.u32 %v5962_v13, 16  ;;  %v2403_v7 = vld [vmem:[#allocation2 + $0x28] sm:$0xe] }
 0x20c   :  { %v2178_v0 = vsel %vm5717_vm10, %v2173_v42, %v2177_v38  ;;  %4678 = vmatmul.mubr.msk.bf16.gmra.mrb[8].mxu1 %vm237_vm0, %v4290_v16  ;;  %v2187_v37 = vrot.slane %v2186_v57, 4  ;;  %v2200_v21 = vor.u32 %v2199_v56, %v2196_v32  ;;  %v4303_v45 = vrot.slane %v2399_v40, 9  ;;  %v2404_v40 = vld [vmem:[#allocation2 + $0x30] sm:$0xe] }
 0x20d   :  { %v2213_v27 = vrot.slane %v2211_v11, 5  ;;  %v2449_v9 = vrot.slane %v5788_v22, 5  ;;  %v4304_v60 = vrot.slane %v2400_v50, 9  ;;  %v4220_v62 = vcombine.low %v5786_v12, %v5794_v3 }
 0x20e   :  { %v2192_v23 = vsel %vm5717_vm10, %v2187_v37, %v2191_v5  ;;  %v2201_v38 = vrot.slane %v2200_v21, 4  ;;  %v2453_v29 = vrot.slane %v5824_v51, 5  ;;  %v2205_v32 = vrot.slane %v2203_v53, 5 }
 0x20f   :  { %v4291_v42 = vcombine.low %v2178_v0, %v2192_v23  ;;  %v2214_v30 = vor.u32 %v2213_v27, %v2210_v28  ;;  %v4221_v16 = vcombine.low %v5829_v15, %v5843_v46  ;;  %v2219_v22 = vrot.slane %v2217_v44, 5  ;;  %v1463_v28 = vld [vmem:[#allocation2 + $0x8] sm:$0xe]  ;;  %v4980_v44 = vld [vmem:[#allocation2 + $0x4] sm:$0x1] }
 0x210   :  { %v2450_v50 = vsel %vm5975_vm13, %v4303_v45, %v2449_v9  ;;  %v4305_v57 = vrot.slane %v2401_v63, 9  ;;  %v2457_v5 = vrot.slane %v5855_v52, 5  ;;  %v2206_v12 = vsel %vm5717_vm10, %v2201_v38, %v2205_v32  ;;  %v1464_v27 = vld [vmem:[#allocation2 + $0x10] sm:$0xe]  ;;  %v2407_v32 = vld [vmem:[#allocation2 + $0x58] sm:$0xe] }
 0x211   :  { %4618 = vmatmul.mubr.msk.bf16.gmra.mrb[24].mxu0 %vm237_vm0, %v4220_v62  ;;  %4681 = vmatprep.mubr.msk.bf16.mxu1 %vm237_vm0, %v4291_v42  ;;  %v2215_v3 = vrot.slane %v2214_v30, 4  ;;  %v2454_v51 = vsel %vm5975_vm13, %v4304_v60, %v2453_v29  ;;  %v4306_v15 = vrot.slane %v2402_v6, 9  ;;  %v2461_v46 = vrot.slane %v5860_v10, 5  ;;  %v1465_v60 = vld [vmem:[#allocation2 + $0x18] sm:$0xe] }
 0x212   :  { %4621 = vmatprep.mubr.msk.bf16.mxu0 %vm237_vm0, %v4221_v16  ;;  %v4307_v56 = vrot.slane %v2403_v7, 9  ;;  %v2465_v0 = vrot.slane %v5884_v1, 5  ;;  %v4308_v53 = vrot.slane %v2404_v40, 9  ;;  %v2469_v11 = vrot.slane %v5891_v8, 5  ;;  %v2405_v62 = vld [vmem:[#allocation2 + $0x38] sm:$0xe] }
 0x213   :  { %v2220_v52 = vsel %vm5717_vm10, %v2215_v3, %v2219_v22  ;;  %v4233_v63 = vrot.slane %v1462_v35, 9  ;;  %v4319_v21 = vcombine.low %v2450_v50, %v2454_v51  ;;  %v1515_v45 = vrot.slane %v4980_v44, 5  ;;  %v1466_v30 = vld [vmem:[#allocation2 + $0x20] sm:$0xe]  ;;  %v1469_v44 = vld [vmem:[#allocation2 + $0x38] sm:$0xe] }
 0x214   :  { %v4292_v37 = vcombine.low %v2206_v12, %v2220_v52  ;;  %v2458_v6 = vsel %vm5975_vm13, %v4305_v57, %v2457_v5  ;;  %v4222_v10 = vcombine.low %v5866_v55, %v5868_v47  ;;  %v4234_v1 = vrot.slane %v1463_v28, 9  ;;  %v2406_v55 = vld [vmem:[#allocation2 + $0x40] sm:$0xe]  ;;  %v1467_v12 = vld [vmem:[#allocation2 + $0x28] sm:$0xe] }
 0x215   :  { %v1519_v9 = vrot.slane %v5668_v20, 5  ;;  %v2462_v8 = vsel %vm5975_vm13, %v4306_v15, %v2461_v46  ;;  %v2466_v7 = vsel %vm5975_vm13, %v4307_v56, %v2465_v0  ;;  %v2470_v23 = vsel %vm5975_vm13, %v4308_v53, %v2469_v11  ;;  %v2408_v5 = vld [vmem:[#allocation2 + $0x60] sm:$0xe]  ;;  %v4957_v15 = vld [vmem:[#allocation6 + $0x68] sm:$0xff]   ;;  %v2410_v56 = vld [vmem:[#allocation2 + $0x70] sm:$0xe] }
 0x216   :  { %4682 = vmatmul.mubr.msk.bf16.gmra.mrb[12].mxu1 %vm237_vm0, %v4292_v37  ;;  %v1516_v38 = vsel %vm5975_vm13, %v4233_v63, %v1515_v45  ;;  %v4235_v47 = vrot.slane %v1464_v27, 9  ;;  %v1523_v29 = vrot.slane %v5670_v43, 5  ;;  %v4236_v35 = vrot.slane %v1465_v60, 9  ;;  %v2409_v46 = vld [vmem:[#allocation2 + $0x68] sm:$0xe] }
 0x217   :  { %4689 = vmatprep.mubr.msk.bf16.mxu1 %vm237_vm0, %v4319_v21  ;;  %v1520_v20 = vsel %vm5975_vm13, %v4234_v1, %v1519_v9  ;;  %v1527_v42 = vrot.slane %v5680_v2, 5  ;;  %v4320_v16 = vcombine.low %v2458_v6, %v2462_v8  ;;  %v4321_v22 = vcombine.low %v2466_v7, %v2470_v23  ;;  %v4981_v28 = vld [vmem:[#allocation2 + $0x24] sm:$0x1]  ;;  %v1468_v11 = vld [vmem:[#allocation2 + $0x30] sm:$0xe] }
 0x218   :  { %v4249_v40 = vcombine.low %v1516_v38, %v1520_v20  ;;  %v4309_v50 = vrot.slane %v2405_v62, 9  ;;  %v2473_v57 = vrot.slane %v5896_v26, 5  ;;  %v4310_v3 = vrot.slane %v2406_v55, 9  ;;  %v1471_v23 = vld [vmem:[#allocation2 + $0x58] sm:$0xe]  ;;  %v6044_v38 = vld [vmem:[#allocation6 + $0x70] sm:$0xff]  }
 0x219   :  { %4622 = vmatmul.mubr.msk.bf16.gmra.mrb[28].mxu0 %vm237_vm0, %v4222_v10  ;;  %v2477_v43 = vrot.slane %v5904_v48, 5  ;;  %v1524_v51 = vsel %vm5975_vm13, %v4235_v47, %v1523_v29  ;;  %v1528_v2 = vsel %vm5975_vm13, %v4236_v35, %v1527_v42  ;;  %v4311_v0 = vrot.slane %v2407_v32, 9  ;;  %v2412_v47 = vld [vmem:[#allocation2 + $0x80] sm:$0xe] }
 0x21a   :  { %4629 = vmatprep.mubr.msk.bf16.mxu0 %vm237_vm0, %v4249_v40  ;;  %v2481_v53 = vrot.slane %v5911_v24, 5  ;;  %v4237_v26 = vrot.slane %v1466_v30, 9  ;;  %v1531_v52 = vrot.slane %v4981_v28, 5  ;;  %v4312_v63 = vrot.slane %v2408_v5, 9  ;;  %v4982_v40 = vld [vmem:[#allocation2 + $0x54] sm:$0x1] }
 0x21b   :  { %v2485_v37 = vrot.slane %v5920_v54, 5  ;;  %v4238_v48 = vrot.slane %v1467_v12, 9  ;;  %v1535_v21 = vrot.slane %v5705_v31, 5  ;;  %v4250_v45 = vcombine.low %v1524_v51, %v1528_v2 }
 0x21c   :  { %v1532_v27 = vsel %vm5975_vm13, %v4237_v26, %v1531_v52  ;;  %v4313_v6 = vrot.slane %v2409_v46, 9  ;;  %v2489_v10 = vrot.slane %v5926_v4, 5  ;;  %v4314_v1 = vrot.slane %v2410_v56, 9  ;;  %v1470_v4 = vld [vmem:[#allocation2 + $0x50] sm:$0xe] }
 0x21d   :  { %v1536_v24 = vsel %vm5975_vm13, %v4238_v48, %v1535_v21  ;;  %v2493_v9 = vrot.slane %v5934_v19, 5  ;;  %v4239_v54 = vrot.slane %v1468_v11, 9  ;;  %v1539_v60 = vrot.slane %v5756_v36, 5  ;;  %v510_v56 = vld [vmem:[#allocation2 + $0x48] sm:$0x1] }
 0x21e   :  { %4690 = vmatmul.mubr.msk.bf16.vlgmr.msra.gmra.mrb[0].mxu1 %vm237_vm0, %v4320_v16  ;;  %v4251_v31 = vcombine.low %v1532_v27, %v1536_v24  ;;  %v4240_v8 = vrot.slane %v1469_v44, 9  ;;  %v1543_v7 = vrot.slane %v5764_v17, 5  ;;  %v2474_v19 = vsel %vm5975_vm13, %v4309_v50, %v2473_v57  ;;  %v2411_v17 = vld [vmem:[#allocation2 + $0x78] sm:$0xe]  ;;  %v2413_v26 = vld [vmem:[#allocation2 + $0x88] sm:$0xe] }
 0x21f   :  { %4706 = vmatpush3.bf16.msra.mxu1 %v5909_v59  ;;  %4693 = vmatprep.mubr.msk.bf16.mxu1 %vm237_vm0, %v4321_v22  ;;  %v2478_v59 = vsel %vm5975_vm13, %v4310_v3, %v2477_v43  ;;  %v2482_v62 = vsel %vm5975_vm13, %v4311_v0, %v2481_v53  ;;  %v2486_v36 = vsel %vm5975_vm13, %v4312_v63, %v2485_v37  ;;  %v4241_v29 = vrot.slane %v1470_v4, 9  ;;  %v1472_v22 = vld [vmem:[#allocation2 + $0x60] sm:$0xe]  ;;  %v1473_v3 = vld [vmem:[#allocation2 + $0x68] sm:$0xe] }
 0x220   :  { %4707 = vmatprep.subr.bf16.mxu1 %v4957_v15  ;;  %v6057_v20 = vsel %vm5975_vm13, %v4313_v6, %v2489_v10  ;;  %v6061_v55 = vsel %vm5975_vm13, %v4314_v1, %v2493_v9  ;;  %v1547_v35 = vrot.slane %v4982_v40, 5  ;;  %v1540_v42 = vsel %vm5975_vm13, %v4239_v54, %v1539_v60  ;;  %v1474_v43 = vld [vmem:[#allocation2 + $0x70] sm:$0xe]  ;;  %v1476_v52 = vld [vmem:[#allocation2 + $0x80] sm:$0xe] }
 0x221   :  { %4630 = vmatmul.mubr.msk.bf16.vlgmr.msra.gmra.mrb[16].mxu0 %vm237_vm0, %v4250_v45  ;;  %v1544_v32 = vsel %vm5975_vm13, %v4240_v8, %v1543_v7  ;;  %v4242_v30 = vrot.slane %v1471_v23, 9  ;;  %v1551_v16 = vrot.slane %v5792_v49, 5  ;;  %v4322_v50 = vcombine.low %v2474_v19, %v2478_v59  ;;  %v1475_v49 = vld [vmem:[#allocation2 + $0x78] sm:$0xe]  ;;  %v1477_v37 = vld [vmem:[#allocation2 + $0x88] sm:$0xe] }
 0x222   :  { %4633 = vmatprep.mubr.msk.bf16.mxu0 %vm237_vm0, %v4251_v31  ;;  %v4323_v57 = vcombine.low %v2482_v62, %v2486_v36  ;;  %v4315_v5 = vrot.slane %v2411_v17, 9  ;;  %v1548_v12 = vsel %vm5975_vm13, %v4241_v29, %v1547_v35  ;;  %v2497_v51 = vrot.slane %v5940_v39, 5  ;;  %v540_v27 = vld [vmem:[#allocation2 + $0x98] sm:$0x1]  ;;  %v2414_v1 = vld [vmem:[#allocation2 + $0x90] sm:$0xe] }
 0x223   :  { %4708 = vmatpush3.bf16.msra.mxu1 %v4957_v15  ;;  %v4316_v2 = vrot.slane %v2412_v47, 9  ;;  %v2501_v15 = vrot.slane %v5950_v18, 5  ;;  %v1552_v46 = vsel %vm5975_vm13, %v4242_v30, %v1551_v16  ;;  %v4324_v0 = vcombine.low %v6057_v20, %v6061_v55  ;;  %v6529_v31 = vld [vmem:[#allocation15_spill] sm:$0xff] }
 0x224   :  { %4725 = vmatprep.subr.bf16.mxu1 %v6044_v38  ;;  %v4252_v53 = vcombine.low %v1540_v42, %v1544_v32  ;;  %v4243_v28 = vrot.slane %v1472_v22, 9  ;;  %v4253_v39 = vcombine.low %v1548_v12, %v1552_v46  ;;  %v1555_v11 = vrot.slane %v5800_v61, 5  ;;  %v4958_v32 = vld [vmem:[#allocation2 + $0x10] ss:$8 sps:$4 sm:$0xff]  }
 0x225   :  { %v4244_v18 = vrot.slane %v1473_v3, 9  ;;  %v1559_v63 = vrot.slane %v5803_v14, 5  ;;  %v4245_v48 = vrot.slane %v1474_v43, 9  ;;  %v1563_v21 = vrot.slane %v5838_v34, 5  ;;  %v6528_v14 = vld [vmem:[#allocation14_spill] sm:$0xff] }
 0x226   :  { %4694 = vmatmul.mubr.msk.bf16.gmra.mrb[4].mxu1 %vm237_vm0, %v4322_v50  ;;  %v4246_v44 = vrot.slane %v1475_v49, 9  ;;  %v1567_v45 = vrot.slane %v5849_v33, 5  ;;  %v2498_v6 = vsel %vm5975_vm13, %v4315_v5, %v2497_v51  ;;  %v2502_v10 = vsel %vm5975_vm13, %v4316_v2, %v2501_v15  ;;  %v2900_v22 = vld [vmem:[#allocation2 + $0x10] sm:$0xf]  ;;  %v4960_v50 = vld [vmem:[#allocation2 + $0x20] ss:$8 sps:$4 sm:$0xff]  }
 0x227   :  { %4697 = vmatprep.mubr.msk.bf16.mxu1 %vm237_vm0, %v4323_v57  ;;  %v4247_v61 = vrot.slane %v1476_v52, 9  ;;  %v1571_v24 = vrot.slane %v6528_v14, 5  ;;  %v4317_v9 = vrot.slane %v2413_v26, 9  ;;  %v4248_v54 = vrot.slane %v1477_v37, 9  ;;  %v4964_v57 = vld [vmem:[#allocation6 + $0x78] sm:$0xff]   ;;  %v6125_v49 = vld [vmem:[#allocation6 + $0x80] sm:$0xff]  }
 0x228   :  { %v1575_v34 = vrot.slane %v6529_v31, 5  ;;  %v511_v33 = vsel %vm5157_vm3, 0, %v510_v56  ;;  %v1556_v8 = vsel %vm5975_vm13, %v4243_v28, %v1555_v11  ;;  %v1560_v7 = vsel %vm5975_vm13, %v4244_v18, %v1559_v63  ;;  %v4961_v5 = vld [vmem:[#allocation2 + $0x30] ss:$8 sps:$4 sm:$0xff]   ;;  %v2904_v51 = vld [vmem:[#allocation2 + $0x20] sm:$0xf] }
 0x229   :  { %4634 = vmatmul.mubr.msk.bf16.gmra.mrb[20].mxu0 %vm237_vm0, %v4252_v53  ;;  %v1572_v4 = vsel %vm5975_vm13, %v4247_v61, %v1571_v24  ;;  %512 = vst [vmem:[#allocation2 + $0x48] sm:$0x1] %v511_v33  ;;  %v541_v23 = vsel %vm5157_vm3, 0, %v540_v27  ;;  %v4325_v19 = vcombine.low %v2498_v6, %v2502_v10  ;;  %v1564_v59 = vsel %vm5975_vm13, %v4245_v48, %v1563_v21  ;;  %v2902_v12 = vld [vmem:[#allocation2 + $0x18] sm:$0xf] }
 0x22a   :  { %4637 = vmatprep.mubr.msk.bf16.mxu0 %vm237_vm0, %v4253_v39  ;;  %v1568_v62 = vsel %vm5975_vm13, %v4246_v44, %v1567_v45  ;;  %v1576_v36 = vsel %vm5975_vm13, %v4248_v54, %v1575_v34  ;;  %542 = vst [vmem:[#allocation2 + $0x98] sm:$0x1] %v541_v23  ;;  %v2505_v17 = vrot.slane %v5958_v58, 5  ;;  %v4318_v20 = vrot.slane %v2414_v1, 9  ;;  %v2906_v2 = vld [vmem:[#allocation2 + $0x28] sm:$0xf] }
 0x22b   :  { %v2509_v55 = vrot.slane %v5962_v13, 5  ;;  %v4256_v47 = vcombine.low %v1572_v4, %v1576_v36  ;;  %v4254_v29 = vcombine.low %v1556_v8, %v1560_v7  ;;  %v4255_v40 = vcombine.low %v1564_v59, %v1568_v62  ;;  %v572_v13 = vld [vmem:[#allocation2 + $0x4c] sm:$0x1]  ;;  %v4963_v39 = vld [vmem:[#allocation2 + $0x60] ss:$8 sps:$4 sm:$0xff]  }
 0x22c   :  { %v2506_v35 = vsel %vm5975_vm13, %v4317_v9, %v2505_v17  ;;  %v573_v16 = vsel %vm5205_vm5, 0, %v572_v13  ;;  %v2933_v3 = vshrl.u32 %v2900_v22, 16  ;;  %v2936_v43 = vshll.u32 %v2900_v22, 16  ;;  %v2908_v11 = vld [vmem:[#allocation2 + $0x30] sm:$0xf] }
 0x22d   :  { %v2510_v42 = vsel %vm5975_vm13, %v4318_v20, %v2509_v55  ;;  %574 = vst [vmem:[#allocation2 + $0x4c] sm:$0x1] %v573_v16  ;;  %v2947_v15 = vshrl.u32 %v2902_v12, 16  ;;  %v2950_v46 = vshll.u32 %v2902_v12, 16  ;;  %v2961_v53 = vshrl.u32 %v2904_v51, 16 }
 0x22e   :  { %4698 = vmatmul.mubr.msk.bf16.gmra.mrb[8].mxu1 %vm237_vm0, %v4324_v0  ;;  %v4326_v58 = vcombine.low %v2506_v35, %v2510_v42  ;;  %v2935_v56 = vrot.slane %v2933_v3, 4  ;;  %v2938_v0 = vrot.slane %v2936_v43, 5  ;;  %v2964_v26 = vshll.u32 %v2904_v51, 16  ;;  %v6127_v63 = vld [vmem:[#allocation2 + $0x14] sm:$0x1] }
 0x22f   :  { %4701 = vmatprep.mubr.msk.bf16.mxu1 %vm237_vm0, %v4325_v19  ;;  %v2975_v28 = vshrl.u32 %v2906_v2, 16  ;;  %v2978_v52 = vshll.u32 %v2906_v2, 16  ;;  %v2952_v37 = vrot.slane %v2950_v46, 5  ;;  %v6130_v48 = vld [vmem:[#allocation2 + $0x1c] sm:$0x1]  ;;  %v2963_v45 = vrot.slane %v2961_v53, 4 }
 0x230   :  { %v4962_v18 = vld [vmem:[#allocation2 + $0x40] ss:$8 sps:$4 sm:$0xff]   ;;  %v2939_v21 = vor.u32 %v2938_v0, %v2935_v56  ;;  %v6132_v44 = vld [vmem:[#allocation2 + $0x24] sm:$0x1]  ;;  %v2966_v27 = vrot.slane %v2964_v26, 5  ;;  %v2989_v14 = vshrl.u32 %v2908_v11, 16 }
 0x231   :  { %4638 = vmatmul.mubr.msk.bf16.gmra.mrb[24].mxu0 %vm237_vm0, %v4254_v29  ;;  %v2977_v6 = vrot.slane %v2975_v28, 4  ;;  %v2980_v10 = vrot.slane %v2978_v52, 5  ;;  %v2910_v61 = vld [vmem:[#allocation2 + $0x38] sm:$0xf]  ;;  %v2992_v24 = vshll.u32 %v2908_v11, 16  ;;  %v2942_v1 = vshll.u32 %v6127_v63, 16 }
 0x232   :  { %4641 = vmatprep.mubr.msk.bf16.mxu0 %vm237_vm0, %v4255_v40  ;;  %v2956_v54 = vshll.u32 %v6130_v48, 16  ;;  %v2970_v31 = vshll.u32 %v6132_v44, 16  ;;  %v602_v34 = vld [vmem:[#allocation2 + $0x9c] sm:$0x1]  ;;  %v2940_v60 = vrot.slane %v2939_v21, 4  ;;  %v3003_v8 = vshrl.u32 %v2910_v61, 16 }
 0x233   :  { %v6139_v33 = vld [vmem:[#allocation2 + $0x2c] sm:$0x1]  ;;  %v3006_v7 = vshll.u32 %v2910_v61, 16  ;;  %v4965_v4 = vld [vmem:[#allocation2 + $0x70] ss:$8 sps:$4 sm:$0xff]   ;;  %v2967_v23 = vor.u32 %v2966_v27, %v2963_v45  ;;  %v2981_v19 = vor.u32 %v2980_v10, %v2977_v6  ;;  %v2991_v59 = vrot.slane %v2989_v14, 4 }
 0x234   :  { %v2994_v62 = vrot.slane %v2992_v24, 5  ;;  %v2912_v36 = vld [vmem:[#allocation2 + $0x40] sm:$0xf]  ;;  %v2944_v20 = vrot.slane %v2942_v1, 5  ;;  %v6141_v55 = vld [vmem:[#allocation2 + $0x34] sm:$0x1] }
 0x235   :  { %v4966_v17 = vld [vmem:[#allocation2 + $0x80] ss:$8 sps:$4 sm:$0xff]   ;;  %v603_v29 = vsel %vm5205_vm5, 0, %v602_v34  ;;  %v2958_v35 = vrot.slane %v2956_v54, 5  ;;  %v2972_v42 = vrot.slane %v2970_v31, 5  ;;  %v3005_v13 = vrot.slane %v3003_v8, 4 }
 0x236   :  { %4702 = vmatmul.mubr.msk.bf16.gmra.mrb[12].mxu1 %vm237_vm0, %v4326_v58  ;;  %v2984_v58 = vshll.u32 %v6139_v33, 16  ;;  %604 = vst [vmem:[#allocation2 + $0x9c] sm:$0x1] %v603_v29  ;;  %v3008_v16 = vrot.slane %v3006_v7, 5  ;;  %v3017_v22 = vshrl.u32 %v2912_v36, 16  ;;  %v2968_v12 = vrot.slane %v2967_v23, 4 }
 0x237   :  { %4709 = vmatprep.mubr.msk.bf16.mxu1 %vm237_vm0, %v4958_v32  ;;  %v2914_v32 = vld [vmem:[#allocation2 + $0x48] sm:$0xf]  ;;  %v2982_v30 = vrot.slane %v2981_v19, 4  ;;  %v2995_v3 = vor.u32 %v2994_v62, %v2991_v59  ;;  %v6150_v43 = vld [vmem:[#allocation2 + $0x3c] sm:$0x1]  ;;  %v2998_v0 = vshll.u32 %v6141_v55, 16 }
 0x238   :  { %v3031_v51 = vshrl.u32 %v2914_v32, 16  ;;  %v3034_v2 = vshll.u32 %v2914_v32, 16  ;;  %v2986_v56 = vrot.slane %v2984_v58, 5  ;;  %v3009_v52 = vor.u32 %v3008_v16, %v3005_v13  ;;  %v6160_v45 = vld [vmem:[#allocation2 + $0x44] sm:$0x1] }
 0x239   :  { %4642 = vmatmul.mubr.msk.bf16.gmra.mrb[28].mxu0 %vm237_vm0, %v4256_v47  ;;  %v2916_v47 = vld [vmem:[#allocation2 + $0x60] sm:$0xf]  ;;  %v3012_v21 = vshll.u32 %v6150_v43, 16  ;;  %v2920_v14 = vld [vmem:[#allocation2 + $0x70] sm:$0xf]  ;;  %v3000_v1 = vrot.slane %v2998_v0, 5 }
 0x23a   :  { %v3048_v46 = vshll.u32 %v2916_v47, 16  ;;  %v3033_v27 = vrot.slane %v3031_v51, 4  ;;  %v3036_v6 = vrot.slane %v3034_v2, 5  ;;  %v4967_v24 = vld [vmem:[#allocation2 + $0x90] ss:$8 sps:$4 sm:$0xff]   ;;  %v3010_v34 = vrot.slane %v3009_v52, 4 }
 0x23b   :  { %v6162_v8 = vld [vmem:[#allocation2 + $0x64] sm:$0x1]  ;;  %v2922_v7 = vld [vmem:[#allocation2 + $0x78] sm:$0xf]  ;;  %v3014_v19 = vrot.slane %v3012_v21, 5  ;;  %v3026_v62 = vshll.u32 %v6160_v45, 16 }
 0x23c   :  { %v3050_v61 = vrot.slane %v3048_v46, 5  ;;  %v6167_v59 = vld [vmem:[#allocation2 + $0x4c] sm:$0x1]  ;;  %v3073_v29 = vshrl.u32 %v2920_v14, 16  ;;  %v3076_v58 = vshll.u32 %v2920_v14, 16  ;;  %v3087_v32 = vshrl.u32 %v2922_v7, 16 }
 0x23d   :  { %v3090_v13 = vshll.u32 %v2922_v7, 16  ;;  %v3015_v16 = vsel %vm5717_vm10, %v3010_v34, %v3014_v19  ;;  %v4969_v0 = vld [vmem:[#allocation6 + $0x88] sm:$0xff]   ;;  %v6193_v34 = vld [vmem:[#allocation2 + $0x84] sm:$0x1] }
 0x23e   :  { %4710 = vmatmul.mubr.msk.bf16.vlgmr.msra.gmra.mrb[0].mxu1 %vm237_vm0, %v4960_v50  ;;  %v3020_v50 = vshll.u32 %v2912_v36, 16  ;;  %v6170_v36 = vld [vmem:[#allocation2 + $0x6c] sm:$0x1]  ;;  %v3075_v46 = vrot.slane %v3073_v29, 4 }
 0x23f   :  { %4726 = vmatpush3.bf16.msra.mxu1 %v6044_v38  ;;  %4713 = vmatprep.mubr.msk.bf16.mxu1 %vm237_vm0, %v4961_v5  ;;  %v2949_v38 = vrot.slane %v2947_v15, 4  ;;  %v2945_v5 = vsel %vm5717_vm10, %v2940_v60, %v2944_v20  ;;  %v3045_v15 = vshrl.u32 %v2916_v47, 16  ;;  %v3040_v20 = vshll.u32 %v6167_v59, 16 }
 0x240   :  { %4727 = vmatprep.subr.bf16.mxu1 %v4964_v57  ;;  %v3022_v11 = vrot.slane %v3020_v50, 5  ;;  %v3054_v50 = vshll.u32 %v6162_v8, 16 }
 0x241   :  { %v2953_v9 = vor.u32 %v2952_v37, %v2949_v38  ;;  %v2987_v38 = vsel %vm5717_vm10, %v2982_v30, %v2986_v56  ;;  %v2996_v37 = vrot.slane %v2995_v3, 4  ;;  %v3047_v10 = vrot.slane %v3045_v15, 4 }
 0x242   :  { %v3042_v2 = vrot.slane %v3040_v20, 5 }
 0x243   :  { %4728 = vmatpush3.bf16.msra.mxu1 %v4964_v57  ;;  %v2954_v40 = vrot.slane %v2953_v9, 4  ;;  %v2918_v57 = vld [vmem:[#allocation2 + $0x68] sm:$0xf]  ;;  %v3001_v23 = vsel %vm5717_vm10, %v2996_v37, %v3000_v1  ;;  %v3051_v47 = vor.u32 %v3050_v61, %v3047_v10  ;;  %v2930_v10 = vld [vmem:[#allocation2 + $0x98] sm:$0xf] }
 0x244   :  { %4745 = vmatprep.subr.bf16.mxu1 %v6125_v49  ;;  %v3059_v53 = vshrl.u32 %v2918_v57, 16  ;;  %v3062_v26 = vshll.u32 %v2918_v57, 16  ;;  %v3068_v57 = vshll.u32 %v6170_v36, 16  ;;  %v4357_v52 = vcombine.low %v3001_v23, %v3015_v16 }
 0x245   :  { %v2959_v28 = vsel %vm5717_vm10, %v2954_v40, %v2958_v35  ;;  %v2924_v40 = vld [vmem:[#allocation2 + $0x80] sm:$0xf]  ;;  %v2926_v35 = vld [vmem:[#allocation2 + $0x88] sm:$0xf]  ;;  %v3052_v15 = vrot.slane %v3051_v47, 4  ;;  %v3143_v23 = vshrl.u32 %v2930_v10, 16 }
 0x246   :  { %4714 = vmatmul.mubr.msk.bf16.gmra.mrb[4].mxu1 %vm237_vm0, %v4962_v18  ;;  %v2973_v18 = vsel %vm5717_vm10, %v2968_v12, %v2972_v42  ;;  %v3061_v9 = vrot.slane %v3059_v53, 4  ;;  %v3064_v54 = vrot.slane %v3062_v26, 5  ;;  %v4355_v31 = vcombine.low %v2945_v5, %v2959_v28 }
 0x247   :  { %4717 = vmatprep.mubr.msk.bf16.mxu1 %vm237_vm0, %v4963_v39  ;;  %v3019_v39 = vrot.slane %v3017_v22, 4  ;;  %v3101_v5 = vshrl.u32 %v2924_v40, 16  ;;  %v3104_v12 = vshll.u32 %v2924_v40, 16  ;;  %v3115_v30 = vshrl.u32 %v2926_v35, 16 }
 0x248   :  { %v3065_v42 = vor.u32 %v3064_v54, %v3061_v9  ;;  %v3118_v3 = vshll.u32 %v2926_v35, 16  ;;  %v3078_v53 = vrot.slane %v3076_v58, 5  ;;  %v3089_v26 = vrot.slane %v3087_v32, 4  ;;  %v6191_v54 = vld [vmem:[#allocation2 + $0x7c] sm:$0x1] }
 0x249   :  { %v3023_v60 = vor.u32 %v3022_v11, %v3019_v39  ;;  %v3092_v28 = vrot.slane %v3090_v13, 5  ;;  %v3028_v39 = vrot.slane %v3026_v62, 5  ;;  %v3056_v11 = vrot.slane %v3054_v50, 5 }
 0x24a   :  { %v3066_v56 = vrot.slane %v3065_v42, 4  ;;  %v3103_v37 = vrot.slane %v3101_v5, 4  ;;  %v3106_v21 = vrot.slane %v3104_v12, 5  ;;  %v3146_v19 = vshll.u32 %v2930_v10, 16 }
 0x24b   :  { %v3024_v22 = vrot.slane %v3023_v60, 4  ;;  %v3057_v1 = vsel %vm5717_vm10, %v3052_v15, %v3056_v11  ;;  %v6195_v60 = vld [vmem:[#allocation2 + $0x8c] sm:$0x1]  ;;  %v3096_v40 = vshll.u32 %v6191_v54, 16  ;;  %v3110_v58 = vshll.u32 %v6193_v34, 16 }
 0x24c   :  { %v3124_v32 = vshll.u32 %v6195_v60, 16  ;;  %v3148_v50 = vrot.slane %v3146_v19, 5  ;;  %v6205_v15 = vld [vmem:[#allocation2 + $0x94] sm:$0x1]  ;;  %v3334_v11 = vld [vmem:[#allocation2 + $0x10] sm:$0xe] }
 0x24d   :  { %v3029_v61 = vsel %vm5717_vm10, %v3024_v22, %v3028_v39  ;;  %v3145_v22 = vrot.slane %v3143_v23, 4  ;;  %v3138_v39 = vshll.u32 %v6205_v15, 16  ;;  %v4373_v10 = vrot.slane %v3334_v11, 9  ;;  %v3338_v19 = vld [vmem:[#allocation2 + $0x30] sm:$0xe] }
 0x24e   :  { %4718 = vmatmul.mubr.msk.bf16.gmra.mrb[8].mxu1 %vm237_vm0, %v4965_v4  ;;  %v4356_v4 = vcombine.low %v2973_v18, %v2987_v38  ;;  %v3070_v18 = vrot.slane %v3068_v57, 5  ;;  %v2928_v38 = vld [vmem:[#allocation2 + $0x90] sm:$0xf]  ;;  %v4377_v25 = vrot.slane %v3338_v19, 9 }
 0x24f   :  { %4721 = vmatprep.mubr.msk.bf16.mxu1 %vm237_vm0, %v4966_v17  ;;  %v3037_v17 = vor.u32 %v3036_v6, %v3033_v27  ;;  %v3117_v27 = vrot.slane %v3115_v30, 4  ;;  %v3120_v6 = vrot.slane %v3118_v3, 5  ;;  %v3129_v7 = vshrl.u32 %v2928_v38, 16 }
 0x250   :  { %v3071_v9 = vsel %vm5717_vm10, %v3066_v56, %v3070_v18  ;;  %v3098_v30 = vrot.slane %v3096_v40, 5  ;;  %v3335_v18 = vld [vmem:[#allocation2 + $0x18] sm:$0xe]  ;;  %v3396_v40 = vrot.slane %v6139_v33, 5 }
 0x251   :  { %v3038_v51 = vrot.slane %v3037_v17, 4  ;;  %v3107_v17 = vor.u32 %v3106_v21, %v3103_v37  ;;  %v3121_v20 = vor.u32 %v3120_v6, %v3117_v27  ;;  %v4359_v29 = vcombine.low %v3057_v1, %v3071_v9 }
 0x252   :  { %v3131_v13 = vrot.slane %v3129_v7, 4  ;;  %v3388_v1 = vrot.slane %v6130_v48, 5  ;;  %v3140_v9 = vrot.slane %v3138_v39, 5  ;;  %v3336_v7 = vld [vmem:[#allocation2 + $0x20] sm:$0xe] }
 0x253   :  { %v3043_v14 = vsel %vm5717_vm10, %v3038_v51, %v3042_v2  ;;  %v3108_v5 = vrot.slane %v3107_v17, 4  ;;  %v3122_v12 = vrot.slane %v3121_v20, 4  ;;  %v3112_v51 = vrot.slane %v3110_v58, 5  ;;  %v3347_v39 = vld [vmem:[#allocation2 + $0x88] sm:$0xe] }
 0x254   :  { %v4358_v47 = vcombine.low %v3029_v61, %v3043_v14  ;;  %v3126_v2 = vrot.slane %v3124_v32, 5  ;;  %v3384_v61 = vrot.slane %v6127_v63, 5  ;;  %v4374_v14 = vrot.slane %v3335_v18, 9  ;;  %v3337_v63 = vld [vmem:[#allocation2 + $0x28] sm:$0xe] }
 0x255   :  { %v4375_v17 = vrot.slane %v3336_v7, 9  ;;  %v3404_v58 = vrot.slane %v6150_v43, 5 }
 0x256   :  { %4722 = vmatmul.mubr.msk.bf16.gmra.mrb[12].mxu1 %vm237_vm0, %v4967_v24  ;;  %v6185_v24 = vld [vmem:[#allocation2 + $0x74] sm:$0x1]  ;;  %v3389_v23 = vsel %vm5975_vm13, %v4374_v14, %v3388_v1 }
 0x257   :  { %4729 = vmatprep.mubr.msk.bf16.mxu1 %vm237_vm0, %v4355_v31  ;;  %v3093_v31 = vor.u32 %v3092_v28, %v3089_v26  ;;  %v3082_v62 = vshll.u32 %v6185_v24, 16  ;;  %v3113_v28 = vsel %vm5717_vm10, %v3108_v5, %v3112_v51 }
 0x259   :  { %v3094_v42 = vrot.slane %v3093_v31, 4  ;;  %v3084_v57 = vrot.slane %v3082_v62, 5  ;;  %v3339_v62 = vld [vmem:[#allocation2 + $0x38] sm:$0xe] }
 0x25b   :  { %v3099_v56 = vsel %vm5717_vm10, %v3094_v42, %v3098_v30  ;;  %v4378_v42 = vrot.slane %v3339_v62, 9 }
 0x25e   :  { %4730 = vmatmul.mubr.msk.bf16.vlgmr.msra.gmra.mrb[0].mxu1 %vm237_vm0, %v4356_v4  ;;  %v3132_v4 = vshll.u32 %v2928_v38, 16 }
 0x25f   :  { %4746 = vmatpush3.bf16.msra.mxu1 %v6125_v49  ;;  %4733 = vmatprep.mubr.msk.bf16.mxu1 %vm237_vm0, %v4357_v52  ;;  %v3079_v49 = vor.u32 %v3078_v53, %v3075_v46  ;;  %v6207_v46 = vld [vmem:[#allocation2 + $0x9c] sm:$0x1]  ;;  %v3149_v53 = vor.u32 %v3148_v50, %v3145_v22  ;;  %v3127_v52 = vsel %vm5717_vm10, %v3122_v12, %v3126_v2  ;;  %v3341_v22 = vld [vmem:[#allocation2 + $0x48] sm:$0xe]  ;;  %v3408_v12 = vrot.slane %v6160_v45, 5 }
 0x260   :  { %4747 = vmatprep.subr.bf16.mxu1 %v4969_v0  ;;  %v3134_v16 = vrot.slane %v3132_v4, 5  ;;  %v3152_v26 = vshll.u32 %v6207_v46, 16  ;;  %v4361_v37 = vcombine.low %v3113_v28, %v3127_v52  ;;  %v3385_v4 = vsel %vm5975_vm13, %v4373_v10, %v3384_v61  ;;  %v3343_v50 = vld [vmem:[#allocation2 + $0x68] sm:$0xe]  ;;  %v3344_v45 = vld [vmem:[#allocation2 + $0x70] sm:$0xe] }
 0x261   :  { %v3080_v35 = vrot.slane %v3079_v49, 4  ;;  %v3150_v27 = vrot.slane %v3149_v53, 4  ;;  %v4389_v20 = vcombine.low %v3385_v4, %v3389_v23  ;;  %v4380_v30 = vrot.slane %v3341_v22, 9  ;;  %v3345_v52 = vld [vmem:[#allocation2 + $0x78] sm:$0xe] }
 0x262   :  { %v3154_v6 = vrot.slane %v3152_v26, 5  ;;  %v3416_v2 = vrot.slane %v6162_v8, 5  ;;  %v3346_v8 = vld [vmem:[#allocation2 + $0x80] sm:$0xe]  ;;  %v4386_v10 = vrot.slane %v3347_v39, 9  ;;  %v3436_v61 = vrot.slane %v6195_v60, 5 }
 0x263   :  { %4748 = vmatpush3.bf16.msra.mxu1 %v4969_v0  ;;  %v3085_v3 = vsel %vm5717_vm10, %v3080_v35, %v3084_v57  ;;  %v3135_v0 = vor.u32 %v3134_v16, %v3131_v13  ;;  %v3400_v35 = vrot.slane %v6141_v55, 5  ;;  %v3405_v16 = vsel %vm5975_vm13, %v4378_v42, %v3404_v58  ;;  %v3342_v55 = vld [vmem:[#allocation2 + $0x60] sm:$0xe] }
 0x264   :  { %v4360_v38 = vcombine.low %v3085_v3, %v3099_v56  ;;  %v3155_v31 = vsel %vm5717_vm10, %v3150_v27, %v3154_v6  ;;  %v3412_v3 = vrot.slane %v6167_v59, 5  ;;  %v4381_v51 = vrot.slane %v3342_v55, 9 }
 0x265   :  { %v3136_v21 = vrot.slane %v3135_v0, 4  ;;  %v3401_v33 = vsel %vm5975_vm13, %v4377_v25, %v3400_v35  ;;  %v4382_v56 = vrot.slane %v3343_v50, 9  ;;  %v3420_v0 = vrot.slane %v6170_v36, 5 }
 0x266   :  { %4734 = vmatmul.mubr.msk.bf16.gmra.mrb[4].mxu1 %vm237_vm0, %v4358_v47  ;;  %v3392_v47 = vrot.slane %v6132_v44, 5  ;;  %v3340_v44 = vld [vmem:[#allocation2 + $0x40] sm:$0xe]  ;;  %v4391_v5 = vcombine.low %v3401_v33, %v3405_v16  ;;  %v3413_v26 = vsel %vm5975_vm13, %v4380_v30, %v3412_v3  ;;  %v3417_v59 = vsel %vm5975_vm13, %v4381_v51, %v3416_v2  ;;  %v4971_v16 = vld [vmem:[%s6483_s3 + $0x8] sm:$0xff]  }
 0x267   :  { %4737 = vmatprep.mubr.msk.bf16.mxu1 %vm237_vm0, %v4359_v29  ;;  %v3141_v49 = vsel %vm5717_vm10, %v3136_v21, %v3140_v9  ;;  %v4376_v29 = vrot.slane %v3337_v63, 9  ;;  %v4379_v43 = vrot.slane %v3340_v44, 9  ;;  %v3421_v28 = vsel %vm5975_vm13, %v4382_v56, %v3420_v0  ;;  %v4970_v33 = vld [vmem:[%s6483_s3] sm:$0xff]  }
 0x268   :  { %v4362_v48 = vcombine.low %v3141_v49, %v3155_v31  ;;  %v3393_v32 = vsel %vm5975_vm13, %v4375_v17, %v3392_v47  ;;  %v4383_v36 = vrot.slane %v3344_v45, 9  ;;  %v4393_v18 = vcombine.low %v3417_v59, %v3421_v28  ;;  %v3349_v49 = vld [vmem:[#allocation2 + $0x98] sm:$0xe]  ;;  %4765 = vmatprep.subr.bf16.mxu0 %v4970_v33 }
 0x269   :  { %v3397_v13 = vsel %vm5975_vm13, %v4376_v29, %v3396_v40  ;;  %v3409_v53 = vsel %vm5975_vm13, %v4379_v43, %v3408_v12  ;;  %v3428_v21 = vrot.slane %v6191_v54, 5  ;;  %v4385_v27 = vrot.slane %v3346_v8, 9  ;;  %4766 = vmatpush3.bf16.msra.mxu0 %v4970_v33 }
 0x26a   :  { %v4390_v57 = vcombine.low %v3393_v32, %v3397_v13  ;;  %v4392_v11 = vcombine.low %v3409_v53, %v3413_v26  ;;  %v3432_v6 = vrot.slane %v6193_v34, 5  ;;  %v3437_v9 = vsel %vm5975_vm13, %v4386_v10, %v3436_v61  ;;  %4767 = vmatprep.subr.bf16.mxu0 %v4971_v16 }
 0x26b   :  { %v3440_v60 = vrot.slane %v6205_v15, 5  ;;  %v4388_v4 = vrot.slane %v3349_v49, 9  ;;  %v3444_v23 = vrot.slane %v6207_v46, 5 }
 0x26c   :  { %v3433_v54 = vsel %vm5975_vm13, %v4385_v27, %v3432_v6 }
 0x26d   :  { %v4395_v7 = vcombine.low %v3433_v54, %v3437_v9  ;;  %v3445_v19 = vsel %vm5975_vm13, %v4388_v4, %v3444_v23  ;;  %4768 = vmatpush3.bf16.msra.mxu0 %v4971_v16 }
 0x26e   :  { %4738 = vmatmul.mubr.msk.bf16.gmra.mrb[8].mxu1 %vm237_vm0, %v4360_v38  ;;  %v3424_v38 = vrot.slane %v6185_v24, 5  ;;  %v3348_v24 = vld [vmem:[#allocation2 + $0x90] sm:$0xe] }
 0x26f   :  { %4741 = vmatprep.mubr.msk.bf16.mxu1 %vm237_vm0, %v4361_v37  ;;  %v4384_v37 = vrot.slane %v3345_v52, 9  ;;  %v4387_v31 = vrot.slane %v3348_v24, 9 }
 0x270   :  { %v3425_v14 = vsel %vm5975_vm13, %v4383_v36, %v3424_v38 }
 0x271   :  { %v3429_v1 = vsel %vm5975_vm13, %v4384_v37, %v3428_v21  ;;  %v3441_v63 = vsel %vm5975_vm13, %v4387_v31, %v3440_v60 }
 0x272   :  { %v4394_v34 = vcombine.low %v3425_v14, %v3429_v1  ;;  %v4396_v62 = vcombine.low %v3441_v63, %v3445_v19 }
 0x276   :  { %4742 = vmatmul.mubr.msk.bf16.gmra.mrb[12].mxu1 %vm237_vm0, %v4362_v48 }
 0x277   :  { %4749 = vmatprep.mubr.msk.bf16.mxu1 %vm237_vm0, %v4389_v20 }
 0x27e   :  { %4750 = vmatmul.mubr.msk.bf16.vlgmr.msra.gmra.mrb[0].mxu1 %vm237_vm0, %v4390_v57 }
 0x27f   :  { %4753 = vmatprep.mubr.msk.bf16.mxu1 %vm237_vm0, %v4391_v5 }
 0x286   :  { %4754 = vmatmul.mubr.msk.bf16.gmra.mrb[4].mxu1 %vm237_vm0, %v4392_v11 }
 0x287   :  { %4757 = vmatprep.mubr.msk.bf16.mxu1 %vm237_vm0, %v4393_v18 }
 0x28e   :  { %4758 = vmatmul.mubr.msk.bf16.gmra.mrb[8].mxu1 %vm237_vm0, %v4394_v34 }
 0x28f   :  { %4761 = vmatprep.mubr.msk.bf16.mxu1 %vm237_vm0, %v4395_v7 }
 0x296   :  { %4762 = vmatmul.mubr.msk.bf16.gmra.mrb[12].mxu1 %vm237_vm0, %v4396_v62 }
 0x2f4   :  { %v4631_v48 = vpop.f32.mrb[16].mxu0 }
 0x2f5   :  { %v1676_v17 = vpop.f32.mrb[17].mxu0 }
 0x2f6   :  { %v4632_v20 = vpop.f32.mrb[18].mxu0 }
 0x2f7   :  { %v1679_v15 = vpop.f32.mrb[19].mxu0 }
 0x2fc   :  { %v4635_v47 = vpop.f32.mrb[20].mxu0 }
 0x2fd   :  { %v1692_v29 = vpop.f32.mrb[21].mxu0 }
 0x2fe   :  { %v4636_v46 = vpop.f32.mrb[22].mxu0 }
 0x2ff   :  { %v1695_v40 = vpop.f32.mrb[23].mxu0 }
 0x304   :  { %v4639_v25 = vpop.f32.mrb[24].mxu0 }
 0x305   :  { %v1708_v35 = vpop.f32.mrb[25].mxu0 }
 0x306   :  { %v4640_v42 = vpop.f32.mrb[26].mxu0 }
 0x307   :  { %v1711_v58 = vpop.f32.mrb[27].mxu0 }
 0x30c   :  { %v4643_v32 = vpop.f32.mrb[28].mxu0 }
 0x30d   :  { %v1724_v13 = vpop.f32.mrb[29].mxu0 }
 0x30e   :  { %v4644_v44 = vpop.f32.mrb[30].mxu0 }
 0x30f   :  { %v1727_v41 = vpop.f32.mrb[31].mxu0 }
 0x351   :  { %v4751_v22 = vpop.f32.mrb[0].mxu1 }
 0x352   :  { %v6286_v55 = vadd.f32 %v4751_v22, %v4631_v48  ;;  %v3545_v50 = vpop.f32.mrb[1].mxu1 }
 0x353   :  { %v6288_v57 = vadd.f32 %v3545_v50, %v1676_v17  ;;  %v4752_v43 = vpop.f32.mrb[2].mxu1 }
 0x354   :  { %v6290_v5 = vadd.f32 %v4752_v43, %v4632_v20  ;;  %v3548_v12 = vpop.f32.mrb[3].mxu1  ;;  %v3629_v56 = vsel %vm237_vm0, %v6286_v55, 0.0 }
 0x355   :  { %v6292_v30 = vadd.f32 %v3548_v12, %v1679_v15  ;;  %v3626_v3 = vsel %vm237_vm0, %v6288_v57, 0.0 }
 0x356   :  { %v3631_v59 = vsel %vm237_vm0, %v6290_v5, 0.0 }
 0x357   :  { %v3627_v51 = vsel %vm237_vm0, %v6292_v30, 0.0 }
 0x358   :  { %v3628_v2 = vadd.f32 %v3627_v51, %v3626_v3 }
 0x359   :  { %v4755_v0 = vpop.f32.mrb[4].mxu1 }
 0x35a   :  { %v3630_v53 = vadd.f32 %v3629_v56, %v3628_v2  ;;  %v4789_v26 = vadd.f32 %v4755_v0, %v4635_v47  ;;  %v3561_v45 = vpop.f32.mrb[5].mxu1 }
 0x35b   :  { %v4790_v28 = vadd.f32 %v3561_v45, %v1692_v29  ;;  %v4756_v52 = vpop.f32.mrb[6].mxu1 }
 0x35c   :  { %v3632_v8 = vadd.f32 %v3631_v59, %v3630_v53  ;;  %v4791_v39 = vadd.f32 %v4756_v52, %v4636_v46  ;;  %v3564_v11 = vpop.f32.mrb[7].mxu1  ;;  %v3637_v27 = vsel %vm237_vm0, %v4789_v26, 0.0 }
 0x35d   :  { %v3633_v36 = vsel %vm237_vm0, %v4790_v28, 0.0  ;;  %v4792_v18 = vadd.f32 %v3564_v11, %v1695_v40 }
 0x35e   :  { %v3634_v38 = vadd.f32 %v3633_v36, %v3632_v8  ;;  %v3639_v1 = vsel %vm237_vm0, %v4791_v39, 0.0 }
 0x35f   :  { %v3635_v37 = vsel %vm237_vm0, %v4792_v18, 0.0 }
 0x360   :  { %v3636_v21 = vadd.f32 %v3635_v37, %v3634_v38 }
 0x361   :  { %v4759_v6 = vpop.f32.mrb[8].mxu1 }
 0x362   :  { %v3638_v10 = vadd.f32 %v3637_v27, %v3636_v21  ;;  %v4793_v61 = vadd.f32 %v4759_v6, %v4639_v25  ;;  %v3577_v14 = vpop.f32.mrb[9].mxu1 }
 0x363   :  { %v4794_v24 = vadd.f32 %v3577_v14, %v1708_v35  ;;  %v4760_v54 = vpop.f32.mrb[10].mxu1 }
 0x364   :  { %v3640_v9 = vadd.f32 %v3639_v1, %v3638_v10  ;;  %v4795_v49 = vadd.f32 %v4760_v54, %v4640_v42  ;;  %v3580_v34 = vpop.f32.mrb[11].mxu1  ;;  %v3645_v63 = vsel %vm237_vm0, %v4793_v61, 0.0 }
 0x365   :  { %v3641_v31 = vsel %vm237_vm0, %v4794_v24, 0.0  ;;  %v4796_v7 = vadd.f32 %v3580_v34, %v1711_v58 }
 0x366   :  { %v3642_v60 = vadd.f32 %v3641_v31, %v3640_v9  ;;  %v3647_v20 = vsel %vm237_vm0, %v4795_v49, 0.0 }
 0x367   :  { %v3643_v4 = vsel %vm237_vm0, %v4796_v7, 0.0 }
 0x368   :  { %v3644_v23 = vadd.f32 %v3643_v4, %v3642_v60 }
 0x369   :  { %v4763_v19 = vpop.f32.mrb[12].mxu1 }
 0x36a   :  { %v3646_v62 = vadd.f32 %v3645_v63, %v3644_v23  ;;  %v4797_v48 = vadd.f32 %v4763_v19, %v4643_v32  ;;  %v3593_v17 = vpop.f32.mrb[13].mxu1 }
 0x36b   :  { %v4798_v15 = vadd.f32 %v3593_v17, %v1724_v13  ;;  %v4764_v47 = vpop.f32.mrb[14].mxu1 }
 0x36c   :  { %v3648_v29 = vadd.f32 %v3647_v20, %v3646_v62  ;;  %v4799_v46 = vadd.f32 %v4764_v47, %v4644_v44  ;;  %v3596_v40 = vpop.f32.mrb[15].mxu1  ;;  %v3653_v16 = vsel %vm237_vm0, %v4797_v48, 0.0 }
 0x36d   :  { %v3649_v25 = vsel %vm237_vm0, %v4798_v15, 0.0  ;;  %v4800_v35 = vadd.f32 %v3596_v40, %v1727_v41 }
 0x36e   :  { %v3650_v42 = vadd.f32 %v3649_v25, %v3648_v29  ;;  %v3655_v32 = vsel %vm237_vm0, %v4799_v46, 0.0 }
 0x36f   :  { %v3651_v58 = vsel %vm237_vm0, %v4800_v35, 0.0 }
 0x370   :  { %v3652_v33 = vadd.f32 %v3651_v58, %v3650_v42 }
 0x372   :  { %v3654_v22 = vadd.f32 %v3653_v16, %v3652_v33 }
 0x374   :  { %v3656_v50 = vadd.f32 %v3655_v32, %v3654_v22 }
 0x376   :  { %v3657_v43 = vrot.slane %v3656_v50, 4 }
 0x378   :  { %v3658_v12 = vadd.f32 %v3657_v43, %v3656_v50 }
 0x37a   :  { %v3659_v13 = vrot.slane %v3658_v12, 2 }
 0x37c   :  { %v3660_v3 = vadd.f32 %v3659_v13, %v3658_v12 }
 0x37e   :  { %v3661_v51 = vrot.slane %v3660_v3, 1 }
 0x380   :  { %v3662_v44 = vadd.f32 %v3661_v51, %v3660_v3 }
 0x382   :  { %v3663_v2 = vmul.f32 0.0078125, %v3662_v44 }
 0x384   :  { %v6315_v56 = vsub.f32 %v6288_v57, %v3663_v2  ;;  %v6318_v41 = vsub.f32 %v6292_v30, %v3663_v2  ;;  %v6321_v0 = vsub.f32 %v6286_v55, %v3663_v2  ;;  %v6324_v53 = vsub.f32 %v6290_v5, %v3663_v2 }
 0x385   :  { %v6326_v45 = vsub.f32 %v4790_v28, %v3663_v2  ;;  %v6328_v59 = vsub.f32 %v4792_v18, %v3663_v2  ;;  %v6330_v52 = vsub.f32 %v4789_v26, %v3663_v2  ;;  %v6332_v8 = vsub.f32 %v4791_v39, %v3663_v2 }
 0x386   :  { %v6334_v11 = vsub.f32 %v4794_v24, %v3663_v2  ;;  %v6336_v57 = vsub.f32 %v4796_v7, %v3663_v2  ;;  %v6338_v30 = vsub.f32 %v4793_v61, %v3663_v2  ;;  %v6340_v36 = vsub.f32 %v4795_v49, %v3663_v2 }
 0x387   :  { %v6342_v55 = vsub.f32 %v4798_v15, %v3663_v2  ;;  %v3677_v5 = vsub.f32 %v4800_v35, %v3663_v2  ;;  %v6344_v38 = vsub.f32 %v4797_v48, %v3663_v2  ;;  %v6346_v28 = vsub.f32 %v4799_v46, %v3663_v2 }
 0x388   :  { %v3680_v26 = vmul.f32 %v6315_v56, %v6315_v56  ;;  %v3681_v39 = vmul.f32 %v6318_v41, %v6318_v41  ;;  %v3682_v18 = vmul.f32 %v6321_v0, %v6321_v0  ;;  %v3683_v37 = vmul.f32 %v6324_v53, %v6324_v53 }
 0x389   :  { %v3684_v10 = vmul.f32 %v6326_v45, %v6326_v45  ;;  %v3685_v1 = vmul.f32 %v6328_v59, %v6328_v59  ;;  %v3686_v9 = vmul.f32 %v6330_v52, %v6330_v52  ;;  %v3687_v31 = vmul.f32 %v6332_v8, %v6332_v8 }
 0x38a   :  { %v3696_v21 = vsel %vm237_vm0, %v3680_v26, 0.0  ;;  %v3697_v27 = vsel %vm237_vm0, %v3681_v39, 0.0  ;;  %v3699_v61 = vsel %vm237_vm0, %v3682_v18, 0.0  ;;  %v3701_v24 = vsel %vm237_vm0, %v3683_v37, 0.0 }
 0x38b   :  { %v3698_v6 = vadd.f32 %v3697_v27, %v3696_v21  ;;  %v3703_v49 = vsel %vm237_vm0, %v3684_v10, 0.0  ;;  %v3705_v7 = vsel %vm237_vm0, %v3685_v1, 0.0  ;;  %v3688_v4 = vmul.f32 %v6334_v11, %v6334_v11 }
 0x38c   :  { %v3707_v23 = vsel %vm237_vm0, %v3686_v9, 0.0  ;;  %v3689_v19 = vmul.f32 %v6336_v57, %v6336_v57  ;;  %v3709_v62 = vsel %vm237_vm0, %v3687_v31, 0.0  ;;  %v3690_v17 = vmul.f32 %v6338_v30, %v6338_v30  ;;  %v6405_v9 = vld [vmem:[%s6484_s4 + $0x3] ss:$0 sm:$0xff] }
 0x38d   :  { %v3700_v14 = vadd.f32 %v3699_v61, %v3698_v6  ;;  %v3711_v20 = vsel %vm237_vm0, %v3688_v4, 0.0  ;;  %v3691_v47 = vmul.f32 %v6340_v36, %v6340_v36  ;;  %v3692_v40 = vmul.f32 %v6342_v55, %v6342_v55  ;;  %v6397_v61 = vld [vmem:[%s6484_s4 + $0x2] ss:$0 sm:$0xff] }
 0x38e   :  { %v3713_v29 = vsel %vm237_vm0, %v3689_v19, 0.0  ;;  %v3715_v25 = vsel %vm237_vm0, %v3690_v17, 0.0  ;;  %v3693_v42 = vmul.f32 %v3677_v5, %v3677_v5  ;;  %v3694_v16 = vmul.f32 %v6344_v38, %v6344_v38 }
 0x38f   :  { %v3702_v54 = vadd.f32 %v3701_v24, %v3700_v14  ;;  %v3717_v58 = vsel %vm237_vm0, %v3691_v47, 0.0  ;;  %v3719_v22 = vsel %vm237_vm0, %v3692_v40, 0.0  ;;  %v3695_v50 = vmul.f32 %v6346_v28, %v6346_v28 }
 0x390   :  { %v3721_v43 = vsel %vm237_vm0, %v3693_v42, 0.0  ;;  %v3723_v13 = vsel %vm237_vm0, %v3694_v16, 0.0 }
 0x391   :  { %v3704_v34 = vadd.f32 %v3703_v49, %v3702_v54  ;;  %v3725_v51 = vsel %vm237_vm0, %v3695_v50, 0.0 }
 0x393   :  { %v3706_v60 = vadd.f32 %v3705_v7, %v3704_v34 }
 0x395   :  { %v3708_v63 = vadd.f32 %v3707_v23, %v3706_v60 }
 0x397   :  { %v3710_v48 = vadd.f32 %v3709_v62, %v3708_v63 }
 0x399   :  { %v3712_v15 = vadd.f32 %v3711_v20, %v3710_v48 }
 0x39b   :  { %v3714_v46 = vadd.f32 %v3713_v29, %v3712_v15 }
 0x39d   :  { %v3716_v35 = vadd.f32 %v3715_v25, %v3714_v46 }
 0x39f   :  { %v3718_v33 = vadd.f32 %v3717_v58, %v3716_v35 }
 0x3a1   :  { %v3720_v32 = vadd.f32 %v3719_v22, %v3718_v33 }
 0x3a3   :  { %v3722_v12 = vadd.f32 %v3721_v43, %v3720_v32 }
 0x3a5   :  { %v3724_v3 = vadd.f32 %v3723_v13, %v3722_v12 }
 0x3a7   :  { %v3726_v44 = vadd.f32 %v3725_v51, %v3724_v3 }
 0x3a9   :  { %v3727_v2 = vrot.slane %v3726_v44, 4 }
 0x3ab   :  { %v3728_v26 = vadd.f32 %v3727_v2, %v3726_v44 }
 0x3ad   :  { %v3729_v39 = vrot.slane %v3728_v26, 2 }
 0x3af   :  { %v3730_v18 = vadd.f32 %v3729_v39, %v3728_v26 }
 0x3b1   :  { %v3731_v37 = vrot.slane %v3730_v18, 1 }
 0x3b3   :  { %v3732_v21 = vadd.f32 %v3731_v37, %v3730_v18 }
 0x3b5   :  { %v3733_v27 = vmul.f32 0.0078125, %v3732_v21 }
 0x3b7   :  { %v3734_v6 = vadd.f32 1e-05, %v3733_v27 }
 0x3b9   :  { %4974 = vrsqrt.f32 %v3734_v6 }
 0x3c3   :  { %v4975_v10 = vpop.eup %4974 }
 0x3c4   :  { %v3749_v14 = vmul.f32 %v4975_v10, %v3677_v5  ;;  %v3736_v1 = vmul.f32 %v4975_v10, %v6315_v56  ;;  %v3737_v24 = vmul.f32 %v4975_v10, %v6318_v41  ;;  %v3738_v54 = vmul.f32 %v4975_v10, %v6321_v0 }
 0x3c5   :  { %v3739_v49 = vmul.f32 %v4975_v10, %v6324_v53  ;;  %v3740_v34 = vmul.f32 %v4975_v10, %v6326_v45  ;;  %v3741_v31 = vmul.f32 %v4975_v10, %v6328_v59  ;;  %v3742_v7 = vmul.f32 %v4975_v10, %v6330_v52 }
 0x3c6   :  { %v3769_v5 = vmul.f32 %v6397_v61, %v3749_v14  ;;  %v3756_v56 = vmul.f32 %v6397_v61, %v3736_v1  ;;  %v3757_v41 = vmul.f32 %v6397_v61, %v3737_v24  ;;  %v3758_v0 = vmul.f32 %v6397_v61, %v3738_v54 }
 0x3c7   :  { %v3759_v60 = vmul.f32 %v6397_v61, %v3739_v49  ;;  %v3760_v4 = vmul.f32 %v6397_v61, %v3740_v34  ;;  %v3761_v53 = vmul.f32 %v6397_v61, %v3741_v31  ;;  %v3743_v45 = vmul.f32 %v4975_v10, %v6332_v8 }
 0x3c8   :  { %v3776_v59 = vadd.f32 %v6405_v9, %v3756_v56  ;;  %v3777_v52 = vadd.f32 %v6405_v9, %v3757_v41  ;;  %v3778_v23 = vadd.f32 %v6405_v9, %v3758_v0  ;;  %v3762_v48 = vmul.f32 %v6397_v61, %v3742_v7 }
 0x3c9   :  { %v3779_v63 = vadd.f32 %v6405_v9, %v3759_v60  ;;  %v3780_v19 = vadd.f32 %v6405_v9, %v3760_v4  ;;  %v3781_v62 = vadd.f32 %v6405_v9, %v3761_v53  ;;  %v3789_v17 = vadd.f32 %v6405_v9, %v3769_v5 }
 0x3ca   :  { %v3792_v20 = vmax.f32 %v3776_v59, 0.0  ;;  %v3793_v15 = vmax.f32 %v3777_v52, 0.0  ;;  %v3794_v47 = vmax.f32 %v3778_v23, 0.0  ;;  %v3763_v40 = vmul.f32 %v6397_v61, %v3743_v45 }
 0x3cb   :  { %v3795_v8 = vmax.f32 %v3779_v63, 0.0  ;;  %v3796_v29 = vmax.f32 %v3780_v19, 0.0  ;;  %v3797_v46 = vmax.f32 %v3781_v62, 0.0  ;;  %v3782_v35 = vadd.f32 %v6405_v9, %v3762_v48 }
 0x3cc   :  { %v3808_v25 = vpack.c.bf16 %v3793_v15, %v3792_v20  ;;  %v3744_v42 = vmul.f32 %v4975_v10, %v6334_v11  ;;  %v3745_v58 = vmul.f32 %v4975_v10, %v6336_v57  ;;  %v3783_v22 = vadd.f32 %v6405_v9, %v3763_v40 }
 0x3cd   :  { %v3809_v33 = vpack.c.bf16 %v3795_v8, %v3794_v47  ;;  %v3810_v16 = vpack.c.bf16 %v3797_v46, %v3796_v29  ;;  %v3746_v32 = vmul.f32 %v4975_v10, %v6338_v30  ;;  %v3798_v50 = vmax.f32 %v3782_v35, 0.0 }
 0x3ce   :  { %4769 = vmatprep.mubr.msk.bf16.mxu0 %vm237_vm0, %v3808_v25  ;;  %v3764_v43 = vmul.f32 %v6397_v61, %v3744_v42  ;;  %v3765_v12 = vmul.f32 %v6397_v61, %v3745_v58  ;;  %v3747_v13 = vmul.f32 %v4975_v10, %v6340_v36  ;;  %v3799_v11 = vmax.f32 %v3783_v22, 0.0 }
 0x3cf   :  { %4770 = vmatmul.mubr.msk.bf16.vlgmr.msra.gmra.mrb[32].mxu0 %vm237_vm0, %v3809_v33  ;;  %v3766_v57 = vmul.f32 %v6397_v61, %v3746_v32  ;;  %v3748_v3 = vmul.f32 %v4975_v10, %v6342_v55  ;;  %v3750_v51 = vmul.f32 %v4975_v10, %v6344_v38  ;;  %v3751_v26 = vmul.f32 %v4975_v10, %v6346_v28 }
 0x3d0   :  { %4773 = vmatprep.mubr.msk.bf16.mxu0 %vm237_vm0, %v3810_v16  ;;  %v3784_v30 = vadd.f32 %v6405_v9, %v3764_v43  ;;  %v3785_v44 = vadd.f32 %v6405_v9, %v3765_v12  ;;  %v3767_v2 = vmul.f32 %v6397_v61, %v3747_v13  ;;  %v3811_v36 = vpack.c.bf16 %v3799_v11, %v3798_v50 }
 0x3d1   :  { %v3786_v39 = vadd.f32 %v6405_v9, %v3766_v57  ;;  %v3768_v18 = vmul.f32 %v6397_v61, %v3748_v3  ;;  %v3770_v37 = vmul.f32 %v6397_v61, %v3750_v51  ;;  %v3771_v27 = vmul.f32 %v6397_v61, %v3751_v26 }
 0x3d2   :  { %v3800_v55 = vmax.f32 %v3784_v30, 0.0  ;;  %v3801_v21 = vmax.f32 %v3785_v44, 0.0  ;;  %v3787_v38 = vadd.f32 %v6405_v9, %v3767_v2  ;;  %v3805_v6 = vmax.f32 %v3789_v17, 0.0 }
 0x3d3   :  { %v3802_v14 = vmax.f32 %v3786_v39, 0.0  ;;  %v3788_v1 = vadd.f32 %v6405_v9, %v3768_v18  ;;  %v3790_v24 = vadd.f32 %v6405_v9, %v3770_v37  ;;  %v3791_v54 = vadd.f32 %v6405_v9, %v3771_v27 }
 0x3d4   :  { %v3812_v28 = vpack.c.bf16 %v3801_v21, %v3800_v55  ;;  %v3803_v10 = vmax.f32 %v3787_v38, 0.0 }
 0x3d5   :  { %v3804_v49 = vmax.f32 %v3788_v1, 0.0  ;;  %v3806_v34 = vmax.f32 %v3790_v24, 0.0  ;;  %v3807_v7 = vmax.f32 %v3791_v54, 0.0 }
 0x3d6   :  { %v3813_v31 = vpack.c.bf16 %v3803_v10, %v3802_v14 }
 0x3d7   :  { %4774 = vmatmul.mubr.msk.bf16.gmra.mrb[36].mxu0 %vm237_vm0, %v3811_v36  ;;  %v3814_v5 = vpack.c.bf16 %v3805_v6, %v3804_v49  ;;  %v3815_v61 = vpack.c.bf16 %v3807_v7, %v3806_v34 }
 0x3d8   :  { %4777 = vmatprep.mubr.msk.bf16.mxu0 %vm237_vm0, %v3812_v28 }
 0x3df   :  { %4778 = vmatmul.mubr.msk.bf16.gmra.mrb[40].mxu0 %vm237_vm0, %v3813_v31 }
 0x3e0   :  { %4781 = vmatprep.mubr.msk.bf16.mxu0 %vm237_vm0, %v3814_v5 }
 0x3e7   :  { %4782 = vmatmul.mubr.msk.bf16.gmra.mrb[44].mxu0 %vm237_vm0, %v3815_v61 }
 0x4a2   :  { %v4771_v56 = vpop.f32.mrb[32].mxu0 }
 0x4a3   :  { %v3890_v41 = vpop.f32.mrb[33].mxu0 }
 0x4a4   :  { %v4772_v0 = vpop.f32.mrb[34].mxu0 }
 0x4a5   :  { %v3893_v9 = vpop.f32.mrb[35].mxu0 }
 0x4a6   :  { %v3955_v60 = vadd.f32 %v3893_v9, %v3890_v41 }
 0x4a8   :  { %v3956_v4 = vadd.f32 %v4771_v56, %v3955_v60 }
 0x4aa   :  { %v4775_v53 = vpop.f32.mrb[36].mxu0  ;;  %v3957_v45 = vadd.f32 %v4772_v0, %v3956_v4 }
 0x4ab   :  { %v3906_v59 = vpop.f32.mrb[37].mxu0 }
 0x4ac   :  { %v3958_v52 = vadd.f32 %v3957_v45, %v3906_v59  ;;  %v4776_v23 = vpop.f32.mrb[38].mxu0 }
 0x4ad   :  { %v3909_v63 = vpop.f32.mrb[39].mxu0 }
 0x4ae   :  { %v3959_v19 = vadd.f32 %v3958_v52, %v3909_v63 }
 0x4b0   :  { %v3960_v62 = vadd.f32 %v4775_v53, %v3959_v19 }
 0x4b2   :  { %v4779_v48 = vpop.f32.mrb[40].mxu0  ;;  %v3961_v17 = vadd.f32 %v4776_v23, %v3960_v62 }
 0x4b3   :  { %v3922_v20 = vpop.f32.mrb[41].mxu0 }
 0x4b4   :  { %v3962_v15 = vadd.f32 %v3961_v17, %v3922_v20  ;;  %v4780_v47 = vpop.f32.mrb[42].mxu0 }
 0x4b5   :  { %v3925_v8 = vpop.f32.mrb[43].mxu0 }
 0x4b6   :  { %v3963_v29 = vadd.f32 %v3962_v15, %v3925_v8 }
 0x4b8   :  { %v3964_v46 = vadd.f32 %v4779_v48, %v3963_v29 }
 0x4ba   :  { %v4783_v40 = vpop.f32.mrb[44].mxu0  ;;  %v3965_v25 = vadd.f32 %v4780_v47, %v3964_v46 }
 0x4bb   :  { %v3938_v35 = vpop.f32.mrb[45].mxu0 }
 0x4bc   :  { %v3966_v42 = vadd.f32 %v3965_v25, %v3938_v35  ;;  %v4784_v58 = vpop.f32.mrb[46].mxu0 }
 0x4bd   :  { %v3941_v33 = vpop.f32.mrb[47].mxu0 }
 0x4be   :  { %v3967_v16 = vadd.f32 %v3966_v42, %v3941_v33 }
 0x4c0   :  { %v3968_v22 = vadd.f32 %v4783_v40, %v3967_v16 }
 0x4c2   :  { %v3969_v32 = vadd.f32 %v4784_v58, %v3968_v22 }
 0x4c4   :  { %v3970_v50 = vrot.slane %v3969_v32, 4 }
 0x4c6   :  { %v3971_v43 = vadd.f32 %v3970_v50, %v3969_v32 }
 0x4c8   :  { %v3972_v12 = vrot.slane %v3971_v43, 2 }
 0x4ca   :  { %v3973_v13 = vadd.f32 %v3972_v12, %v3971_v43 }
 0x4cc   :  { %v3974_v11 = vrot.slane %v3973_v13, 1 }
 0x4ce   :  { %v3975_v57 = vadd.f32 %v3974_v11, %v3973_v13  ;;  %v4419_v13 = vld [vmem:[%s6484_s4 + $0x4] ss:$0 sm:$0xff] }
 0x4d0   :  { %v3976_v3 = vmul.f32 0.0078125, %v3975_v57 }
 0x4d2   :  { %v3977_v51 = vsub.f32 %v3890_v41, %v3976_v3  ;;  %v3978_v30 = vsub.f32 %v3893_v9, %v3976_v3  ;;  %v3979_v44 = vsub.f32 %v4771_v56, %v3976_v3  ;;  %v3980_v2 = vsub.f32 %v4772_v0, %v3976_v3 }
 0x4d3   :  { %v3981_v26 = vsub.f32 %v3906_v59, %v3976_v3  ;;  %v3982_v36 = vsub.f32 %v3909_v63, %v3976_v3  ;;  %v3983_v39 = vsub.f32 %v4775_v53, %v3976_v3  ;;  %v3984_v18 = vsub.f32 %v4776_v23, %v3976_v3 }
 0x4d4   :  { %v3985_v37 = vsub.f32 %v3922_v20, %v3976_v3  ;;  %v3986_v55 = vsub.f32 %v3925_v8, %v3976_v3  ;;  %v3987_v21 = vsub.f32 %v4779_v48, %v3976_v3  ;;  %v3988_v38 = vsub.f32 %v4780_v47, %v3976_v3 }
 0x4d5   :  { %v3989_v27 = vsub.f32 %v3938_v35, %v3976_v3  ;;  %v3990_v6 = vsub.f32 %v3941_v33, %v3976_v3  ;;  %v3991_v14 = vsub.f32 %v4783_v40, %v3976_v3  ;;  %v3992_v1 = vsub.f32 %v4784_v58, %v3976_v3 }
 0x4d6   :  { %v3993_v24 = vmul.f32 %v3977_v51, %v3977_v51  ;;  %v3994_v28 = vmul.f32 %v3978_v30, %v3978_v30  ;;  %v3995_v10 = vmul.f32 %v3979_v44, %v3979_v44  ;;  %v3996_v49 = vmul.f32 %v3980_v2, %v3980_v2 }
 0x4d7   :  { %v3997_v31 = vmul.f32 %v3981_v26, %v3981_v26  ;;  %v3998_v5 = vmul.f32 %v3982_v36, %v3982_v36  ;;  %v3999_v56 = vmul.f32 %v3983_v39, %v3983_v39  ;;  %v4000_v0 = vmul.f32 %v3984_v18, %v3984_v18 }
 0x4d8   :  { %v4009_v54 = vadd.f32 %v3994_v28, %v3993_v24  ;;  %v4001_v60 = vmul.f32 %v3985_v37, %v3985_v37  ;;  %v4002_v53 = vmul.f32 %v3986_v55, %v3986_v55  ;;  %v4003_v59 = vmul.f32 %v3987_v21, %v3987_v21 }
 0x4d9   :  { %v4004_v23 = vmul.f32 %v3988_v38, %v3988_v38  ;;  %v4005_v19 = vmul.f32 %v3989_v27, %v3989_v27  ;;  %v4006_v48 = vmul.f32 %v3990_v6, %v3990_v6  ;;  %v4007_v20 = vmul.f32 %v3991_v14, %v3991_v14 }
 0x4da   :  { %v4010_v34 = vadd.f32 %v4009_v54, %v3995_v10  ;;  %v4008_v47 = vmul.f32 %v3992_v1, %v3992_v1 }
 0x4dc   :  { %v4011_v7 = vadd.f32 %v4010_v34, %v3996_v49 }
 0x4de   :  { %v4012_v61 = vadd.f32 %v4011_v7, %v3997_v31 }
 0x4e0   :  { %v4013_v41 = vadd.f32 %v4012_v61, %v3998_v5  ;;  %v4420_v61 = vld [vmem:[%s6484_s4 + $0x5] ss:$0 sm:$0xff]  ;;  %s5062_s4 = smov [#allocation8]  }
 0x4e1   :  { %s4158_s25 = sshll.u32 %s5062_s4, 4  ;;  %s4159_s25 = int_to_ptr.vmem [resolvable:$true] %s4158_s25 }
 0x4e2   :  { %v4014_v9 = vadd.f32 %v4013_v41, %v3999_v56  ;;  %v4089_v56 = vld [vmem:[#allocation3] sm:$0xff]  ;;  %s5027_s2 = scalar_lea.vmem %s4159_s25, 2048  ;;  %p5032_p3 = scmp.lt.s32.totalorder %s4159_s25, %s4159_s25 }
 0x4e3   :  { %p5028_p2 = scmp.ne.s32.totalorder %s4159_s25, %s5027_s2  ;;  %p5033_p4 = scmp.lt.s32.totalorder %s5027_s2, %s5027_s2 }
 0x4e4   :  { %v4015_v4 = vadd.f32 %v4014_v9, %v4000_v0 }
 0x4e5   :  { %p5034_p5 = por %p5033_p4, %p5032_p3 }
 0x4e6   :  { %v4016_v45 = vadd.f32 %v4015_v4, %v4001_v60  ;;  %v4090_v4 = vld [vmem:[#allocation3 + $0x8] sm:$0xff] }
 0x4e7   :  { %p5035_p6 = pnand %p5034_p5, %p5028_p2 }
 0x4e8   :  { %v4017_v52 = vadd.f32 %v4016_v45, %v4002_v53  ;;  %v4091_v53 = vld [vmem:[#allocation3 + $0x10] sm:$0xff]  ;;  %v4092_v45 = vld [vmem:[#allocation3 + $0x18] sm:$0xff] }
 0x4ea   :  { %v4018_v63 = vadd.f32 %v4017_v52, %v4003_v59 }
 0x4ec   :  { %v4019_v62 = vadd.f32 %v4018_v63, %v4004_v23 }
 0x4ee   :  { %v4020_v17 = vadd.f32 %v4019_v62, %v4005_v19  ;;  %v4093_v19 = vld [vmem:[#allocation3 + $0x20] sm:$0xff]  ;;  %v4094_v62 = vld [vmem:[#allocation3 + $0x28] sm:$0xff] }
 0x4f0   :  { %v4021_v15 = vadd.f32 %v4020_v17, %v4006_v48  ;;  %v4095_v48 = vld [vmem:[#allocation3 + $0x30] sm:$0xff] }
 0x4f2   :  { %v4022_v8 = vadd.f32 %v4021_v15, %v4007_v20 }
 0x4f4   :  { %v4023_v29 = vadd.f32 %v4022_v8, %v4008_v47  ;;  %v4096_v8 = vld [vmem:[#allocation3 + $0x38] sm:$0xff] }
 0x4f6   :  { %v4024_v46 = vrot.slane %v4023_v29, 4 }
 0x4f8   :  { %v4025_v40 = vadd.f32 %v4024_v46, %v4023_v29  ;;  %v4097_v29 = vld [vmem:[#allocation3 + $0x40] sm:$0xff]  ;;  %v4098_v46 = vld [vmem:[#allocation3 + $0x48] sm:$0xff] }
 0x4fa   :  { %v4026_v25 = vrot.slane %v4025_v40, 2 }
 0x4fc   :  { %v4027_v35 = vadd.f32 %v4026_v25, %v4025_v40 }
 0x4fe   :  { %v4028_v42 = vrot.slane %v4027_v35, 1 }
 0x500   :  { %v4029_v58 = vadd.f32 %v4028_v42, %v4027_v35 }
 0x502   :  { %v4030_v33 = vmul.f32 0.0078125, %v4029_v58  ;;  %v4099_v58 = vld [vmem:[#allocation3 + $0x50] sm:$0xff] }
 0x504   :  { %v4031_v16 = vadd.f32 1e-05, %v4030_v33  ;;  %v4100_v33 = vld [vmem:[#allocation3 + $0x58] sm:$0xff] }
 0x506   :  { %4976 = vrsqrt.f32 %v4031_v16  ;;  %v4101_v16 = vld [vmem:[#allocation3 + $0x60] sm:$0xff] }
 0x510   :  { %v4977_v22 = vpop.eup %4976 }
 0x511   :  { %v4033_v32 = vmul.f32 %v4977_v22, %v3977_v51  ;;  %v4034_v50 = vmul.f32 %v4977_v22, %v3978_v30  ;;  %v4035_v43 = vmul.f32 %v4977_v22, %v3979_v44  ;;  %v4036_v12 = vmul.f32 %v4977_v22, %v3980_v2 }
 0x512   :  { %v4037_v11 = vmul.f32 %v4977_v22, %v3981_v26  ;;  %v4038_v57 = vmul.f32 %v4977_v22, %v3982_v36  ;;  %v4039_v3 = vmul.f32 %v4977_v22, %v3983_v39  ;;  %v4040_v24 = vmul.f32 %v4977_v22, %v3984_v18 }
 0x513   :  { %v4041_v28 = vmul.f32 %v4977_v22, %v3985_v37  ;;  %v4042_v10 = vmul.f32 %v4977_v22, %v3986_v55  ;;  %v4043_v54 = vmul.f32 %v4977_v22, %v3987_v21  ;;  %v4044_v49 = vmul.f32 %v4977_v22, %v3988_v38 }
 0x514   :  { %v4045_v34 = vmul.f32 %v4977_v22, %v3989_v27  ;;  %v4046_v31 = vmul.f32 %v4977_v22, %v3990_v6  ;;  %v4047_v7 = vmul.f32 %v4977_v22, %v3991_v14  ;;  %v4048_v5 = vmul.f32 %v4977_v22, %v3992_v1  ;;  %v4102_v22 = vld [vmem:[#allocation3 + $0x68] sm:$0xff] }
 0x515   :  { %v4053_v51 = vmul.f32 %v4419_v13, %v4033_v32  ;;  %v4054_v30 = vmul.f32 %v4419_v13, %v4034_v50  ;;  %v4055_v44 = vmul.f32 %v4419_v13, %v4035_v43  ;;  %v4056_v2 = vmul.f32 %v4419_v13, %v4036_v12  ;;  %v4103_v32 = vld [vmem:[#allocation3 + $0x70] sm:$0xff]  ;;  %v4104_v50 = vld [vmem:[#allocation3 + $0x78] sm:$0xff] }
 0x516   :  { %v4057_v26 = vmul.f32 %v4419_v13, %v4037_v11  ;;  %v4058_v36 = vmul.f32 %v4419_v13, %v4038_v57  ;;  %v4059_v39 = vmul.f32 %v4419_v13, %v4039_v3  ;;  %v4060_v18 = vmul.f32 %v4419_v13, %v4040_v24 }
 0x517   :  { %v4061_v37 = vmul.f32 %v4419_v13, %v4041_v28  ;;  %v4062_v55 = vmul.f32 %v4419_v13, %v4042_v10  ;;  %v4063_v21 = vmul.f32 %v4419_v13, %v4043_v54  ;;  %v4064_v38 = vmul.f32 %v4419_v13, %v4044_v49 }
 0x518   :  { %v4065_v27 = vmul.f32 %v4419_v13, %v4045_v34  ;;  %v4066_v6 = vmul.f32 %v4419_v13, %v4046_v31  ;;  %v4067_v14 = vmul.f32 %v4419_v13, %v4047_v7  ;;  %v4068_v1 = vmul.f32 %v4419_v13, %v4048_v5 }
 0x519   :  { %v4073_v41 = vadd.f32 %v4420_v61, %v4053_v51  ;;  %v4074_v0 = vadd.f32 %v4420_v61, %v4054_v30  ;;  %v4075_v9 = vadd.f32 %v4420_v61, %v4055_v44  ;;  %v4076_v60 = vadd.f32 %v4420_v61, %v4056_v2 }
 0x51a   :  { %v4077_v59 = vadd.f32 %v4420_v61, %v4057_v26  ;;  %v4078_v52 = vadd.f32 %v4420_v61, %v4058_v36  ;;  %v4079_v23 = vadd.f32 %v4420_v61, %v4059_v39  ;;  %v4080_v63 = vadd.f32 %v4420_v61, %v4060_v18 }
 0x51b   :  { %v4081_v17 = vadd.f32 %v4420_v61, %v4061_v37  ;;  %v4082_v20 = vadd.f32 %v4420_v61, %v4062_v55  ;;  %v4083_v15 = vadd.f32 %v4420_v61, %v4063_v21  ;;  %v4084_v47 = vadd.f32 %v4420_v61, %v4064_v38 }
 0x51c   :  { %v4085_v40 = vadd.f32 %v4420_v61, %v4065_v27  ;;  %v4086_v25 = vadd.f32 %v4420_v61, %v4066_v6  ;;  %v4087_v35 = vadd.f32 %v4420_v61, %v4067_v14  ;;  %v4088_v42 = vadd.f32 %v4420_v61, %v4068_v1 }
 0x51d   :  { %v4105_v43 = vadd.f32 %v4089_v56, %v4073_v41  ;;  %v4106_v12 = vadd.f32 %v4090_v4, %v4074_v0  ;;  %v4107_v13 = vadd.f32 %v4091_v53, %v4075_v9  ;;  %v4108_v11 = vadd.f32 %v4092_v45, %v4076_v60 }
 0x51e   :  { %v4109_v57 = vadd.f32 %v4093_v19, %v4077_v59  ;;  %v4110_v3 = vadd.f32 %v4094_v62, %v4078_v52  ;;  %v4111_v24 = vadd.f32 %v4095_v48, %v4079_v23  ;;  %v4112_v28 = vadd.f32 %v4096_v8, %v4080_v63 }
 0x51f   :  { %v4113_v10 = vadd.f32 %v4097_v29, %v4081_v17  ;;  %v4114_v54 = vadd.f32 %v4098_v46, %v4082_v20  ;;  %v4115_v49 = vadd.f32 %v4099_v58, %v4083_v15  ;;  %v4116_v34 = vadd.f32 %v4100_v33, %v4084_v47 }
 0x520   :  { %v4117_v31 = vadd.f32 %v4101_v16, %v4085_v40  ;;  %v4118_v7 = vadd.f32 %v4102_v22, %v4086_v25  ;;  %v4119_v5 = vadd.f32 %v4103_v32, %v4087_v35  ;;  %v4120_v51 = vadd.f32 %v4104_v50, %v4088_v42 }
 0x521   :  { %v4121_v30 = vmax.f32 %v4105_v43, 0.0  ;;  %v4122_v44 = vmax.f32 %v4106_v12, 0.0  ;;  %v4123_v2 = vmax.f32 %v4107_v13, 0.0  ;;  %v4124_v61 = vmax.f32 %v4108_v11, 0.0 }
 0x522   :  { %v4125_v26 = vmax.f32 %v4109_v57, 0.0  ;;  %v4126_v36 = vmax.f32 %v4110_v3, 0.0  ;;  %v4127_v39 = vmax.f32 %v4111_v24, 0.0  ;;  %v4128_v18 = vmax.f32 %v4112_v28, 0.0 }
 0x523   :  { %v4129_v37 = vmax.f32 %v4113_v10, 0.0  ;;  %v4130_v55 = vmax.f32 %v4114_v54, 0.0  ;;  %v4131_v21 = vmax.f32 %v4115_v49, 0.0  ;;  %v4132_v38 = vmax.f32 %v4116_v34, 0.0  ;;  %4137 = vst [vmem:[#allocation8] sm:$0xff] %v4121_v30  ;;  %4138 = vst [vmem:[#allocation8 + $0x8] sm:$0xff] %v4122_v44 }
 0x524   :  { %4139 = vst [vmem:[#allocation8 + $0x10] sm:$0xff] %v4123_v2  ;;  %4140 = vst [vmem:[#allocation8 + $0x18] sm:$0xff] %v4124_v61  ;;  %v4133_v27 = vmax.f32 %v4117_v31, 0.0  ;;  %v4134_v6 = vmax.f32 %v4118_v7, 0.0  ;;  %v4135_v14 = vmax.f32 %v4119_v5, 0.0  ;;  %v4136_v1 = vmax.f32 %v4120_v51, 0.0 }
 0x525   :  { %4141 = vst [vmem:[#allocation8 + $0x20] sm:$0xff] %v4125_v26  ;;  %4142 = vst [vmem:[#allocation8 + $0x28] sm:$0xff] %v4126_v36 }
 0x526   :  { %4143 = vst [vmem:[#allocation8 + $0x30] sm:$0xff] %v4127_v39  ;;  %4144 = vst [vmem:[#allocation8 + $0x38] sm:$0xff] %v4128_v18 }
 0x527   :  { %4145 = vst [vmem:[#allocation8 + $0x40] sm:$0xff] %v4129_v37  ;;  %4146 = vst [vmem:[#allocation8 + $0x48] sm:$0xff] %v4130_v55 }
 0x528   :  { %4147 = vst [vmem:[#allocation8 + $0x50] sm:$0xff] %v4131_v21  ;;  %4148 = vst [vmem:[#allocation8 + $0x58] sm:$0xff] %v4132_v38 }
 0x529   :  { %4149 = vst [vmem:[#allocation8 + $0x60] sm:$0xff] %v4133_v27  ;;  %4150 = vst [vmem:[#allocation8 + $0x68] sm:$0xff] %v4134_v6 }
 0x52a   :  { %4151 = vst [vmem:[#allocation8 + $0x70] sm:$0xff] %v4135_v14  ;;  %4152 = vst [vmem:[#allocation8 + $0x78] sm:$0xff] %v4136_v1 }
 0x52b   :  { %5038 = shalt.err (!%p5035_p6)
}
 0x52c   :  { %s5039_s30 = scalar_lea.hbm %s6485_s5, 2048 }
 0x52d   :  { %p5040_p7 = scmp.ne.s32.totalorder %s6485_s5, %s5039_s30  ;;  %p5043_p8 = scmp.lt.u32.totalorder %s5039_s30, %s6485_s5 }
 0x52f   :  { %p5045_p9 = pnand %p5043_p8, %p5040_p7 }
 0x531   :  { %5048 = shalt.err (!%p5045_p9)
}
 0x532   :  { %4164 = dma.vmem_to_hbm [thread:$0]  %s4159_s25, 2048, %s6485_s5, [#allocation5], %s5056_s28, %s5056_s28, %s5057_s29  }
 0x533   :  { %5053 = dma.done.wait [#allocation5], 2048  }
 0x534   :  { %5054 = vsyncadd [#allocation5], 4294965248 }
 0x535   :  { %4168 = vsyncpa [#allocation4], 1 }
 0x536   :  { %4169 = vsyncpa [#allocation7], 1 }
 0x537   :  { %4170 = vsyncpa [#allocation5], 1 }

</bundles_post_ra>
